<compile_context>
chip_gen: v5e
topology: v5e:2x2
jax: 0.10.0
libtpu: 0.0.40
codegen_flags: <defaults>
</compile_context>

<pallas_src>
import functools

import jax
import jax.numpy as jnp
from jax.experimental import pallas as pl
from jax.experimental.pallas import tpu as pltpu


def _vmem_capacity_bytes():
    """Per-core VMEM capacity; conservative (v7x-sized) fallback if the query fails."""
    try:
        return int(pltpu.get_tpu_info().vmem_capacity_bytes)
    except Exception:
        return 64 * 1024 * 1024


def _aligned_ks(H, W, align, N):
    """k (k | H) such that the tile k*W is `align`-aligned or the full extent N."""
    return [k for k in range(1, H + 1)
            if H % k == 0 and ((k * W) % align == 0 or k * W == N)]


def _choose_tiles(H, W, A, out_itemsize, max_rows, max_cols, budget):
    """Pick (TR, TC): multiples of W dividing N, lane/sublane aligned, VMEM-bounded."""
    N = H * W

    def vmem_cost(tr, tc):
        # Everything double-buffered by the pipeline:
        #   pattern (A, W, tc) f32  +  output tile (tr, tc)  +  h2 row padded to (8, tc) i32
        return 2 * (4 * A * W * tc + out_itemsize * tr * tc + 4 * 8 * tc)

    col_ks = _aligned_ks(H, W, 128, N)   # lane-dense columns -> unmasked vst
    row_ks = _aligned_ks(H, W, 8, N)     # sublane-aligned rows
    min_tr = min(row_ks) * W

    col_cands = [k for k in col_ks
                 if k * W <= max_cols and vmem_cost(min_tr, k * W) <= budget]
    tc = (max(col_cands) if col_cands else min(col_ks)) * W
    # TODO(synk): for awkward (H, W) where only the full-width tile is lane-alignable and it
    # blows the budget, pad N up to a multiple of 128 instead of this fallback.

    row_cands = [k for k in row_ks if k * W <= max_rows and vmem_cost(k * W, tc) <= budget]
    if not row_cands:
        row_cands = [k for k in row_ks if vmem_cost(k * W, tc) <= budget] or [min(row_ks)]
    # Prefer >= 2 row tiles (leading grid axis) so megacore / 2-TC sharding stays balanced.
    multi = [k for k in row_cands if k * W <= N // 2]
    tr = (max(multi) if multi else max(row_cands)) * W
    return tr, tc


def _make_kernel(TR, TC, W, R, A):
    hb_r = TR // W   # distinct h1 values per row tile
    hb_c = TC // W   # distinct h2 values per column tile

    def kernel(p_ref, h2_ref, out_ref):
        i = pl.program_id(0)
        j = pl.program_id(1)
        # h1 / h2 ranges covered by this output tile (scalar math only).
        h1_lo = i * hb_r
        h1_hi = h1_lo + (hb_r - 1)
        h2_lo = j * hb_c
        h2_hi = h2_lo + (hb_c - 1)
        on_band = jnp.logical_and(h2_hi >= h1_lo - R, h2_lo <= h1_hi + R)

        @pl.when(jnp.logical_not(on_band))
        def _():
            # Tile entirely outside the |h2-h1| <= R band: pure zero store.
            out_ref[...] = jnp.zeros_like(out_ref)

        @pl.when(on_band)
        def _():
            h2 = h2_ref[...]                       # (1, TC) int32, loaded once per tile

            def row_block(rb, carry):
                h1 = i * hb_r + rb                 # scalar
                dh = h2 - h1                       # (1, TC) int32
                acc = jnp.zeros((W, TC), jnp.float32)
                # The A dh-values are disjoint, so the select chain is exact; the (1, TC)
                # mask is broadcast across the W sublanes of the W-periodic pattern slab.
                for a in range(A):
                    acc = jnp.where(dh == (a - R), p_ref[a], acc)
                r0 = pl.multiple_of(rb * W, W)
                out_ref[pl.ds(r0, W), :] = acc.astype(out_ref.dtype)
                return carry

            jax.lax.fori_loop(0, hb_r, row_block, None)

    return kernel


@functools.partial(
    jax.jit,
    static_argnames=("feat_shape", "pos_bias_radius", "max_tile_rows",
                     "max_tile_cols", "out_dtype"),
)
def sliding_pos_biases(biases, feat_shape, pos_bias_radius,
                       max_tile_rows=4096, max_tile_cols=65536,
                       out_dtype=jnp.float32):
    """Pallas implementation of SlidingPosBiases.forward for pos_dim == 2.

    Args:
      biases: f32[(2R+1), (2R+1)] learnable bias table.
      feat_shape: (H, W) spatial shape of the feature map.
      pos_bias_radius: R.
      out_dtype: output dtype (f32 matches the module; bf16 halves store bytes on v5e).
    Returns:
      out_dtype[(H*W), (H*W)] positional bias matrix.
    """
    H, W = feat_shape
    R = pos_bias_radius
    A = 2 * R + 1
    N = H * W
    out_itemsize = jnp.dtype(out_dtype).itemsize

    vmem_cap = _vmem_capacity_bytes()
    budget = vmem_cap // 4          # 32 MiB on v5e/v6e, 16 MiB on v7x
    TR, TC = _choose_tiles(H, W, A, out_itemsize, max_tile_rows, max_tile_cols, budget)
    grid = (N // TR, N // TC)

    biases = biases.astype(jnp.float32)

    # A Toeplitz W x W column patterns, tiled along columns only (W-periodic in rows);
    # constant index_map keeps the (A, W, TC) slab resident in VMEM.
    w = jnp.arange(W)
    dw = w[None, :] - w[:, None]                               # (W, W): w2 - w1
    tmat = jnp.where((jnp.abs(dw) <= R)[None, :, :],
                     biases[:, jnp.clip(dw + R, 0, 2 * R)],
                     jnp.float32(0.0))                         # (A, W, W)
    pattern = jnp.tile(tmat, (1, 1, TC // W))                  # (A, W, TC)

    # h2 (= row index of the feature position) for every output column.
    h2_of_col = (jnp.arange(N, dtype=jnp.int32) // W).reshape(1, N)

    kernel = _make_kernel(TR, TC, W, R, A)

    # VMEM model consistent with the actual buffering (see _choose_tiles.vmem_cost).
    needed = 2 * (4 * A * W * TC + out_itemsize * TR * TC + 4 * 8 * TC)
    vmem_limit = int(min(max(needed + (4 << 20), 8 << 20), (vmem_cap * 9) // 10))
    vmem_limit = max(vmem_limit, needed + (2 << 20))   # never below the chosen tiles

    out = pl.pallas_call(
        kernel,
        out_shape=jax.ShapeDtypeStruct((N, N), out_dtype),
        grid_spec=pltpu.PrefetchScalarGridSpec(
            num_scalar_prefetch=0,
            grid=grid,
            in_specs=[
                pl.BlockSpec((A, W, TC), lambda i, j: (0, 0, 0)),   # resident pattern
                pl.BlockSpec((1, TC), lambda i, j: (0, j)),         # h2 per column
            ],
            out_specs=pl.BlockSpec((TR, TC), lambda i, j: (i, j)),
        ),
        compiler_params=pltpu.CompilerParams(
            dimension_semantics=("parallel", "parallel"),
            vmem_limit_bytes=vmem_limit,
        ),
    )(pattern, h2_of_col)
    return out


def reference_sliding_pos_biases(biases, feat_shape, R):
    """Plain-JAX reference mirroring the PyTorch scatter + slice + reshape."""
    H, W = feat_shape
    h1 = jnp.arange(H)[:, None, None, None]
    w1 = jnp.arange(W)[None, :, None, None]
    h2 = jnp.arange(H)[None, None, :, None]
    w2 = jnp.arange(W)[None, None, None, :]
    dh = h2 - h1
    dw = w2 - w1
    inside = (jnp.abs(dh) <= R) & (jnp.abs(dw) <= R)
    ih = jnp.clip(dh + R, 0, 2 * R)
    iw = jnp.clip(dw + R, 0, 2 * R)
    vals = biases[ih, iw]
    full = jnp.where(inside, vals, 0.0)
    return full.reshape(H * W, H * W)


if __name__ == "__main__":
    key = jax.random.PRNGKey(0)

    # Test 1: small, module-consistent configuration (H=W=16, R=3).
    R = 3
    H, W = 16, 16
    biases = jax.random.normal(key, (2 * R + 1, 2 * R + 1), dtype=jnp.float32)
    out = jax.block_until_ready(sliding_pos_biases(biases, (H, W), R))
    ref = reference_sliding_pos_biases(biases, (H, W), R)
    assert out.shape == (H * W, H * W) and out.dtype == jnp.float32
    assert jnp.allclose(out, ref, atol=1e-6, rtol=1e-6)

    # Test 2: module-default radius R=7, non-square H != W.
    R2, H2, W2 = 7, 24, 16
    biases2 = jax.random.normal(jax.random.fold_in(key, 1),
                                (2 * R2 + 1, 2 * R2 + 1), dtype=jnp.float32)
    out2 = jax.block_until_ready(sliding_pos_biases(biases2, (H2, W2), R2))
    ref2 = reference_sliding_pos_biases(biases2, (H2, W2), R2)
    assert jnp.allclose(out2, ref2, atol=1e-6, rtol=1e-6)

    # Test 3: force row+column tiling so the off-band zero-store path is exercised.
    R3, H3, W3 = 2, 32, 16
    biases3 = jax.random.normal(jax.random.fold_in(key, 2),
                                (2 * R3 + 1, 2 * R3 + 1), dtype=jnp.float32)
    out3 = jax.block_until_ready(
        sliding_pos_biases(biases3, (H3, W3), R3, max_tile_rows=64, max_tile_cols=128))
    ref3 = reference_sliding_pos_biases(biases3, (H3, W3), R3)
    assert jnp.allclose(out3, ref3, atol=1e-6, rtol=1e-6)

    print("KERNEL_OK")
</pallas_src>

<mosaic_0001>
module attributes {stable_mosaic.version = 11 : i64} {
  func.func @kernel(%arg0: i32, %arg1: i32, %arg2: memref<7x16x256xf32, #tpu.memory_space<vmem>>, %arg3: memref<1x256xi32, #tpu.memory_space<vmem>>, %arg4: memref<128x256xf32, #tpu.memory_space<vmem>>) attributes {dimension_semantics = [#tpu.dimension_semantics<parallel>, #tpu.dimension_semantics<parallel>], iteration_bounds = array<i64: 2, 1>, scalar_prefetch = 0 : i64, scratch_operands = 0 : i64, tpu.core_type = #tpu.core_type<tc>, window_params = [{pipeline_mode = #tpu.pipeline_mode<synchronous>, transform_indices = @transform_0, window_bounds = array<i64: 7, 16, 256>}, {transform_indices = @transform_1, window_bounds = array<i64: 1, 256>}, {transform_indices = @transform_2, window_bounds = array<i64: 128, 256>}]} {
    %c8_i32 = arith.constant 8 : i32
    %0 = arith.muli %arg0, %c8_i32 : i32
    %c7_i32 = arith.constant 7 : i32
    %1 = arith.addi %0, %c7_i32 : i32
    %c16_i32 = arith.constant 16 : i32
    %2 = arith.muli %arg1, %c16_i32 : i32
    %c15_i32 = arith.constant 15 : i32
    %3 = arith.addi %2, %c15_i32 : i32
    %c3_i32 = arith.constant 3 : i32
    %4 = arith.subi %0, %c3_i32 : i32
    %5 = arith.cmpi sge, %3, %4 : i32
    %c3_i32_0 = arith.constant 3 : i32
    %6 = arith.addi %1, %c3_i32_0 : i32
    %7 = arith.cmpi sle, %2, %6 : i32
    %8 = arith.andi %5, %7 : i1
    %true = arith.constant true
    %9 = arith.xori %8, %true : i1
    %10 = arith.extui %9 : i1 to i32
    %c0_i32 = arith.constant 0 : i32
    %11 = arith.cmpi ne, %10, %c0_i32 : i32
    scf.if %11 {
      %cst = arith.constant 0.000000e+00 : f32
      %14 = vector.broadcast %cst : f32 to vector<128x256xf32>
      %c0 = arith.constant 0 : index
      %c0_2 = arith.constant 0 : index
      %15 = vector.load %arg4[%c0, %c0_2] : memref<128x256xf32, #tpu.memory_space<vmem>>, vector<128x256xf32>
      tpu.vector_store %arg4[%c0, %c0_2], %14 {strides = array<i32>} : memref<128x256xf32, #tpu.memory_space<vmem>>, vector<128x256xf32>,
    } else {
    }
    %12 = arith.extui %8 : i1 to i32
    %c0_i32_1 = arith.constant 0 : i32
    %13 = arith.cmpi ne, %12, %c0_i32_1 : i32
    scf.if %13 {
      %c0 = arith.constant 0 : index
      %c0_2 = arith.constant 0 : index
      %14 = vector.load %arg3[%c0, %c0_2] : memref<1x256xi32, #tpu.memory_space<vmem>>, vector<1x256xi32>
      %c0_i32_3 = arith.constant 0 : i32
      %c8_i32_4 = arith.constant 8 : i32
      %15 = arith.addi %c0_i32_3, %c8_i32_4 : i32
      %c1_i32 = arith.constant 1 : i32
      scf.for %arg5 = %c0_i32_3 to %15 step %c1_i32  : i32 {
        %c8_i32_6 = arith.constant 8 : i32
        %16 = arith.muli %arg0, %c8_i32_6 : i32
        %17 = arith.addi %16, %arg5 : i32
        %18 = vector.broadcast %17 : i32 to vector<1x256xi32>
        %19 = arith.subi %14, %18 : vector<1x256xi32>
        %cst = arith.constant 0.000000e+00 : f32
        %20 = vector.broadcast %cst : f32 to vector<16x256xf32>
        %c-3_i32 = arith.constant -3 : i32
        %21 = vector.broadcast %c-3_i32 : i32 to vector<1x256xi32>
        %22 = arith.cmpi eq, %19, %21 : vector<1x256xi32>
        %c0_7 = arith.constant 0 : index
        %c0_8 = arith.constant 0 : index
        %c0_9 = arith.constant 0 : index
        %23 = vector.load %arg2[%c0_7, %c0_8, %c0_9] : memref<7x16x256xf32, #tpu.memory_space<vmem>>, vector<1x16x256xf32>
        %24 = vector.shape_cast %23 : vector<1x16x256xf32> to vector<16x256xf32>
        %25 = vector.shape_cast %22 : vector<1x256xi1> to vector<1x256xi1>
        %26 = vector.broadcast %25 : vector<1x256xi1> to vector<16x256xi1>
        %27 = arith.select %26, %24, %20 : vector<16x256xi1>, vector<16x256xf32>
        %c-2_i32 = arith.constant -2 : i32
        %28 = vector.broadcast %c-2_i32 : i32 to vector<1x256xi32>
        %29 = arith.cmpi eq, %19, %28 : vector<1x256xi32>
        %c1 = arith.constant 1 : index
        %c0_10 = arith.constant 0 : index
        %c0_11 = arith.constant 0 : index
        %30 = vector.load %arg2[%c1, %c0_10, %c0_11] : memref<7x16x256xf32, #tpu.memory_space<vmem>>, vector<1x16x256xf32>
        %31 = vector.shape_cast %30 : vector<1x16x256xf32> to vector<16x256xf32>
        %32 = vector.shape_cast %29 : vector<1x256xi1> to vector<1x256xi1>
        %33 = vector.broadcast %32 : vector<1x256xi1> to vector<16x256xi1>
        %34 = arith.select %33, %31, %27 : vector<16x256xi1>, vector<16x256xf32>
        %c-1_i32 = arith.constant -1 : i32
        %35 = vector.broadcast %c-1_i32 : i32 to vector<1x256xi32>
        %36 = arith.cmpi eq, %19, %35 : vector<1x256xi32>
        %c2 = arith.constant 2 : index
        %c0_12 = arith.constant 0 : index
        %c0_13 = arith.constant 0 : index
        %37 = vector.load %arg2[%c2, %c0_12, %c0_13] : memref<7x16x256xf32, #tpu.memory_space<vmem>>, vector<1x16x256xf32>
        %38 = vector.shape_cast %37 : vector<1x16x256xf32> to vector<16x256xf32>
        %39 = vector.shape_cast %36 : vector<1x256xi1> to vector<1x256xi1>
        %40 = vector.broadcast %39 : vector<1x256xi1> to vector<16x256xi1>
        %41 = arith.select %40, %38, %34 : vector<16x256xi1>, vector<16x256xf32>
        %c0_i32_14 = arith.constant 0 : i32
        %42 = vector.broadcast %c0_i32_14 : i32 to vector<1x256xi32>
        %43 = arith.cmpi eq, %19, %42 : vector<1x256xi32>
        %c3 = arith.constant 3 : index
        %c0_15 = arith.constant 0 : index
        %c0_16 = arith.constant 0 : index
        %44 = vector.load %arg2[%c3, %c0_15, %c0_16] : memref<7x16x256xf32, #tpu.memory_space<vmem>>, vector<1x16x256xf32>
        %45 = vector.shape_cast %44 : vector<1x16x256xf32> to vector<16x256xf32>
        %46 = vector.shape_cast %43 : vector<1x256xi1> to vector<1x256xi1>
        %47 = vector.broadcast %46 : vector<1x256xi1> to vector<16x256xi1>
        %48 = arith.select %47, %45, %41 : vector<16x256xi1>, vector<16x256xf32>
        %c1_i32_17 = arith.constant 1 : i32
        %49 = vector.broadcast %c1_i32_17 : i32 to vector<1x256xi32>
        %50 = arith.cmpi eq, %19, %49 : vector<1x256xi32>
        %c4 = arith.constant 4 : index
        %c0_18 = arith.constant 0 : index
        %c0_19 = arith.constant 0 : index
        %51 = vector.load %arg2[%c4, %c0_18, %c0_19] : memref<7x16x256xf32, #tpu.memory_space<vmem>>, vector<1x16x256xf32>
        %52 = vector.shape_cast %51 : vector<1x16x256xf32> to vector<16x256xf32>
        %53 = vector.shape_cast %50 : vector<1x256xi1> to vector<1x256xi1>
        %54 = vector.broadcast %53 : vector<1x256xi1> to vector<16x256xi1>
        %55 = arith.select %54, %52, %48 : vector<16x256xi1>, vector<16x256xf32>
        %c2_i32 = arith.constant 2 : i32
        %56 = vector.broadcast %c2_i32 : i32 to vector<1x256xi32>
        %57 = arith.cmpi eq, %19, %56 : vector<1x256xi32>
        %c5 = arith.constant 5 : index
        %c0_20 = arith.constant 0 : index
        %c0_21 = arith.constant 0 : index
        %58 = vector.load %arg2[%c5, %c0_20, %c0_21] : memref<7x16x256xf32, #tpu.memory_space<vmem>>, vector<1x16x256xf32>
        %59 = vector.shape_cast %58 : vector<1x16x256xf32> to vector<16x256xf32>
        %60 = vector.shape_cast %57 : vector<1x256xi1> to vector<1x256xi1>
        %61 = vector.broadcast %60 : vector<1x256xi1> to vector<16x256xi1>
        %62 = arith.select %61, %59, %55 : vector<16x256xi1>, vector<16x256xf32>
        %c3_i32_22 = arith.constant 3 : i32
        %63 = vector.broadcast %c3_i32_22 : i32 to vector<1x256xi32>
        %64 = arith.cmpi eq, %19, %63 : vector<1x256xi32>
        %c6 = arith.constant 6 : index
        %c0_23 = arith.constant 0 : index
        %c0_24 = arith.constant 0 : index
        %65 = vector.load %arg2[%c6, %c0_23, %c0_24] : memref<7x16x256xf32, #tpu.memory_space<vmem>>, vector<1x16x256xf32>
        %66 = vector.shape_cast %65 : vector<1x16x256xf32> to vector<16x256xf32>
        %67 = vector.shape_cast %64 : vector<1x256xi1> to vector<1x256xi1>
        %68 = vector.broadcast %67 : vector<1x256xi1> to vector<16x256xi1>
        %69 = arith.select %68, %66, %62 : vector<16x256xi1>, vector<16x256xf32>
        %c16_i32_25 = arith.constant 16 : i32
        %70 = arith.muli %arg5, %c16_i32_25 : i32
        %71 = tpu.assume_multiple %70, 16 : i32
        %72 = arith.index_cast %71 : i32 to index
        %c0_26 = arith.constant 0 : index
        %73 = vector.load %arg4[%72, %c0_26] : memref<128x256xf32, #tpu.memory_space<vmem>>, vector<16x256xf32>
        tpu.vector_store %arg4[%72, %c0_26], %69 {strides = array<i32>} : memref<128x256xf32, #tpu.memory_space<vmem>>, vector<16x256xf32>,
      }
      %c8_i32_5 = arith.constant 8 : i32
    } else {
    }
    return
  }
  func.func @transform_0(%arg0: i32, %arg1: i32) -> (i32, i32, i32) {
    %c0_i32 = arith.constant 0 : i32
    %c0_i32_0 = arith.constant 0 : i32
    %c0_i32_1 = arith.constant 0 : i32
    %c0_i32_2 = arith.constant 0 : i32
    return %c0_i32, %c0_i32_0, %c0_i32_1 : i32, i32, i32
  }
  func.func @transform_1(%arg0: i32, %arg1: i32) -> (i32, i32) {
    %c0_i32 = arith.constant 0 : i32
    %c0_i32_0 = arith.constant 0 : i32
    return %c0_i32, %arg1 : i32, i32
  }
  func.func @transform_2(%arg0: i32, %arg1: i32) -> (i32, i32) {
    %c0_i32 = arith.constant 0 : i32
    return %arg0, %arg1 : i32, i32
  }
}

</mosaic_0001>

<bundles_post_ra>
// kernel: tile.9
= control target key start
LH: loop header
LB: loop body
LE: loop exit
PB: predicated region body
PF: predicated region fallthrough
CT: control target
= control target key end

     0   :  { %s420_s6 = smov 3  ;;  %s423_s7 = smov 12  ;;  %vm425_vm0 = vcmask 1043458   ;;  %vm430_vm1 = vcmask 1045508   ;;  %vm435_vm2 = vcmask 1047558   ;;  %vm4_vm3 = vcmask 1047556   ;;  %s11042_s0 = inlined_call_operand.vmem [shape: f32[7,16,16,16], index: 0, kind: input, shape index: {}]   ;;  %s11043_s1 = inlined_call_operand.vmem [shape: f32[7,16,256], index: 1, kind: output, shape index: {}]  }
   0x1   :  { %v5085_v0 = vld [vmem:[%s11042_s0 + $0x7] ss:$16 sm:%s420_s6]   ;;  %s428_s12 = smov 48  ;;  %s433_s13 = smov 192  ;;  %vm6_vm4 = vcmask 130048   ;;  %vm439_vm5 = vcmask 1048448  }
   0x2   :  { %v5086_v1 = vld [vmem:[%s11042_s0 + $0x7] ss:$16 sm:%s423_s7]   ;;  %s465_s18 = smov 3  ;;  %s468_s21 = smov 12  ;;  %vm1082_vm6 = vcmask 917248   ;;  %vm1725_vm7 = vcmask 786048  }
   0x3   :  { %v426_v2 = vsel %vm425_vm0, %v5086_v1, %v5085_v0  ;;  %v5087_v3 = vld [vmem:[%s11042_s0 + $0x7] ss:$16 sm:%s428_s12]   ;;  %s473_s22 = smov 48  ;;  %s478_s27 = smov 192  ;;  %vm2368_vm8 = vcmask 654848   ;;  %vm3011_vm9 = vcmask 523648  }
   0x4   :  { %v5088_v4 = vld [vmem:[%s11042_s0 + $0x7] ss:$16 sm:%s433_s13]   ;;  %v431_v5 = vsel %vm430_vm1, %v5087_v3, %v426_v2  ;;  %s442_s28 = smov 3  ;;  %s6065_s29 = smov 112   ;;  %vm3654_vm10 = vcmask 392448   ;;  %vm4297_vm11 = vcmask 261248  }
   0x5   :  { %v5094_v6 = vld [vmem:[%s11042_s0 + $0x207] ss:$16 sm:%s465_s18]   ;;  %v436_v7 = vsel %vm435_vm2, %v5088_v4, %v431_v5  ;;  %s445_s3 = smov 12  ;;  %s450_s4 = smov 48 }
   0x6   :  { %v5095_v8 = vld [vmem:[%s11042_s0 + $0x207] ss:$16 sm:%s468_s21]   ;;  %437 = vrot.lane.b32.xlu0 %v436_v7, %s6065_s29  ;;  %s455_s9 = smov 192  ;;  %s488_s10 = smov 3 }
   0x7   :  { %v5096_v9 = vld [vmem:[%s11042_s0 + $0x207] ss:$16 sm:%s473_s22]   ;;  %v471_v10 = vsel %vm425_vm0, %v5095_v8, %v5094_v6  ;;  %s491_s15 = smov 12  ;;  %s496_s16 = smov 48 }
   0x8   :  { %v5097_v11 = vld [vmem:[%s11042_s0 + $0x207] ss:$16 sm:%s478_s27]   ;;  %v476_v12 = vsel %vm430_vm1, %v5096_v9, %v471_v10  ;;  %s501_s19 = smov 192  ;;  %s557_s20 = smov 3 }
   0x9   :  { %v5089_v13 = vld [vmem:[%s11042_s0 + $0x107] ss:$16 sm:%s442_s28]   ;;  %v481_v15 = vsel %vm435_vm2, %v5097_v11, %v476_v12  ;;  %s560_s25 = smov 12  ;;  %s565_s26 = smov 48 }
   0xa   :  { %v5090_v14 = vld [vmem:[%s11042_s0 + $0x107] ss:$16 sm:%s445_s3]   ;;  %482 = vrot.lane.b32.xlu1 %v481_v15, %s6065_s29  ;;  %s580_s3 = smov 3  ;;  %s583_s6 = smov 12 }
   0xb   :  { %v448_v16 = vsel %vm425_vm0, %v5090_v14, %v5089_v13  ;;  %v5091_v17 = vld [vmem:[%s11042_s0 + $0x107] ss:$16 sm:%s450_s4]   ;;  %v5119_v31 = vld [vmem:[%s11042_s0 + $0xf] ss:$16 sm:%s580_s3]   ;;  %s588_s12 = smov 48  ;;  %s629_s17 = smov 12 }
   0xc   :  { %v5092_v18 = vld [vmem:[%s11042_s0 + $0x107] ss:$16 sm:%s455_s9]   ;;  %v453_v19 = vsel %vm430_vm1, %v5091_v17, %v448_v16  ;;  %s570_s9 = smov 192  ;;  %v5120_v33 = vld [vmem:[%s11042_s0 + $0xf] ss:$16 sm:%s583_s6]   ;;  %s511_s18 = smov 3 }
   0xd   :  { %v5099_v20 = vld [vmem:[%s11042_s0 + $0x307] ss:$16 sm:%s488_s10]   ;;  %v458_v23 = vsel %vm435_vm2, %v5092_v18, %v453_v19  ;;  %v586_v36 = vsel %vm425_vm0, %v5120_v33, %v5119_v31  ;;  %v5121_v37 = vld [vmem:[%s11042_s0 + $0xf] ss:$16 sm:%s588_s12]   ;;  %s514_s23 = smov 12  ;;  %s519_s24 = smov 48 }
   0xe   :  { %v5100_v21 = vld [vmem:[%s11042_s0 + $0x307] ss:$16 sm:%s491_s15]   ;;  %459 = vrot.lane.b32.xlu0 %v458_v23, %s6065_s29  ;;  %s593_s15 = smov 192  ;;  %s634_s30 = smov 48  ;;  %v591_v43 = vsel %vm430_vm1, %v5121_v37, %v586_v36 }
   0xf   :  { %v5101_v22 = vld [vmem:[%s11042_s0 + $0x307] ss:$16 sm:%s496_s16]   ;;  %v494_v24 = vsel %vm425_vm0, %v5100_v21, %v5099_v20  ;;  %s626_s16 = smov 3  ;;  %v5122_v38 = vld [vmem:[%s11042_s0 + $0xf] ss:$16 sm:%s593_s15]   ;;  %s524_s2 = smov 192 }
  0x10   :  { %v5102_v25 = vld [vmem:[%s11042_s0 + $0x307] ss:$16 sm:%s501_s19]   ;;  %v499_v27 = vsel %vm430_vm1, %v5101_v22, %v494_v24  ;;  %v5129_v39 = vld [vmem:[%s11042_s0 + $0x20f] ss:$16 sm:%s626_s16]   ;;  %s649_s7 = smov 3  ;;  %s652_s8 = smov 12  ;;  %v596_v53 = vsel %vm435_vm2, %v5122_v38, %v591_v43 }
  0x11   :  { %v5114_v26 = vld [vmem:[%s11042_s0 + $0x607] ss:$16 sm:%s557_s20]   ;;  %v504_v32 = vsel %vm435_vm2, %v5102_v25, %v499_v27  ;;  %v5130_v40 = vld [vmem:[%s11042_s0 + $0x20f] ss:$16 sm:%s629_s17]   ;;  %s639_s15 = smov 192  ;;  %s657_s22 = smov 48 }
  0x12   :  { %v5115_v28 = vld [vmem:[%s11042_s0 + $0x607] ss:$16 sm:%s560_s25]   ;;  %505 = vrot.lane.b32.xlu1 %v504_v32, %s6065_s29  ;;  %v632_v49 = vsel %vm425_vm0, %v5130_v40, %v5129_v39  ;;  %s698_s25 = smov 12  ;;  %s534_s28 = smov 3 }
  0x13   :  { %v563_v29 = vsel %vm425_vm0, %v5115_v28, %v5114_v26  ;;  %v5116_v30 = vld [vmem:[%s11042_s0 + $0x607] ss:$16 sm:%s565_s26]   ;;  %v5131_v46 = vld [vmem:[%s11042_s0 + $0x20f] ss:$16 sm:%s634_s30]   ;;  %s537_s30 = smov 12  ;;  %s542_s6 = smov 48 }
  0x14   :  { %v568_v34 = vsel %vm430_vm1, %v5116_v30, %v563_v29  ;;  %v5117_v35 = vld [vmem:[%s11042_s0 + $0x607] ss:$16 sm:%s570_s9]   ;;  %v5134_v51 = vld [vmem:[%s11042_s0 + $0x30f] ss:$16 sm:%s649_s7]   ;;  %v637_v56 = vsel %vm430_vm1, %v5131_v46, %v632_v49  ;;  %s547_s7 = smov 192  ;;  %s703_s12 = smov 48 }
  0x15   :  { %v5104_v41 = vld [vmem:[%s11042_s0 + $0x407] ss:$16 sm:%s511_s18]   ;;  %v573_v42 = vsel %vm435_vm2, %v5117_v35, %v568_v34  ;;  %v5135_v52 = vld [vmem:[%s11042_s0 + $0x30f] ss:$16 sm:%s652_s8]   ;;  %s718_s17 = smov 3  ;;  %s721_s18 = smov 12 }
  0x16   :  { %v5105_v44 = vld [vmem:[%s11042_s0 + $0x407] ss:$16 sm:%s514_s23]   ;;  %s695_s23 = smov 3  ;;  %574 = vrot.lane.b32.xlu0 %v573_v42, %s6065_s29  ;;  %v655_v57 = vsel %vm425_vm0, %v5135_v52, %v5134_v51  ;;  %s708_s19 = smov 192 }
  0x17   :  { %v5106_v45 = vld [vmem:[%s11042_s0 + $0x407] ss:$16 sm:%s519_s24]   ;;  %v517_v47 = vsel %vm425_vm0, %v5105_v44, %v5104_v41  ;;  %s662_s24 = smov 192  ;;  %v5132_v55 = vld [vmem:[%s11042_s0 + $0x20f] ss:$16 sm:%s639_s15]   ;;  %s726_s26 = smov 48 }
  0x18   :  { %v5107_v48 = vld [vmem:[%s11042_s0 + $0x407] ss:$16 sm:%s524_s2]   ;;  %v522_v50 = vsel %vm430_vm1, %v5106_v45, %v517_v47  ;;  %v5136_v58 = vld [vmem:[%s11042_s0 + $0x30f] ss:$16 sm:%s657_s22]   ;;  %v642_v0 = vsel %vm435_vm2, %v5132_v55, %v637_v56  ;;  %s764_s3 = smov 3  ;;  %s767_s4 = smov 12 }
  0x19   :  { %v527_v54 = vsel %vm435_vm2, %v5107_v48, %v522_v50  ;;  %v5144_v59 = vld [vmem:[%s11042_s0 + $0x50f] ss:$16 sm:%s695_s23]   ;;  %v5109_v62 = vld [vmem:[%s11042_s0 + $0x507] ss:$16 sm:%s534_s28]   ;;  %v660_v1 = vsel %vm430_vm1, %v5136_v58, %v655_v57  ;;  %s606_s10 = smov 12  ;;  %s611_s11 = smov 48 }
  0x1a   :  { %528 = vrot.lane.b32.xlu2 %v527_v54, %s6065_s29  ;;  %597 = vrot.lane.b32.xlu1 %v596_v53, %s6065_s29  ;;  %v5137_v60 = vld [vmem:[%s11042_s0 + $0x30f] ss:$16 sm:%s662_s24]   ;;  %s672_s13 = smov 3  ;;  %s675_s16 = smov 12 }
  0x1b   :  { %v5145_v61 = vld [vmem:[%s11042_s0 + $0x50f] ss:$16 sm:%s698_s25]   ;;  %v5110_v63 = vld [vmem:[%s11042_s0 + $0x507] ss:$16 sm:%s537_s30]   ;;  %v665_v11 = vsel %vm435_vm2, %v5137_v60, %v660_v1  ;;  %s787_s25 = smov 3  ;;  %s777_s30 = smov 192 }
  0x1c   :  { %v540_v2 = vsel %vm425_vm0, %v5110_v63, %v5109_v62  ;;  %v5111_v3 = vld [vmem:[%s11042_s0 + $0x507] ss:$16 sm:%s542_s6]   ;;  %v5146_v5 = vld [vmem:[%s11042_s0 + $0x50f] ss:$16 sm:%s703_s12]   ;;  %v701_v7 = vsel %vm425_vm0, %v5145_v61, %v5144_v59  ;;  %s731_s12 = smov 192  ;;  %s795_s6 = smov 48 }
  0x1d   :  { %v5112_v4 = vld [vmem:[%s11042_s0 + $0x507] ss:$16 sm:%s547_s7]   ;;  %v545_v6 = vsel %vm430_vm1, %v5111_v3, %v540_v2  ;;  %v5149_v9 = vld [vmem:[%s11042_s0 + $0x60f] ss:$16 sm:%s718_s17]   ;;  %s603_s7 = smov 3  ;;  %v706_v14 = vsel %vm430_vm1, %v5146_v5, %v701_v7  ;;  %s616_s17 = smov 192 }
  0x1e   :  { %v550_v8 = vsel %vm435_vm2, %v5112_v4, %v545_v6  ;;  %v5150_v10 = vld [vmem:[%s11042_s0 + $0x60f] ss:$16 sm:%s721_s18]   ;;  %643 = vrot.lane.b32.xlu0 %v642_v0, %s6065_s29  ;;  %s772_s18 = smov 48  ;;  %s685_s20 = smov 192 }
  0x1f   :  { %v5147_v12 = vld [vmem:[%s11042_s0 + $0x50f] ss:$16 sm:%s708_s19]   ;;  %v724_v15 = vsel %vm425_vm0, %v5150_v10, %v5149_v9  ;;  %v5159_v16 = vld [vmem:[%s11042_s0 + $0x187] ss:$16 sm:%s764_s3]   ;;  %s680_s19 = smov 48  ;;  %s800_s21 = smov 192 }
  0x20   :  { %v5151_v13 = vld [vmem:[%s11042_s0 + $0x60f] ss:$16 sm:%s726_s26]   ;;  %v5160_v17 = vld [vmem:[%s11042_s0 + $0x187] ss:$16 sm:%s767_s4]   ;;  %s790_s26 = smov 12  ;;  %v711_v21 = vsel %vm435_vm2, %v5147_v12, %v706_v14  ;;  %s841_s28 = smov 48 }
  0x21   :  { %v5124_v18 = vld [vmem:[%s11042_s0 + $0x10f] ss:$16 sm:%s603_s7]   ;;  %v729_v22 = vsel %vm430_vm1, %v5151_v13, %v724_v15  ;;  %v5161_v26 = vld [vmem:[%s11042_s0 + $0x187] ss:$16 sm:%s772_s18]   ;;  %s833_s7 = smov 3  ;;  %v770_v28 = vsel %vm425_vm0, %v5160_v17, %v5159_v16  ;;  %s859_s8 = smov 12 }
  0x22   :  { %551 = vrot.lane.b32.xlu2 %v550_v8, %s6065_s29  ;;  %666 = vrot.lane.b32.xlu1 %v665_v11, %s6065_s29  ;;  %v5125_v19 = vld [vmem:[%s11042_s0 + $0x10f] ss:$16 sm:%s606_s10]   ;;  %v775_v35 = vsel %vm430_vm1, %v5161_v26, %v770_v28  ;;  %s864_s14 = smov 48  ;;  %s902_s15 = smov 3 }
  0x23   :  { %v5126_v20 = vld [vmem:[%s11042_s0 + $0x10f] ss:$16 sm:%s611_s11]   ;;  %v609_v24 = vsel %vm425_vm0, %v5125_v19, %v5124_v18  ;;  %v5164_v30 = vld [vmem:[%s11042_s0 + $0x287] ss:$16 sm:%s787_s25]   ;;  %s846_s11 = smov 192  ;;  %s749_s24 = smov 48 }
  0x24   :  { %v5152_v23 = vld [vmem:[%s11042_s0 + $0x60f] ss:$16 sm:%s731_s12]   ;;  %v614_v27 = vsel %vm430_vm1, %v5126_v20, %v609_v24  ;;  %v5165_v31 = vld [vmem:[%s11042_s0 + $0x287] ss:$16 sm:%s790_s26]   ;;  %s836_s12 = smov 12  ;;  %s905_s27 = smov 12 }
  0x25   :  { %v5127_v25 = vld [vmem:[%s11042_s0 + $0x10f] ss:$16 sm:%s616_s17]   ;;  %v734_v32 = vsel %vm435_vm2, %v5152_v23, %v729_v22  ;;  %v5162_v33 = vld [vmem:[%s11042_s0 + $0x187] ss:$16 sm:%s777_s30]   ;;  %v793_v36 = vsel %vm425_vm0, %v5165_v31, %v5164_v30  ;;  %s869_s30 = smov 192  ;;  %s810_s23 = smov 3 }
  0x26   :  { %v619_v29 = vsel %vm435_vm2, %v5127_v25, %v614_v27  ;;  %712 = vrot.lane.b32.xlu0 %v711_v21, %s6065_s29  ;;  %v5166_v34 = vld [vmem:[%s11042_s0 + $0x287] ss:$16 sm:%s795_s6]   ;;  %v780_v44 = vsel %vm435_vm2, %v5162_v33, %v775_v35  ;;  %s823_s6 = smov 192  ;;  %s882_s3 = smov 12 }
  0x27   :  { %v5174_v37 = vld [vmem:[%s11042_s0 + $0x487] ss:$16 sm:%s833_s7]   ;;  %v5139_v39 = vld [vmem:[%s11042_s0 + $0x40f] ss:$16 sm:%s672_s13]   ;;  %s856_s7 = smov 3  ;;  %v798_v45 = vsel %vm430_vm1, %v5166_v34, %v793_v36  ;;  %s887_s9 = smov 48 }
  0x28   :  { %v5175_v38 = vld [vmem:[%s11042_s0 + $0x487] ss:$16 sm:%s836_s12]   ;;  %v5140_v40 = vld [vmem:[%s11042_s0 + $0x40f] ss:$16 sm:%s675_s16]   ;;  %s928_s16 = smov 12  ;;  %s1066_s4 = smov 12 }
  0x29   :  { %v678_v41 = vsel %vm425_vm0, %v5140_v40, %v5139_v39  ;;  %v5141_v42 = vld [vmem:[%s11042_s0 + $0x40f] ss:$16 sm:%s680_s19]   ;;  %v5167_v46 = vld [vmem:[%s11042_s0 + $0x287] ss:$16 sm:%s800_s21]   ;;  %v839_v50 = vsel %vm425_vm0, %v5175_v38, %v5174_v37  ;;  %s744_s21 = smov 12  ;;  %s915_s19 = smov 192 }
  0x2a   :  { %620 = vrot.lane.b32.xlu2 %v619_v29, %s6065_s29  ;;  %735 = vrot.lane.b32.xlu1 %v734_v32, %s6065_s29  ;;  %v5142_v43 = vld [vmem:[%s11042_s0 + $0x40f] ss:$16 sm:%s685_s20]   ;;  %v683_v47 = vsel %vm430_vm1, %v5141_v42, %v678_v41  ;;  %s741_s20 = smov 3  ;;  %v803_v53 = vsel %vm435_vm2, %v5167_v46, %v798_v45  ;;  %s948_s5 = smov 3 }
  0x2b   :  { %v5176_v48 = vld [vmem:[%s11042_s0 + $0x487] ss:$16 sm:%s841_s28]   ;;  %v688_v49 = vsel %vm435_vm2, %v5142_v43, %v683_v47  ;;  %s754_s28 = smov 192  ;;  %v5189_v58 = vld [vmem:[%s11042_s0 + $0x8f] ss:$16 sm:%s902_s15]   ;;  %s925_s15 = smov 3 }
  0x2c   :  { %v5179_v51 = vld [vmem:[%s11042_s0 + $0x587] ss:$16 sm:%s856_s7]   ;;  %v844_v56 = vsel %vm430_vm1, %v5176_v48, %v839_v50  ;;  %v5190_v63 = vld [vmem:[%s11042_s0 + $0x8f] ss:$16 sm:%s905_s27]   ;;  %s971_s7 = smov 3  ;;  %s984_s27 = smov 192 }
  0x2d   :  { %v5180_v52 = vld [vmem:[%s11042_s0 + $0x587] ss:$16 sm:%s859_s8]   ;;  %s910_s8 = smov 48  ;;  %v908_v7 = vsel %vm425_vm0, %v5190_v63, %v5189_v58  ;;  %v5194_v8 = vld [vmem:[%s11042_s0 + $0x18f] ss:$16 sm:%s925_s15]   ;;  %s1040_s15 = smov 3 }
  0x2e   :  { %781 = vrot.lane.b32.xlu0 %v780_v44, %s6065_s29  ;;  %v5177_v54 = vld [vmem:[%s11042_s0 + $0x487] ss:$16 sm:%s846_s11]   ;;  %v862_v57 = vsel %vm425_vm0, %v5180_v52, %v5179_v51  ;;  %s938_s11 = smov 192  ;;  %s956_s13 = smov 48 }
  0x2f   :  { %v5181_v55 = vld [vmem:[%s11042_s0 + $0x587] ss:$16 sm:%s864_s14]   ;;  %v849_v2 = vsel %vm435_vm2, %v5177_v54, %v844_v56  ;;  %v5191_v5 = vld [vmem:[%s11042_s0 + $0x8f] ss:$16 sm:%s910_s8]   ;;  %s974_s8 = smov 12  ;;  %s892_s14 = smov 192 }
  0x30   :  { %v5154_v59 = vld [vmem:[%s11042_s0 + $0x87] ss:$16 sm:%s741_s20]   ;;  %v867_v3 = vsel %vm430_vm1, %v5181_v55, %v862_v57  ;;  %s933_s20 = smov 48  ;;  %v5195_v9 = vld [vmem:[%s11042_s0 + $0x18f] ss:$16 sm:%s928_s16]   ;;  %v913_v14 = vsel %vm430_vm1, %v5191_v5, %v908_v7  ;;  %s979_s16 = smov 48 }
  0x31   :  { %v5155_v60 = vld [vmem:[%s11042_s0 + $0x87] ss:$16 sm:%s744_s21]   ;;  %v5192_v11 = vld [vmem:[%s11042_s0 + $0x8f] ss:$16 sm:%s915_s19]   ;;  %v931_v15 = vsel %vm425_vm0, %v5195_v9, %v5194_v8  ;;  %s1007_s21 = smov 192  ;;  %s1071_s17 = smov 48 }
  0x32   :  { %689 = vrot.lane.b32.xlu2 %v688_v49, %s6065_s29  ;;  %804 = vrot.lane.b32.xlu1 %v803_v53, %s6065_s29  ;;  %v747_v61 = vsel %vm425_vm0, %v5155_v60, %v5154_v59  ;;  %v5156_v62 = vld [vmem:[%s11042_s0 + $0x87] ss:$16 sm:%s749_s24]   ;;  %s997_s24 = smov 12  ;;  %v918_v23 = vsel %vm435_vm2, %v5192_v11, %v913_v14  ;;  %s961_s22 = smov 192 }
  0x33   :  { %v752_v0 = vsel %vm430_vm1, %v5156_v62, %v747_v61  ;;  %v5157_v1 = vld [vmem:[%s11042_s0 + $0x87] ss:$16 sm:%s754_s28]   ;;  %s813_s28 = smov 12  ;;  %v5196_v12 = vld [vmem:[%s11042_s0 + $0x18f] ss:$16 sm:%s933_s20]   ;;  %s1025_s19 = smov 48 }
  0x34   :  { %v5182_v4 = vld [vmem:[%s11042_s0 + $0x587] ss:$16 sm:%s869_s30]   ;;  %v757_v6 = vsel %vm435_vm2, %v5157_v1, %v752_v0  ;;  %s818_s30 = smov 48  ;;  %v5204_v20 = vld [vmem:[%s11042_s0 + $0x38f] ss:$16 sm:%s971_s7]   ;;  %v936_v24 = vsel %vm430_vm1, %v5196_v12, %v931_v15  ;;  %s1131_s7 = smov 3 }
  0x35   :  { %v872_v10 = vsel %vm435_vm2, %v5182_v4, %v867_v3  ;;  %v5169_v13 = vld [vmem:[%s11042_s0 + $0x387] ss:$16 sm:%s810_s23]   ;;  %v5205_v21 = vld [vmem:[%s11042_s0 + $0x38f] ss:$16 sm:%s974_s8]   ;;  %s994_s23 = smov 3  ;;  %s1002_s8 = smov 48 }
  0x36   :  { %850 = vrot.lane.b32.xlu0 %v849_v2, %s6065_s29  ;;  %v5170_v16 = vld [vmem:[%s11042_s0 + $0x387] ss:$16 sm:%s813_s28]   ;;  %s879_s28 = smov 3  ;;  %v977_v28 = vsel %vm425_vm0, %v5205_v21, %v5204_v20  ;;  %s1139_s25 = smov 48 }
  0x37   :  { %v5171_v17 = vld [vmem:[%s11042_s0 + $0x387] ss:$16 sm:%s818_s30]   ;;  %v816_v18 = vsel %vm425_vm0, %v5170_v16, %v5169_v13  ;;  %v5197_v25 = vld [vmem:[%s11042_s0 + $0x18f] ss:$16 sm:%s938_s11]   ;;  %s1144_s11 = smov 192  ;;  %s1185_s12 = smov 48 }
  0x38   :  { %v5172_v19 = vld [vmem:[%s11042_s0 + $0x387] ss:$16 sm:%s823_s6]   ;;  %v821_v22 = vsel %vm430_vm1, %v5171_v17, %v816_v18  ;;  %v5206_v26 = vld [vmem:[%s11042_s0 + $0x38f] ss:$16 sm:%s979_s16]   ;;  %v941_v31 = vsel %vm435_vm2, %v5197_v25, %v936_v24  ;;  %s1043_s16 = smov 12  ;;  %s1180_s6 = smov 12 }
  0x39   :  { %v826_v27 = vsel %vm435_vm2, %v5172_v19, %v821_v22  ;;  %v5209_v29 = vld [vmem:[%s11042_s0 + $0x48f] ss:$16 sm:%s994_s23]   ;;  %v5184_v33 = vld [vmem:[%s11042_s0 + $0x687] ss:$16 sm:%s879_s28]   ;;  %v982_v35 = vsel %vm430_vm1, %v5206_v26, %v977_v28  ;;  %s1108_s23 = smov 3  ;;  %s1093_s28 = smov 48 }
  0x3a   :  { %758 = vrot.lane.b32.xlu2 %v757_v6, %s6065_s29  ;;  %873 = vrot.lane.b32.xlu1 %v872_v10, %s6065_s29  ;;  %v5210_v30 = vld [vmem:[%s11042_s0 + $0x48f] ss:$16 sm:%s997_s24]   ;;  %s1048_s24 = smov 48  ;;  %s1213_s20 = smov 192 }
  0x3b   :  { %v5207_v32 = vld [vmem:[%s11042_s0 + $0x38f] ss:$16 sm:%s984_s27]   ;;  %v5185_v34 = vld [vmem:[%s11042_s0 + $0x687] ss:$16 sm:%s882_s3]   ;;  %v1000_v36 = vsel %vm425_vm0, %v5210_v30, %v5209_v29  ;;  %s1063_s27 = smov 3  ;;  %s1076_s3 = smov 192 }
  0x3c   :  { %v5211_v37 = vld [vmem:[%s11042_s0 + $0x48f] ss:$16 sm:%s1002_s8]   ;;  %v885_v38 = vsel %vm425_vm0, %v5185_v34, %v5184_v33  ;;  %v5186_v39 = vld [vmem:[%s11042_s0 + $0x687] ss:$16 sm:%s887_s9]   ;;  %v987_v44 = vsel %vm435_vm2, %v5207_v32, %v982_v35  ;;  %s951_s8 = smov 12  ;;  %s1269_s2 = smov 3 }
  0x3d   :  { %v890_v40 = vsel %vm430_vm1, %v5186_v39, %v885_v38  ;;  %v5187_v41 = vld [vmem:[%s11042_s0 + $0x687] ss:$16 sm:%s892_s14]   ;;  %v5219_v42 = vld [vmem:[%s11042_s0 + $0x68f] ss:$16 sm:%s1040_s15]   ;;  %v1005_v45 = vsel %vm430_vm1, %v5211_v37, %v1000_v36  ;;  %s1053_s14 = smov 192  ;;  %s1249_s15 = smov 12 }
  0x3e   :  { %919 = vrot.lane.b32.xlu0 %v918_v23, %s6065_s29  ;;  %v5220_v43 = vld [vmem:[%s11042_s0 + $0x68f] ss:$16 sm:%s1043_s16]   ;;  %v895_v48 = vsel %vm435_vm2, %v5187_v41, %v890_v40  ;;  %s1200_s16 = smov 3  ;;  %s1277_s18 = smov 48 }
  0x3f   :  { %v5212_v46 = vld [vmem:[%s11042_s0 + $0x48f] ss:$16 sm:%s1007_s21]   ;;  %v5224_v49 = vld [vmem:[%s11042_s0 + $0x6] ss:$16 sm:%s1063_s27]   ;;  %v1046_v50 = vsel %vm425_vm0, %v5220_v43, %v5219_v42  ;;  %s1254_s21 = smov 48  ;;  %s1223_s30 = smov 3 }
  0x40   :  { %v5221_v47 = vld [vmem:[%s11042_s0 + $0x68f] ss:$16 sm:%s1048_s24]   ;;  %v5225_v51 = vld [vmem:[%s11042_s0 + $0x6] ss:$16 sm:%s1066_s4]   ;;  %v1010_v53 = vsel %vm435_vm2, %v5212_v46, %v1005_v45  ;;  %s1111_s24 = smov 12  ;;  %s1116_s4 = smov 48 }
  0x41   :  { %v5199_v52 = vld [vmem:[%s11042_s0 + $0x28f] ss:$16 sm:%s948_s5]   ;;  %v1051_v57 = vsel %vm430_vm1, %v5221_v47, %v1046_v50  ;;  %v1069_v59 = vsel %vm425_vm0, %v5225_v51, %v5224_v49  ;;  %v5226_v60 = vld [vmem:[%s11042_s0 + $0x6] ss:$16 sm:%s1071_s17]   ;;  %s1177_s5 = smov 3  ;;  %s1085_s17 = smov 3 }
  0x42   :  { %827 = vrot.lane.b32.xlu2 %v826_v27, %s6065_s29  ;;  %942 = vrot.lane.b32.xlu1 %v941_v31, %s6065_s29  ;;  %v5200_v54 = vld [vmem:[%s11042_s0 + $0x28f] ss:$16 sm:%s951_s8]   ;;  %s1134_s8 = smov 12  ;;  %v1074_v2 = vsel %vm430_vm1, %v5226_v60, %v1069_v59  ;;  %s1338_s10 = smov 3 }
  0x43   :  { %v954_v55 = vsel %vm425_vm0, %v5200_v54, %v5199_v52  ;;  %v5201_v56 = vld [vmem:[%s11042_s0 + $0x28f] ss:$16 sm:%s956_s13]   ;;  %v5233_v63 = vld [vmem:[%s11042_s0 + $0x206] ss:$16 sm:%s1108_s23]   ;;  %s1017_s13 = smov 3  ;;  %s1088_s23 = smov 12 }
  0x44   :  { %v5222_v58 = vld [vmem:[%s11042_s0 + $0x68f] ss:$16 sm:%s1053_s14]   ;;  %v959_v61 = vsel %vm430_vm1, %v5201_v56, %v954_v55  ;;  %v5234_v0 = vld [vmem:[%s11042_s0 + $0x206] ss:$16 sm:%s1111_s24]   ;;  %s1020_s14 = smov 12  ;;  %s1121_s24 = smov 192 }
  0x45   :  { %v5202_v62 = vld [vmem:[%s11042_s0 + $0x28f] ss:$16 sm:%s961_s22]   ;;  %v1056_v1 = vsel %vm435_vm2, %v5222_v58, %v1051_v57  ;;  %v5227_v3 = vld [vmem:[%s11042_s0 + $0x6] ss:$16 sm:%s1076_s3]   ;;  %v1114_v8 = vsel %vm425_vm0, %v5234_v0, %v5233_v63  ;;  %s1203_s22 = smov 12  ;;  %s1272_s3 = smov 12 }
  0x46   :  { %988 = vrot.lane.b32.xlu0 %v987_v44, %s6065_s29  ;;  %v5235_v4 = vld [vmem:[%s11042_s0 + $0x206] ss:$16 sm:%s1116_s4]   ;;  %v964_v5 = vsel %vm435_vm2, %v5202_v62, %v959_v61  ;;  %v1079_v11 = vsel %vm435_vm2, %v5227_v3, %v1074_v2  ;;  %s1030_s4 = smov 192  ;;  %s1346_s26 = smov 48 }
  0x47   :  { %v5238_v6 = vld [vmem:[%s11042_s0 + $0x306] ss:$16 sm:%s1131_s7]   ;;  %v5214_v9 = vld [vmem:[%s11042_s0 + $0x58f] ss:$16 sm:%s1017_s13]   ;;  %v1119_v14 = vsel %vm430_vm1, %v5235_v4, %v1114_v8  ;;  %s6066_s13 = smov 96   ;;  %s1351_s27 = smov 192 }
  0x48   :  { %v5239_v7 = vld [vmem:[%s11042_s0 + $0x306] ss:$16 sm:%s1134_s8]   ;;  %v5215_v10 = vld [vmem:[%s11042_s0 + $0x58f] ss:$16 sm:%s1020_s14]   ;;  %s1208_s8 = smov 48  ;;  %s1098_s14 = smov 192 }
  0x49   :  { %v1023_v12 = vsel %vm425_vm0, %v5215_v10, %v5214_v9  ;;  %v5216_v13 = vld [vmem:[%s11042_s0 + $0x58f] ss:$16 sm:%s1025_s19]   ;;  %v5236_v15 = vld [vmem:[%s11042_s0 + $0x206] ss:$16 sm:%s1121_s24]   ;;  %v1137_v16 = vsel %vm425_vm0, %v5239_v7, %v5238_v6  ;;  %s1154_s24 = smov 3  ;;  %s1292_s9 = smov 3 }
  0x4a   :  { %896 = vrot.lane.b32.xlu2 %v895_v48, %s6065_s29  ;;  %1011 = vrot.lane.b32.xlu1 %v1010_v53, %s6065_s29  ;;  %v5240_v17 = vld [vmem:[%s11042_s0 + $0x306] ss:$16 sm:%s1139_s25]   ;;  %v1028_v18 = vsel %vm430_vm1, %v5216_v13, %v1023_v12  ;;  %v1124_v22 = vsel %vm435_vm2, %v5236_v15, %v1119_v14  ;;  %s1157_s25 = smov 12  ;;  %s1420_s7 = smov 192 }
  0x4b   :  { %v5217_v19 = vld [vmem:[%s11042_s0 + $0x58f] ss:$16 sm:%s1030_s4]   ;;  %v5248_v20 = vld [vmem:[%s11042_s0 + $0x506] ss:$16 sm:%s1177_s5]   ;;  %v1142_v23 = vsel %vm430_vm1, %v5240_v17, %v1137_v16  ;;  %s1190_s5 = smov 192  ;;  %s1387_s4 = smov 12 }
  0x4c   :  { %v5249_v21 = vld [vmem:[%s11042_s0 + $0x506] ss:$16 sm:%s1180_s6]   ;;  %v1033_v26 = vsel %vm435_vm2, %v5217_v19, %v1028_v18  ;;  %v5264_v42 = vld [vmem:[%s11042_s0 + $0x10e] ss:$16 sm:%s1249_s15]   ;;  %s1415_s6 = smov 48  ;;  %s1489_s15 = smov 192 }
  0x4d   :  { %v5241_v24 = vld [vmem:[%s11042_s0 + $0x306] ss:$16 sm:%s1144_s11]   ;;  %v1183_v29 = vsel %vm425_vm0, %v5249_v21, %v5248_v20  ;;  %v5265_v46 = vld [vmem:[%s11042_s0 + $0x10e] ss:$16 sm:%s1254_s21]   ;;  %s1167_s21 = smov 192  ;;  %s1341_s11 = smov 12 }
  0x4e   :  { %1057 = vrot.lane.b32.xlu0 %v1056_v1, %s6065_s29  ;;  %v5250_v25 = vld [vmem:[%s11042_s0 + $0x506] ss:$16 sm:%s1185_s12]   ;;  %v1147_v32 = vsel %vm435_vm2, %v5241_v24, %v1142_v23  ;;  %s1456_s12 = smov 12  ;;  %s1522_s19 = smov 3 }
  0x4f   :  { %v5253_v27 = vld [vmem:[%s11042_s0 + $0x606] ss:$16 sm:%s1200_s16]   ;;  %v1188_v35 = vsel %vm430_vm1, %v5250_v25, %v1183_v29  ;;  %v5268_v51 = vld [vmem:[%s11042_s0 + $0x20e] ss:$16 sm:%s1269_s2]   ;;  %s1323_s2 = smov 48  ;;  %s1231_s16 = smov 48 }
  0x50   :  { %v5228_v28 = vld [vmem:[%s11042_s0 + $0x106] ss:$16 sm:%s1085_s17]   ;;  %v5269_v52 = vld [vmem:[%s11042_s0 + $0x20e] ss:$16 sm:%s1272_s3]   ;;  %s1384_s3 = smov 3  ;;  %s1361_s17 = smov 3 }
  0x51   :  { %v5254_v30 = vld [vmem:[%s11042_s0 + $0x606] ss:$16 sm:%s1203_s22]   ;;  %s1315_s22 = smov 3  ;;  %v1275_v58 = vsel %vm425_vm0, %v5269_v52, %v5268_v51  ;;  %v5270_v59 = vld [vmem:[%s11042_s0 + $0x20e] ss:$16 sm:%s1277_s18]   ;;  %s1364_s18 = smov 12 }
  0x52   :  { %965 = vrot.lane.b32.xlu2 %v964_v5, %s6065_s29  ;;  %1080 = vrot.lane.b32.xlu1 %v1079_v11, %s6066_s13  ;;  %v5229_v31 = vld [vmem:[%s11042_s0 + $0x106] ss:$16 sm:%s1088_s23]   ;;  %v1206_v37 = vsel %vm425_vm0, %v5254_v30, %v5253_v27  ;;  %s1318_s23 = smov 12  ;;  %v1280_v1 = vsel %vm430_vm1, %v5270_v59, %v1275_v58 }
  0x53   :  { %v1091_v33 = vsel %vm425_vm0, %v5229_v31, %v5228_v28  ;;  %v5230_v34 = vld [vmem:[%s11042_s0 + $0x106] ss:$16 sm:%s1093_s28]   ;;  %s1282_s28 = smov 192  ;;  %v5278_v62 = vld [vmem:[%s11042_s0 + $0x40e] ss:$16 sm:%s1315_s22]   ;;  %s1553_s22 = smov 48 }
  0x54   :  { %v5251_v36 = vld [vmem:[%s11042_s0 + $0x506] ss:$16 sm:%s1190_s5]   ;;  %v1096_v39 = vsel %vm430_vm1, %v5230_v34, %v1091_v33  ;;  %s1226_s5 = smov 12  ;;  %v5279_v63 = vld [vmem:[%s11042_s0 + $0x40e] ss:$16 sm:%s1318_s23]   ;;  %s1558_s23 = smov 192 }
  0x55   :  { %v5255_v38 = vld [vmem:[%s11042_s0 + $0x606] ss:$16 sm:%s1208_s8]   ;;  %v1193_v43 = vsel %vm435_vm2, %v5251_v36, %v1188_v35  ;;  %s1162_s8 = smov 48  ;;  %v5271_v2 = vld [vmem:[%s11042_s0 + $0x20e] ss:$16 sm:%s1282_s28]   ;;  %v1321_v7 = vsel %vm425_vm0, %v5279_v63, %v5278_v62  ;;  %s1476_s28 = smov 3 }
  0x56   :  { %1125 = vrot.lane.b32.xlu0 %v1124_v22, %s6066_s13  ;;  %v5231_v40 = vld [vmem:[%s11042_s0 + $0x106] ss:$16 sm:%s1098_s14]   ;;  %v1211_v44 = vsel %vm430_vm1, %v5255_v38, %v1206_v37  ;;  %s1259_s14 = smov 192  ;;  %v1285_v10 = vsel %vm435_vm2, %v5271_v2, %v1280_v1 }
  0x57   :  { %v5256_v45 = vld [vmem:[%s11042_s0 + $0x606] ss:$16 sm:%s1213_s20]   ;;  %v1101_v47 = vsel %vm435_vm2, %v5231_v40, %v1096_v39  ;;  %v5266_v57 = vld [vmem:[%s11042_s0 + $0x10e] ss:$16 sm:%s1259_s14]   ;;  %s1392_s14 = smov 48  ;;  %s1407_s20 = smov 3 }
  0x58   :  { %v5243_v48 = vld [vmem:[%s11042_s0 + $0x406] ss:$16 sm:%s1154_s24]   ;;  %v1216_v53 = vsel %vm435_vm2, %v5256_v45, %v1211_v44  ;;  %v5258_v3 = vld [vmem:[%s11042_s0 + $0xe] ss:$16 sm:%s1223_s30]   ;;  %s1397_s30 = smov 192  ;;  %s7264_s24 = smov 192 }
  0x59   :  { %v5244_v49 = vld [vmem:[%s11042_s0 + $0x406] ss:$16 sm:%s1157_s25]   ;;  %v5280_v4 = vld [vmem:[%s11042_s0 + $0x40e] ss:$16 sm:%s1323_s2]   ;;  %s1236_s2 = smov 192  ;;  %s1430_s25 = smov 3 }
  0x5a   :  { %1034 = vrot.lane.b32.xlu2 %v1033_v26, %s6065_s29  ;;  %s1246_s29 = smov 3  ;;  %1148 = vrot.lane.b32.xlu1 %v1147_v32, %s6066_s13  ;;  %v1160_v54 = vsel %vm425_vm0, %v5244_v49, %v5243_v48  ;;  %v5245_v55 = vld [vmem:[%s11042_s0 + $0x406] ss:$16 sm:%s1162_s8]   ;;  %v1326_v13 = vsel %vm430_vm1, %v5280_v4, %v1321_v7  ;;  %s1545_s8 = smov 3 }
  0x5b   :  { %v5263_v41 = vld [vmem:[%s11042_s0 + $0x10e] ss:$16 sm:%s1246_s29]   ;;  %v1165_v60 = vsel %vm430_vm1, %v5245_v55, %v1160_v54  ;;  %v5246_v61 = vld [vmem:[%s11042_s0 + $0x406] ss:$16 sm:%s1167_s21]   ;;  %s1328_s21 = smov 192  ;;  %s1484_s29 = smov 48 }
  0x5c   :  { %v1252_v50 = vsel %vm425_vm0, %v5264_v42, %v5263_v41  ;;  %v1170_v5 = vsel %vm435_vm2, %v5246_v61, %v1165_v60  ;;  %v5259_v6 = vld [vmem:[%s11042_s0 + $0xe] ss:$16 sm:%s1226_s5]   ;;  %v5293_v20 = vld [vmem:[%s11042_s0 + $0x86] ss:$16 sm:%s1384_s3]   ;;  %s1499_s5 = smov 3  ;;  %s1627_s3 = smov 192 }
  0x5d   :  { %v1257_v56 = vsel %vm430_vm1, %v5265_v46, %v1252_v50  ;;  %v5283_v8 = vld [vmem:[%s11042_s0 + $0x50e] ss:$16 sm:%s1338_s10]   ;;  %v1229_v11 = vsel %vm425_vm0, %v5259_v6, %v5258_v3  ;;  %s1295_s10 = smov 12  ;;  %v5294_v21 = vld [vmem:[%s11042_s0 + $0x86] ss:$16 sm:%s1387_s4]   ;;  %s1660_s4 = smov 3 }
  0x5e   :  { %1194 = vrot.lane.b32.xlu0 %v1193_v43, %s6066_s13  ;;  %v1262_v0 = vsel %vm435_vm2, %v5266_v57, %v1257_v56  ;;  %v5284_v9 = vld [vmem:[%s11042_s0 + $0x50e] ss:$16 sm:%s1341_s11]   ;;  %v1390_v28 = vsel %vm425_vm0, %v5294_v21, %v5293_v20  ;;  %s1453_s11 = smov 3 }
  0x5f   :  { %v5260_v12 = vld [vmem:[%s11042_s0 + $0xe] ss:$16 sm:%s1231_s16]   ;;  %v1344_v15 = vsel %vm425_vm0, %v5284_v9, %v5283_v8  ;;  %v5295_v26 = vld [vmem:[%s11042_s0 + $0x86] ss:$16 sm:%s1392_s14]   ;;  %s1614_s16 = smov 3  ;;  %s7123_s14 = smov 192 }
  0x60   :  { %v5281_v14 = vld [vmem:[%s11042_s0 + $0x40e] ss:$16 sm:%s1328_s21]   ;;  %v1234_v18 = vsel %vm430_vm1, %v5260_v12, %v1229_v11  ;;  %s1410_s21 = smov 12  ;;  %v5298_v29 = vld [vmem:[%s11042_s0 + $0x186] ss:$16 sm:%s1407_s20]   ;;  %v1395_v34 = vsel %vm430_vm1, %v5295_v26, %v1390_v28  ;;  %s1525_s20 = smov 12 }
  0x61   :  { %v5285_v16 = vld [vmem:[%s11042_s0 + $0x50e] ss:$16 sm:%s1346_s26]   ;;  %v1331_v22 = vsel %vm435_vm2, %v5281_v14, %v1326_v13  ;;  %s1300_s26 = smov 48  ;;  %v5299_v30 = vld [vmem:[%s11042_s0 + $0x186] ss:$16 sm:%s1410_s21]   ;;  %s1461_s21 = smov 48 }
  0x62   :  { %1102 = vrot.lane.b32.xlu2 %v1101_v47, %s6066_s13  ;;  %1217 = vrot.lane.b32.xlu1 %v1216_v53, %s6066_s13  ;;  %v5286_v17 = vld [vmem:[%s11042_s0 + $0x50e] ss:$16 sm:%s1351_s27]   ;;  %v1349_v23 = vsel %vm430_vm1, %v5285_v16, %v1344_v15  ;;  %v1413_v36 = vsel %vm425_vm0, %v5299_v30, %v5298_v29  ;;  %s1591_s27 = smov 3 }
  0x63   :  { %v5261_v19 = vld [vmem:[%s11042_s0 + $0xe] ss:$16 sm:%s1236_s2]   ;;  %v1354_v31 = vsel %vm435_vm2, %v5286_v17, %v1349_v23  ;;  %v5296_v35 = vld [vmem:[%s11042_s0 + $0x86] ss:$16 sm:%s1397_s30]   ;;  %s1479_s30 = smov 12  ;;  %s7044_s2 = smov 192 }
  0x64   :  { %v5273_v24 = vld [vmem:[%s11042_s0 + $0x30e] ss:$16 sm:%s1292_s9]   ;;  %v1239_v27 = vsel %vm435_vm2, %v5261_v19, %v1234_v18  ;;  %v5300_v37 = vld [vmem:[%s11042_s0 + $0x186] ss:$16 sm:%s1415_s6]   ;;  %v1400_v44 = vsel %vm435_vm2, %v5296_v35, %v1395_v34  ;;  %s1369_s6 = smov 48  ;;  %s1466_s9 = smov 192 }
  0x65   :  { %v5274_v25 = vld [vmem:[%s11042_s0 + $0x30e] ss:$16 sm:%s1295_s10]   ;;  %s1305_s10 = smov 192  ;;  %v5301_v38 = vld [vmem:[%s11042_s0 + $0x186] ss:$16 sm:%s1420_s7]   ;;  %v1418_v45 = vsel %vm430_vm1, %v5300_v37, %v1413_v36  ;;  %s7007_s7 = smov 48 }
  0x66   :  { %1263 = vrot.lane.b32.xlu0 %v1262_v0, %s6066_s13  ;;  %v1298_v32 = vsel %vm425_vm0, %v5274_v25, %v5273_v24  ;;  %v5275_v33 = vld [vmem:[%s11042_s0 + $0x30e] ss:$16 sm:%s1300_s26]   ;;  %v1423_v53 = vsel %vm435_vm2, %v5301_v38, %v1418_v45  ;;  %s1433_s26 = smov 12 }
  0x67   :  { %v1303_v40 = vsel %vm430_vm1, %v5275_v33, %v1298_v32  ;;  %v5276_v41 = vld [vmem:[%s11042_s0 + $0x30e] ss:$16 sm:%s1305_s10]   ;;  %v5308_v42 = vld [vmem:[%s11042_s0 + $0x386] ss:$16 sm:%s1453_s11]   ;;  %s6905_s10 = smov 192  ;;  %s7063_s11 = smov 12 }
  0x68   :  { %v5309_v43 = vld [vmem:[%s11042_s0 + $0x386] ss:$16 sm:%s1456_s12]   ;;  %v5288_v46 = vld [vmem:[%s11042_s0 + $0x60e] ss:$16 sm:%s1361_s17]   ;;  %v1308_v49 = vsel %vm435_vm2, %v5276_v41, %v1303_v40  ;;  %s1535_s17 = smov 192  ;;  %s7117_s12 = smov 48 }
  0x69   :  { %v5289_v47 = vld [vmem:[%s11042_s0 + $0x60e] ss:$16 sm:%s1364_s18]   ;;  %v5310_v48 = vld [vmem:[%s11042_s0 + $0x386] ss:$16 sm:%s1461_s21]   ;;  %v1459_v50 = vsel %vm425_vm0, %v5309_v43, %v5308_v42  ;;  %s1374_s18 = smov 192  ;;  %s1683_s21 = smov 3 }
  0x6a   :  { %1171 = vrot.lane.b32.xlu2 %v1170_v5, %s6066_s13  ;;  %1286 = vrot.lane.b32.xlu1 %v1285_v10, %s6066_s13  ;;  %v5313_v51 = vld [vmem:[%s11042_s0 + $0x486] ss:$16 sm:%s1476_s28]   ;;  %v1367_v54 = vsel %vm425_vm0, %v5289_v47, %v5288_v46  ;;  %v1464_v57 = vsel %vm430_vm1, %v5310_v48, %v1459_v50  ;;  %s1594_s28 = smov 12 }
  0x6b   :  { %v5314_v52 = vld [vmem:[%s11042_s0 + $0x486] ss:$16 sm:%s1479_s30]   ;;  %v5290_v55 = vld [vmem:[%s11042_s0 + $0x60e] ss:$16 sm:%s1369_s6]   ;;  %s1530_s30 = smov 48  ;;  %s1502_s6 = smov 12 }
  0x6c   :  { %v5311_v58 = vld [vmem:[%s11042_s0 + $0x386] ss:$16 sm:%s1466_s9]   ;;  %v1482_v59 = vsel %vm425_vm0, %v5314_v52, %v5313_v51  ;;  %v1372_v63 = vsel %vm430_vm1, %v5290_v55, %v1367_v54  ;;  %v5291_v0 = vld [vmem:[%s11042_s0 + $0x60e] ss:$16 sm:%s1374_s18]   ;;  %s1548_s9 = smov 12  ;;  %s7023_s18 = smov 3 }
  0x6d   :  { %v5315_v60 = vld [vmem:[%s11042_s0 + $0x486] ss:$16 sm:%s1484_s29]   ;;  %v1469_v3 = vsel %vm435_vm2, %v5311_v58, %v1464_v57  ;;  %s1438_s29 = smov 48  ;;  %v1377_v9 = vsel %vm435_vm2, %v5291_v0, %v1372_v63  ;;  %v5328_v11 = vld [vmem:[%s11042_s0 + $0x8e] ss:$16 sm:%s1545_s8]   ;;  %s1512_s8 = smov 192 }
  0x6e   :  { %1332 = vrot.lane.b32.xlu0 %v1331_v22, %s6066_s13  ;;  %v5316_v61 = vld [vmem:[%s11042_s0 + $0x486] ss:$16 sm:%s1489_s15]   ;;  %v1487_v5 = vsel %vm430_vm1, %v5315_v60, %v1482_v59  ;;  %s1568_s15 = smov 3 }
  0x6f   :  { %v5323_v1 = vld [vmem:[%s11042_s0 + $0x686] ss:$16 sm:%s1522_s19]   ;;  %v5329_v12 = vld [vmem:[%s11042_s0 + $0x8e] ss:$16 sm:%s1548_s9]   ;;  %v1492_v13 = vsel %vm435_vm2, %v5316_v61, %v1487_v5  ;;  %s1599_s9 = smov 48  ;;  %s1581_s19 = smov 192 }
  0x70   :  { %v5324_v2 = vld [vmem:[%s11042_s0 + $0x686] ss:$16 sm:%s1525_s20]   ;;  %v1551_v19 = vsel %vm425_vm0, %v5329_v12, %v5328_v11  ;;  %v5330_v20 = vld [vmem:[%s11042_s0 + $0x8e] ss:$16 sm:%s1553_s22]   ;;  %s1507_s22 = smov 48  ;;  %s1782_s20 = smov 48 }
  0x71   :  { %v5303_v6 = vld [vmem:[%s11042_s0 + $0x286] ss:$16 sm:%s1430_s25]   ;;  %v1528_v10 = vsel %vm425_vm0, %v5324_v2, %v5323_v1  ;;  %v5331_v21 = vld [vmem:[%s11042_s0 + $0x8e] ss:$16 sm:%s1558_s23]   ;;  %v1556_v29 = vsel %vm430_vm1, %v5330_v20, %v1551_v19  ;;  %s1604_s25 = smov 192  ;;  %s6978_s23 = smov 12 }
  0x72   :  { %1240 = vrot.lane.b32.xlu2 %v1239_v27, %s6066_s13  ;;  %1355 = vrot.lane.b32.xlu1 %v1354_v31, %s6066_s13  ;;  %v5304_v7 = vld [vmem:[%s11042_s0 + $0x286] ss:$16 sm:%s1433_s26]   ;;  %s1443_s26 = smov 192  ;;  %v1561_v37 = vsel %vm435_vm2, %v5331_v21, %v1556_v29 }
  0x73   :  { %v5325_v8 = vld [vmem:[%s11042_s0 + $0x686] ss:$16 sm:%s1530_s30]   ;;  %v1436_v14 = vsel %vm425_vm0, %v5304_v7, %v5303_v6  ;;  %v5338_v25 = vld [vmem:[%s11042_s0 + $0x28e] ss:$16 sm:%s1591_s27]   ;;  %s6933_s27 = smov 48  ;;  %s7549_s30 = smov 192 }
  0x74   :  { %v6759_v39 = vpop.permute.xlu2 %528   ;;  %v5305_v15 = vld [vmem:[%s11042_s0 + $0x286] ss:$16 sm:%s1438_s29]   ;;  %v1533_v17 = vsel %vm430_vm1, %v5325_v8, %v1528_v10  ;;  %v5339_v26 = vld [vmem:[%s11042_s0 + $0x28e] ss:$16 sm:%s1594_s28]   ;;  %s6935_s28 = smov 192  ;;  %s7070_s29 = smov 48 }
  0x75   :  { %v5326_v18 = vld [vmem:[%s11042_s0 + $0x686] ss:$16 sm:%s1535_s17]   ;;  %v1441_v23 = vsel %vm430_vm1, %v5305_v15, %v1436_v14  ;;  %s1617_s17 = smov 12  ;;  %v5340_v32 = vld [vmem:[%s11042_s0 + $0x28e] ss:$16 sm:%s1599_s9]   ;;  %v1597_v34 = vsel %vm425_vm0, %v5339_v26, %v5338_v25  ;;  %s1668_s9 = smov 48 }
  0x76   :  { %1401 = vrot.lane.b32.xlu0 %v1400_v44, %s6066_s13  ;;  %v5306_v24 = vld [vmem:[%s11042_s0 + $0x286] ss:$16 sm:%s1443_s26]   ;;  %v1538_v27 = vsel %vm435_vm2, %v5326_v18, %v1533_v17  ;;  %s1622_s26 = smov 48  ;;  %v1602_v42 = vsel %vm430_vm1, %v5340_v32, %v1597_v34  ;;  %v4942_v5 = vld [vmem:[%s11042_s0 + $0x100] ss:$8 sm:$0xf0]  }
  0x77   :  { %v5318_v30 = vld [vmem:[%s11042_s0 + $0x586] ss:$16 sm:%s1499_s5]   ;;  %v1446_v33 = vsel %vm435_vm2, %v5306_v24, %v1441_v23  ;;  %v5343_v35 = vld [vmem:[%s11042_s0 + $0x38e] ss:$16 sm:%s1614_s16]   ;;  %s1663_s5 = smov 12  ;;  %s1571_s16 = smov 12 }
  0x78   :  { %v6797_v56 = vpop.permute.xlu0 %437   ;;  %v5319_v31 = vld [vmem:[%s11042_s0 + $0x586] ss:$16 sm:%s1502_s6]   ;;  %v5344_v36 = vld [vmem:[%s11042_s0 + $0x38e] ss:$16 sm:%s1617_s17]   ;;  %s7167_s17 = smov 12  ;;  %s7339_s6 = smov 3 }
  0x79   :  { %v1505_v38 = vsel %vm425_vm0, %v5319_v31, %v5318_v30  ;;  %v5320_v40 = vld [vmem:[%s11042_s0 + $0x586] ss:$16 sm:%s1507_s22]   ;;  %v5341_v43 = vld [vmem:[%s11042_s0 + $0x28e] ss:$16 sm:%s1604_s25]   ;;  %v1620_v44 = vsel %vm425_vm0, %v5344_v36, %v5343_v35  ;;  %s1686_s22 = smov 12  ;;  %s7223_s25 = smov 192 }
  0x7a   :  { %1309 = vrot.lane.b32.xlu2 %v1308_v49, %s6066_s13  ;;  %1424 = vrot.lane.b32.xlu1 %v1423_v53, %s6066_s13  ;;  %v5345_v45 = vld [vmem:[%s11042_s0 + $0x38e] ss:$16 sm:%s1622_s26]   ;;  %v1510_v48 = vsel %vm430_vm1, %v5320_v40, %v1505_v38  ;;  %v1607_v52 = vsel %vm435_vm2, %v5341_v43, %v1602_v42  ;;  %s1645_s26 = smov 48 }
  0x7b   :  { %v5346_v46 = vld [vmem:[%s11042_s0 + $0x38e] ss:$16 sm:%s1627_s3]   ;;  %v5321_v49 = vld [vmem:[%s11042_s0 + $0x586] ss:$16 sm:%s1512_s8]   ;;  %v1625_v54 = vsel %vm430_vm1, %v5345_v45, %v1620_v44  ;;  %s6951_s8 = smov 3  ;;  %s1640_s3 = smov 12 }
  0x7c   :  { %v6811_v62 = vpop.permute.xlu2 %551   ;;  %v6824_v4 = vpop.permute.xlu1 %482   ;;  %v5353_v50 = vld [vmem:[%s11042_s0 + $0x58e] ss:$16 sm:%s1660_s4]   ;;  %v1515_v59 = vsel %vm435_vm2, %v5321_v49, %v1510_v48  ;;  %v1630_v0 = vsel %vm435_vm2, %v5346_v46, %v1625_v54  ;;  %v5367_v17 = vld [vmem:[%s11042_s0 + $0x105] ss:$16 sm:%s6951_s8]   ;;  %s7072_s8 = smov 192  ;;  %s7247_s4 = smov 3 }
  0x7d   :  { %v5354_v51 = vld [vmem:[%s11042_s0 + $0x58e] ss:$16 sm:%s1663_s5]   ;;  %s1576_s5 = smov 48  ;;  %v5373_v30 = vld [vmem:[%s11042_s0 + $0x205] ss:$16 sm:%s6978_s23]   ;;  %s1650_s23 = smov 192 }
  0x7e   :  { %1470 = vrot.lane.b32.xlu0 %v1469_v3, %s6066_s13  ;;  %v5333_v55 = vld [vmem:[%s11042_s0 + $0x18e] ss:$16 sm:%s1568_s15]   ;;  %v1666_v60 = vsel %vm425_vm0, %v5354_v51, %v5353_v50  ;;  %s6962_s15 = smov 48  ;;  %v4941_v3 = vld [vmem:[%s11042_s0 + $0x100] ss:$8 sm:$0xf]  }
  0x7f   :  { %v5334_v57 = vld [vmem:[%s11042_s0 + $0x18e] ss:$16 sm:%s1571_s16]   ;;  %s6964_s16 = smov 192  ;;  %v64_v11 = vsel %vm4_vm3, %v4942_v5, %v4941_v3  ;;  %v5369_v25 = vld [vmem:[%s11042_s0 + $0x105] ss:$16 sm:%s6962_s15]   ;;  %s7042_s15 = smov 48 }
  0x80   :  { %v6851_v16 = vpop.permute.xlu0 %459   ;;  %v5355_v58 = vld [vmem:[%s11042_s0 + $0x58e] ss:$16 sm:%s1668_s9]   ;;  %s6953_s9 = smov 12  ;;  %v1574_v1 = vsel %vm425_vm0, %v5334_v57, %v5333_v55  ;;  %4943 = vst.msk [vmem:[%s11043_s1 + $0x20] ss:$8 sm:$0x3] %vm6_vm4, %v64_v11  }
  0x81   :  { %v5358_v61 = vld [vmem:[%s11042_s0 + $0x68e] ss:$16 sm:%s1683_s21]   ;;  %v1671_v7 = vsel %vm430_vm1, %v5355_v58, %v1666_v60  ;;  %v5368_v18 = vld [vmem:[%s11042_s0 + $0x105] ss:$16 sm:%s6953_s9]   ;;  %s7021_s9 = smov 192  ;;  %s7262_s21 = smov 48 }
  0x82   :  { %1378 = vrot.lane.b32.xlu2 %v1377_v9, %s6066_s13  ;;  %1493 = vrot.lane.b32.xlu1 %v1492_v13, %s6066_s13  ;;  %v5359_v63 = vld [vmem:[%s11042_s0 + $0x68e] ss:$16 sm:%s1686_s22]   ;;  %s6976_s22 = smov 3 }
  0x83   :  { %v5335_v2 = vld [vmem:[%s11042_s0 + $0x18e] ss:$16 sm:%s1576_s5]   ;;  %v1689_v9 = vsel %vm425_vm0, %v5359_v63, %v5358_v61  ;;  %v5372_v29 = vld [vmem:[%s11042_s0 + $0x205] ss:$16 sm:%s6976_s22]   ;;  %s7055_s5 = smov 3  ;;  %s6067_s22 = smov 80  }
  0x84   :  { %v6865_v22 = vpop.permute.xlu2 %620   ;;  %v6878_v28 = vpop.permute.xlu1 %505   ;;  %v5356_v8 = vld [vmem:[%s11042_s0 + $0x58e] ss:$16 sm:%s6905_s10]   ;;  %v1579_v14 = vsel %vm430_vm1, %v5335_v2, %v1574_v1  ;;  %4944 = vst.msk [vmem:[%s11043_s1 + $0x11] ss:$8 sm:$0xc] %vm6_vm4, %v64_v11   ;;  %s7234_s10 = smov 48 }
  0x85   :  { %v5360_v10 = vld [vmem:[%s11042_s0 + $0x68e] ss:$16 sm:%s6933_s27]   ;;  %s1637_s27 = smov 3  ;;  %v1676_v19 = vsel %vm435_vm2, %v5356_v8, %v1671_v7  ;;  %4945 = vst.msk [vmem:[%s11043_s1 + $0x2] ss:$8 sm:$0x30] %vm6_vm4, %v64_v11  }
  0x86   :  { %1539 = vrot.lane.b32.xlu0 %v1538_v27, %s6066_s13  ;;  %v5361_v12 = vld [vmem:[%s11042_s0 + $0x68e] ss:$16 sm:%s6935_s28]   ;;  %v1694_v21 = vsel %vm430_vm1, %v5360_v10, %v1689_v9  ;;  %v1734_v27 = vsel %vm425_vm0, %v5368_v18, %v5367_v17  ;;  %4946 = vst.msk [vmem:[%s11043_s1 - $0xd] ss:$8 sm:$0xc0] %vm6_vm4, %v64_v11   ;;  %s7159_s28 = smov 192 }
  0x87   :  { %v5336_v15 = vld [vmem:[%s11042_s0 + $0x18e] ss:$16 sm:%s1581_s19]   ;;  %s7029_s19 = smov 12  ;;  %v1699_v31 = vsel %vm435_vm2, %v5361_v12, %v1694_v21  ;;  %v1739_v35 = vsel %vm430_vm1, %v5369_v25, %v1734_v27  ;;  %v5370_v36 = vld [vmem:[%s11042_s0 + $0x105] ss:$16 sm:%s6964_s16]   ;;  %s1714_s16 = smov 48 }
  0x88   :  { %v6907_v41 = vpop.permute.xlu0 %574   ;;  %v5348_v23 = vld [vmem:[%s11042_s0 + $0x48e] ss:$16 sm:%s1637_s27]   ;;  %v1584_v26 = vsel %vm435_vm2, %v5336_v15, %v1579_v14  ;;  %v5374_v38 = vld [vmem:[%s11042_s0 + $0x205] ss:$16 sm:%s7007_s7]   ;;  %s1706_s7 = smov 3  ;;  %v1744_v48 = vsel %vm435_vm2, %v5370_v36, %v1739_v35  ;;  %s7151_s27 = smov 48 }
  0x89   :  { %v5349_v24 = vld [vmem:[%s11042_s0 + $0x48e] ss:$16 sm:%s1640_s3]   ;;  %v5375_v40 = vld [vmem:[%s11042_s0 + $0x205] ss:$16 sm:%s7021_s9]   ;;  %s7101_s3 = smov 3  ;;  %s7326_s9 = smov 48 }
  0x8a   :  { %1447 = vrot.lane.b32.xlu2 %v1446_v33, %s6066_s13  ;;  %1562 = vrot.lane.b32.xlu1 %v1561_v37, %s6066_s13  ;;  %v1643_v32 = vsel %vm425_vm0, %v5349_v24, %v5348_v23  ;;  %v5350_v33 = vld [vmem:[%s11042_s0 + $0x48e] ss:$16 sm:%s1645_s26]   ;;  %v1757_v37 = vsel %vm425_vm0, %v5373_v30, %v5372_v29  ;;  %s1709_s26 = smov 12 }
  0x8b   :  { %v1648_v43 = vsel %vm430_vm1, %v5350_v33, %v1643_v32  ;;  %v5351_v44 = vld [vmem:[%s11042_s0 + $0x48e] ss:$16 sm:%s1650_s23]   ;;  %v5382_v45 = vld [vmem:[%s11042_s0 + $0x405] ss:$16 sm:%s7023_s18]   ;;  %v1762_v50 = vsel %vm430_vm1, %v5374_v38, %v1757_v37  ;;  %s2165_s18 = smov 3  ;;  %s2660_s23 = smov 192 }
  0x8c   :  { %v6921_v47 = vpop.permute.xlu2 %689   ;;  %v6938_v53 = vpop.permute.xlu1 %597   ;;  %v5383_v46 = vld [vmem:[%s11042_s0 + $0x405] ss:$16 sm:%s7029_s19]   ;;  %s7115_s19 = smov 12  ;;  %v1653_v55 = vsel %vm435_vm2, %v5351_v44, %v1648_v43  ;;  %v1767_v60 = vsel %vm435_vm2, %v5375_v40, %v1762_v50  ;;  %v4948_v1 = vld [vmem:[%s11042_s0 + $0x140] ss:$8 sm:$0xf0]  }
  0x8d   :  { %v5363_v51 = vld [vmem:[%s11042_s0 + $0x5] ss:$16 sm:%s1706_s7]   ;;  %v1803_v57 = vsel %vm425_vm0, %v5383_v46, %v5382_v45  ;;  %s1777_s7 = smov 12  ;;  %v5397_v15 = vld [vmem:[%s11042_s0 + $0xd] ss:$16 sm:%s7101_s3]   ;;  %s7255_s3 = smov 12 }
  0x8e   :  { %1608 = vrot.lane.b32.xlu0 %v1607_v52, %s6066_s13  ;;  %v5364_v52 = vld [vmem:[%s11042_s0 + $0x5] ss:$16 sm:%s1709_s26]   ;;  %s7138_s26 = smov 3 }
  0x8f   :  { %v5384_v54 = vld [vmem:[%s11042_s0 + $0x405] ss:$16 sm:%s7042_s15]   ;;  %s7136_s15 = smov 192  ;;  %v1712_v61 = vsel %vm425_vm0, %v5364_v52, %v5363_v51  ;;  %v5398_v17 = vld [vmem:[%s11042_s0 + $0xd] ss:$16 sm:%s7115_s19]   ;;  %s7211_s19 = smov 192 }
  0x90   :  { %v6983_v6 = vpop.permute.xlu0 %643   ;;  %v5387_v58 = vld [vmem:[%s11042_s0 + $0x505] ss:$16 sm:%s7055_s5]   ;;  %v1808_v3 = vsel %vm430_vm1, %v5384_v54, %v1803_v57  ;;  %v5399_v25 = vld [vmem:[%s11042_s0 + $0xd] ss:$16 sm:%s7117_s12]   ;;  %s7232_s12 = smov 12  ;;  %v1872_v27 = vsel %vm425_vm0, %v5398_v17, %v5397_v15  ;;  %s1846_s5 = smov 12 }
  0x91   :  { %v5365_v63 = vld [vmem:[%s11042_s0 + $0x5] ss:$16 sm:%s1714_s16]   ;;  %v5402_v29 = vld [vmem:[%s11042_s0 + $0x10d] ss:$16 sm:%s7138_s26]   ;;  %v1877_v36 = vsel %vm430_vm1, %v5399_v25, %v1872_v27  ;;  %s2145_s16 = smov 12  ;;  %s2058_s26 = smov 48 }
  0x92   :  { %1516 = vrot.lane.b32.xlu2 %v1515_v59, %s6066_s13  ;;  %1631 = vrot.lane.b32.xlu1 %v1630_v0, %s6066_s13  ;;  %v5388_v59 = vld [vmem:[%s11042_s0 + $0x505] ss:$16 sm:%s7063_s11]   ;;  %s7149_s11 = smov 12  ;;  %v1717_v12 = vsel %vm430_vm1, %v5365_v63, %v1712_v61 }
  0x93   :  { %v4947_v0 = vld [vmem:[%s11042_s0 + $0x140] ss:$8 sm:$0xf]   ;;  %v5385_v5 = vld [vmem:[%s11042_s0 + $0x405] ss:$16 sm:%s7044_s2]   ;;  %v1826_v7 = vsel %vm425_vm0, %v5388_v59, %v5387_v58  ;;  %s2104_s2 = smov 48 }
  0x94   :  { %v7001_v13 = vpop.permute.xlu2 %758   ;;  %v7026_v20 = vpop.permute.xlu1 %666   ;;  %v5389_v8 = vld [vmem:[%s11042_s0 + $0x505] ss:$16 sm:%s7070_s29]   ;;  %s1774_s29 = smov 3  ;;  %v79_v9 = vsel %vm4_vm3, %v4948_v1, %v4947_v0  ;;  %v1813_v18 = vsel %vm435_vm2, %v5385_v5, %v1808_v3  ;;  %v5403_v30 = vld [vmem:[%s11042_s0 + $0x10d] ss:$16 sm:%s7149_s11]   ;;  %s7245_s11 = smov 192 }
  0x95   :  { %v5390_v10 = vld [vmem:[%s11042_s0 + $0x505] ss:$16 sm:%s7072_s8]   ;;  %4949 = vst.msk [vmem:[%s11043_s1 + $0x24] ss:$8 sm:$0x3] %vm6_vm4, %v79_v9   ;;  %v1831_v21 = vsel %vm430_vm1, %v5389_v8, %v1826_v7  ;;  %v1895_v38 = vsel %vm425_vm0, %v5403_v30, %v5402_v29  ;;  %s2142_s8 = smov 3 }
  0x96   :  { %1677 = vrot.lane.b32.xlu0 %v1676_v19, %s6066_s13  ;;  %v5366_v14 = vld [vmem:[%s11042_s0 + $0x5] ss:$16 sm:%s7136_s15]   ;;  %s7197_s15 = smov 48  ;;  %4950 = vst.msk [vmem:[%s11043_s1 + $0x15] ss:$8 sm:$0xc] %vm6_vm4, %v79_v9  }
  0x97   :  { %v5377_v23 = vld [vmem:[%s11042_s0 + $0x305] ss:$16 sm:%s1774_s29]   ;;  %s7225_s29 = smov 3  ;;  %4951 = vst.msk [vmem:[%s11043_s1 + $0x6] ss:$8 sm:$0x30] %vm6_vm4, %v79_v9  }
  0x98   :  { %v7078_v34 = vpop.permute.xlu0 %712   ;;  %v5378_v24 = vld [vmem:[%s11042_s0 + $0x305] ss:$16 sm:%s1777_s7]   ;;  %v5400_v37 = vld [vmem:[%s11042_s0 + $0xd] ss:$16 sm:%s7123_s14]   ;;  %s7308_s7 = smov 3  ;;  %s2178_s14 = smov 192 }
  0x99   :  { %v1780_v32 = vsel %vm425_vm0, %v5378_v24, %v5377_v23  ;;  %v5379_v33 = vld [vmem:[%s11042_s0 + $0x305] ss:$16 sm:%s1782_s20]   ;;  %v5404_v40 = vld [vmem:[%s11042_s0 + $0x10d] ss:$16 sm:%s7151_s27]   ;;  %s1843_s27 = smov 3  ;;  %v1882_v51 = vsel %vm435_vm2, %v5400_v37, %v1877_v36  ;;  %s2201_s20 = smov 192 }
  0x9a   :  { %1585 = vrot.lane.b32.xlu2 %v1584_v26, %s6066_s13  ;;  %1700 = vrot.lane.b32.xlu1 %v1699_v31, %s6066_s13  ;;  %v1722_v26 = vsel %vm435_vm2, %v5366_v14, %v1717_v12  ;;  %v1836_v31 = vsel %vm435_vm2, %v5390_v10, %v1831_v21  ;;  %v5405_v43 = vld [vmem:[%s11042_s0 + $0x10d] ss:$16 sm:%s7159_s28]   ;;  %v1785_v45 = vsel %vm430_vm1, %v5379_v33, %v1780_v32  ;;  %s1915_s28 = smov 12 }
  0x9b   :  { %v5380_v46 = vld [vmem:[%s11042_s0 + $0x305] ss:$16 sm:%s7223_s25]   ;;  %s1851_s25 = smov 48  ;;  %4952 = vst.msk [vmem:[%s11043_s1 - $0x9] ss:$8 sm:$0xc0] %vm6_vm4, %v79_v9   ;;  %v1900_v54 = vsel %vm430_vm1, %v5404_v40, %v1895_v38 }
  0x9c   :  { %v7095_v42 = vpop.permute.xlu2 %827   ;;  %v7120_v49 = vpop.permute.xlu1 %735   ;;  %v5413_v50 = vld [vmem:[%s11042_s0 + $0x30d] ss:$16 sm:%s7167_s17]   ;;  %s7306_s17 = smov 192  ;;  %v5392_v57 = vld [vmem:[%s11042_s0 + $0x605] ss:$16 sm:%s1843_s27]   ;;  %v1790_v59 = vsel %vm435_vm2, %v5380_v46, %v1785_v45  ;;  %v1905_v1 = vsel %vm435_vm2, %v5405_v43, %v1900_v54  ;;  %s2119_s27 = smov 3 }
  0x9d   :  { %v5393_v58 = vld [vmem:[%s11042_s0 + $0x605] ss:$16 sm:%s1846_s5]   ;;  %s7324_s5 = smov 12  ;;  %v5418_v61 = vld [vmem:[%s11042_s0 + $0x40d] ss:$16 sm:%s7232_s12]   ;;  %s7337_s12 = smov 192 }
  0x9e   :  { %1745 = vrot.lane.b32.xlu0 %v1744_v48, %s6067_s22  ;;  %v5394_v0 = vld [vmem:[%s11042_s0 + $0x605] ss:$16 sm:%s1851_s25]   ;;  %5093 = vst.msk [vmem:[%s11043_s1 + $0x20] sm:$0xff] %vm439_vm5, %v6851_v16   ;;  %v1849_v7 = vsel %vm425_vm0, %v5393_v58, %v5392_v57  ;;  %s2099_s25 = smov 12 }
  0x9f   :  { %v2_v16 = vld [vmem:[%s11042_s0] ss:$8 sm:$0xf]   ;;  %v5415_v3 = vld [vmem:[%s11042_s0 + $0x30d] ss:$16 sm:%s7211_s19]   ;;  %5128 = vst.msk [vmem:[%s11043_s1 + $0x28] sm:$0xff] %vm439_vm5, %v6865_v22   ;;  %v1854_v24 = vsel %vm430_vm1, %v5394_v0, %v1849_v7 }
  0xa0   :  { %v7172_v2 = vpop.permute.xlu0 %781   ;;  %v5419_v5 = vld [vmem:[%s11042_s0 + $0x40d] ss:$16 sm:%s7234_s10]   ;;  %s7364_s10 = smov 12  ;;  %v3_v22 = vld [vmem:[%s11042_s0] ss:$8 sm:$0xf0]  }
  0xa1   :  { %v5_v8 = vsel %vm4_vm3, %v3_v22, %v2_v16  ;;  %v4923_v9 = vld [vmem:[%s11042_s0 + $0x40] ss:$8 sm:$0xf]   ;;  %v5427_v17 = vld [vmem:[%s11042_s0 + $0x60d] ss:$16 sm:%s7247_s4]   ;;  %s2211_s19 = smov 3 }
  0xa2   :  { %1654 = vrot.lane.b32.xlu2 %v1653_v55, %s6066_s13  ;;  %s7165_s13 = smov 3  ;;  %1768 = vrot.lane.b32.xlu1 %v1767_v60, %s6067_s22  ;;  %v5414_v55 = vld [vmem:[%s11042_s0 + $0x30d] ss:$16 sm:%s7197_s15]   ;;  %s2293_s15 = smov 192 }
  0xa3   :  { %v5412_v48 = vld [vmem:[%s11042_s0 + $0x30d] ss:$16 sm:%s7165_s13]   ;;  %v4924_v10 = vld [vmem:[%s11042_s0 + $0x40] ss:$8 sm:$0xf0]   ;;  %s2371_s13 = smov 3 }
  0xa4   :  { %v7190_v11 = vpop.permute.xlu2 %896   ;;  %v7214_v19 = vpop.permute.xlu1 %804   ;;  %v5417_v60 = vld [vmem:[%s11042_s0 + $0x40d] ss:$16 sm:%s7225_s29]   ;;  %v1941_v63 = vsel %vm425_vm0, %v5413_v50, %v5412_v48  ;;  %s1912_s29 = smov 3  ;;  %7 = vst.msk [vmem:[%s11043_s1] ss:$8 sm:$0x3] %vm6_vm4, %v5_v8  }
  0xa5   :  { %v1946_v14 = vsel %vm430_vm1, %v5414_v55, %v1941_v63  ;;  %v1964_v15 = vsel %vm425_vm0, %v5418_v61, %v5417_v60  ;;  %v5420_v21 = vld [vmem:[%s11042_s0 + $0x40d] ss:$16 sm:%s7245_s11]   ;;  %v5395_v25 = vld [vmem:[%s11042_s0 + $0x605] ss:$16 sm:%s7306_s17]   ;;  %s1925_s17 = smov 192  ;;  %s2242_s11 = smov 48 }
  0xa6   :  { %1814 = vrot.lane.b32.xlu0 %v1813_v18, %s6067_s22  ;;  %v5428_v18 = vld [vmem:[%s11042_s0 + $0x60d] ss:$16 sm:%s7255_s3]   ;;  %s7394_s3 = smov 48  ;;  %4920 = vst.msk [vmem:[%s11043_s1 - $0xf] ss:$8 sm:$0xc] %vm6_vm4, %v5_v8   ;;  %v1951_v29 = vsel %vm435_vm2, %v5415_v3, %v1946_v14  ;;  %v1859_v38 = vsel %vm435_vm2, %v5395_v25, %v1854_v24 }
  0xa7   :  { %4921 = vst.msk [vmem:[%s11043_s1 - $0x1e] ss:$8 sm:$0x30] %vm6_vm4, %v5_v8   ;;  %v5407_v27 = vld [vmem:[%s11042_s0 + $0x20d] ss:$16 sm:%s1912_s29]   ;;  %s1920_s29 = smov 48  ;;  %v2010_v43 = vsel %vm425_vm0, %v5428_v18, %v5427_v17 }
  0xa8   :  { %v7270_v35 = vpop.permute.xlu0 %850   ;;  %v5429_v32 = vld [vmem:[%s11042_s0 + $0x60d] ss:$16 sm:%s7262_s21]   ;;  %v5432_v33 = vld [vmem:[%s11042_s0 + $0x85] ss:$16 sm:%s7308_s7]   ;;  %s1984_s21 = smov 12  ;;  %s2260_s7 = smov 12 }
  0xa9   :  { %v5433_v36 = vld [vmem:[%s11042_s0 + $0x85] ss:$16 sm:%s7324_s5]   ;;  %4922 = vst.msk [vmem:[%s11043_s1 - $0x2d] ss:$8 sm:$0xc0] %vm6_vm4, %v5_v8   ;;  %v2015_v58 = vsel %vm430_vm1, %v5429_v32, %v2010_v43  ;;  %s1989_s5 = smov 48 }
  0xaa   :  { %1723 = vrot.lane.b32.xlu2 %v1722_v26, %s6067_s22  ;;  %1837 = vrot.lane.b32.xlu1 %v1836_v31, %s6067_s22  ;;  %v19_v26 = vsel %vm4_vm3, %v4924_v10, %v4923_v9  ;;  %v1969_v31 = vsel %vm430_vm1, %v5419_v5, %v1964_v15  ;;  %v4965_v37 = vld [vmem:[%s11042_s0 + $0x200] ss:$8 sm:$0xf]   ;;  %s2402_s4 = smov 48 }
  0xab   :  { %4925 = vst.msk [vmem:[%s11043_s1 + $0x4] ss:$8 sm:$0x3] %vm6_vm4, %v19_v26   ;;  %v5408_v40 = vld [vmem:[%s11042_s0 + $0x20d] ss:$16 sm:%s1915_s28]   ;;  %v1974_v46 = vsel %vm435_vm2, %v5420_v21, %v1969_v31  ;;  %s2443_s28 = smov 12 }
  0xac   :  { %v7287_v44 = vpop.permute.xlu2 %965   ;;  %v7311_v52 = vpop.permute.xlu1 %873   ;;  %4926 = vst.msk [vmem:[%s11043_s1 - $0xb] ss:$8 sm:$0xc] %vm6_vm4, %v19_v26   ;;  %v4966_v45 = vld [vmem:[%s11042_s0 + $0x200] ss:$8 sm:$0xf0]  }
  0xad   :  { %v5430_v48 = vld [vmem:[%s11042_s0 + $0x60d] ss:$16 sm:%s7264_s24]   ;;  %v5434_v50 = vld [vmem:[%s11042_s0 + $0x85] ss:$16 sm:%s7326_s9]   ;;  %s1981_s9 = smov 3  ;;  %s2127_s24 = smov 48 }
  0xae   :  { %1883 = vrot.lane.b32.xlu0 %v1882_v51, %s6067_s22  ;;  %4927 = vst.msk [vmem:[%s11043_s1 - $0x1a] ss:$8 sm:$0x30] %vm6_vm4, %v19_v26   ;;  %v1918_v51 = vsel %vm425_vm0, %v5408_v40, %v5407_v27  ;;  %v5409_v54 = vld [vmem:[%s11042_s0 + $0x20d] ss:$16 sm:%s1920_s29]   ;;  %v2020_v3 = vsel %vm435_vm2, %v5430_v48, %v2015_v58  ;;  %s2283_s29 = smov 12 }
  0xaf   :  { %4928 = vst.msk [vmem:[%s11043_s1 - $0x29] ss:$8 sm:$0xc0] %vm6_vm4, %v19_v26   ;;  %v4971_v55 = vld [vmem:[%s11042_s0 + $0x240] ss:$8 sm:$0xf]  }
  0xb0   :  { %v7382_v12 = vpop.permute.xlu0 %919   ;;  %v5442_v60 = vld [vmem:[%s11042_s0 + $0x285] ss:$16 sm:%s7339_s6]   ;;  %440 = vst.msk [vmem:[%s11043_s1] sm:$0xff] %vm439_vm5, %v6797_v56   ;;  %v124_v56 = vsel %vm4_vm3, %v4966_v45, %v4965_v37  ;;  %v4972_v61 = vld [vmem:[%s11042_s0 + $0x240] ss:$8 sm:$0xf0]  }
  0xb1   :  { %v5435_v63 = vld [vmem:[%s11042_s0 + $0x85] ss:$16 sm:%s7337_s12]   ;;  %5123 = vst.msk [vmem:[%s11043_s1 + $0x8] sm:$0xff] %vm439_vm5, %v6938_v53   ;;  %v1923_v53 = vsel %vm430_vm1, %v5409_v54, %v1918_v51  ;;  %v139_v8 = vsel %vm4_vm3, %v4972_v61, %v4971_v55  ;;  %v5013_v21 = vld [vmem:[%s11042_s0 + $0x400] ss:$8 sm:$0xf]  }
  0xb2   :  { %1791 = vrot.lane.b32.xlu2 %v1790_v59, %s6067_s22  ;;  %1906 = vrot.lane.b32.xlu1 %v1905_v1, %s6067_s22  ;;  %v2033_v59 = vsel %vm425_vm0, %v5433_v36, %v5432_v33  ;;  %v5410_v16 = vld [vmem:[%s11042_s0 + $0x20d] ss:$16 sm:%s1925_s17]   ;;  %s2096_s17 = smov 3  ;;  %s2150_s6 = smov 48 }
  0xb3   :  { %v5443_v1 = vld [vmem:[%s11042_s0 + $0x285] ss:$16 sm:%s7364_s10]   ;;  %s2086_s10 = smov 192  ;;  %v2038_v7 = vsel %vm430_vm1, %v5434_v50, %v2033_v59  ;;  %4967 = vst.msk [vmem:[%s11043_s1 + $0x40] ss:$8 sm:$0x3] %vm6_vm4, %v124_v56   ;;  %v1928_v9 = vsel %vm435_vm2, %v5410_v16, %v1923_v53 }
  0xb4   :  { %v7405_v23 = vpop.permute.xlu2 %1034   ;;  %v7425_v30 = vpop.permute.xlu1 %942   ;;  %v5444_v22 = vld [vmem:[%s11042_s0 + $0x285] ss:$16 sm:%s7394_s3]   ;;  %4968 = vst.msk [vmem:[%s11043_s1 + $0x31] ss:$8 sm:$0xc] %vm6_vm4, %v124_v56   ;;  %v2079_v14 = vsel %vm425_vm0, %v5443_v1, %v5442_v60  ;;  %v2043_v17 = vsel %vm435_vm2, %v5435_v63, %v2038_v7  ;;  %s2155_s12 = smov 192 }
  0xb5   :  { %v5447_v10 = vld [vmem:[%s11042_s0 + $0x385] ss:$16 sm:%s2096_s17]   ;;  %4969 = vst.msk [vmem:[%s11043_s1 + $0x22] ss:$8 sm:$0x30] %vm6_vm4, %v124_v56   ;;  %v2084_v26 = vsel %vm430_vm1, %v5444_v22, %v2079_v14  ;;  %s2219_s3 = smov 48 }
  0xb6   :  { %1952 = vrot.lane.b32.xlu0 %v1951_v29, %s6067_s22  ;;  %v5448_v15 = vld [vmem:[%s11042_s0 + $0x385] ss:$16 sm:%s2099_s25]   ;;  %4970 = vst.msk [vmem:[%s11043_s1 + $0x13] ss:$8 sm:$0xc0] %vm6_vm4, %v124_v56   ;;  %s2168_s25 = smov 12 }
  0xb7   :  { %v5445_v18 = vld [vmem:[%s11042_s0 + $0x285] ss:$16 sm:%s2086_s10]   ;;  %4973 = vst.msk [vmem:[%s11043_s1 + $0x44] ss:$8 sm:$0x3] %vm6_vm4, %v139_v8   ;;  %v2102_v27 = vsel %vm425_vm0, %v5448_v15, %v5447_v10  ;;  %s2247_s17 = smov 192 }
  0xb8   :  { %v7489_v57 = vpop.permute.xlu0 %988   ;;  %v5449_v24 = vld [vmem:[%s11042_s0 + $0x385] ss:$16 sm:%s2104_s2]   ;;  %4974 = vst.msk [vmem:[%s11043_s1 + $0x35] ss:$8 sm:$0xc] %vm6_vm4, %v139_v8   ;;  %v2089_v36 = vsel %vm435_vm2, %v5445_v18, %v2084_v26  ;;  %s2173_s2 = smov 48 }
  0xb9   :  { %v5014_v29 = vld [vmem:[%s11042_s0 + $0x400] ss:$8 sm:$0xf0]   ;;  %4975 = vst.msk [vmem:[%s11043_s1 + $0x26] ss:$8 sm:$0x30] %vm6_vm4, %v139_v8  }
  0xba   :  { %1860 = vrot.lane.b32.xlu2 %v1859_v38, %s6067_s22  ;;  %1975 = vrot.lane.b32.xlu1 %v1974_v46, %s6067_s22  ;;  %v5457_v31 = vld [vmem:[%s11042_s0 + $0x585] ss:$16 sm:%s2142_s8]   ;;  %v244_v40 = vsel %vm4_vm3, %v5014_v29, %v5013_v21  ;;  %s1994_s8 = smov 192  ;;  %s2420_s10 = smov 12 }
  0xbb   :  { %4976 = vst.msk [vmem:[%s11043_s1 + $0x17] ss:$8 sm:$0xc0] %vm6_vm4, %v139_v8   ;;  %v5458_v33 = vld [vmem:[%s11042_s0 + $0x585] ss:$16 sm:%s2145_s16]   ;;  %s2693_s16 = smov 3 }
  0xbc   :  { %v1103_v0 = vpop.permute.xlu2 %1102   ;;  %v7529_v5 = vpop.permute.xlu1 %1011   ;;  %5098 = vst.msk [vmem:[%s11043_s1 + $0x40] sm:$0xff] %vm439_vm5, %v6824_v4   ;;  %v2107_v4 = vsel %vm430_vm1, %v5449_v24, %v2102_v27  ;;  %v5450_v38 = vld [vmem:[%s11042_s0 + $0x385] ss:$16 sm:%s7549_s30]   ;;  %v5019_v43 = vld [vmem:[%s11042_s0 + $0x440] ss:$8 sm:$0xf]  }
  0xbd   :  { %5232 = vst.msk [vmem:[%s11043_s1 + $0x20] sm:$0xff] %vm1082_vm6, %v1103_v0   ;;  %v5459_v45 = vld [vmem:[%s11042_s0 + $0x585] ss:$16 sm:%s2150_s6]   ;;  %v5020_v46 = vld [vmem:[%s11042_s0 + $0x440] ss:$8 sm:$0xf0]   ;;  %v2112_v48 = vsel %vm435_vm2, %v5450_v38, %v2107_v4 }
  0xbe   :  { %2021 = vrot.lane.b32.xlu0 %v2020_v3, %s6067_s22  ;;  %5133 = vst.msk [vmem:[%s11043_s1 + $0x48] sm:$0xff] %vm439_vm5, %v6983_v6   ;;  %v2148_v6 = vsel %vm425_vm0, %v5458_v33, %v5457_v31  ;;  %v5460_v54 = vld [vmem:[%s11042_s0 + $0x585] ss:$16 sm:%s2155_s12]   ;;  %v259_v55 = vsel %vm4_vm3, %v5020_v46, %v5019_v43  ;;  %s2288_s6 = smov 48  ;;  %s2349_s12 = smov 3 }
  0xbf   :  { %5015 = vst.msk [vmem:[%s11043_s1 + $0x80] ss:$8 sm:$0x3] %vm6_vm4, %v244_v40   ;;  %v2153_v51 = vsel %vm430_vm1, %v5459_v45, %v2148_v6  ;;  %v5422_v58 = vld [vmem:[%s11042_s0 + $0x50d] ss:$16 sm:%s1981_s9]   ;;  %s2257_s9 = smov 3 }
  0xc0   :  { %v7579_v25 = vpop.permute.xlu0 %1057   ;;  %5016 = vst.msk [vmem:[%s11043_s1 + $0x71] ss:$8 sm:$0xc] %vm6_vm4, %v244_v40   ;;  %v4989_v60 = vld [vmem:[%s11042_s0 + $0x300] ss:$8 sm:$0xf]   ;;  %v2158_v63 = vsel %vm435_vm2, %v5460_v54, %v2153_v51 }
  0xc1   :  { %5017 = vst.msk [vmem:[%s11043_s1 + $0x62] ss:$8 sm:$0x30] %vm6_vm4, %v244_v40   ;;  %v4990_v56 = vld [vmem:[%s11042_s0 + $0x300] ss:$8 sm:$0xf0]  }
  0xc2   :  { %1929 = vrot.lane.b32.xlu2 %v1928_v9, %s6067_s22  ;;  %2044 = vrot.lane.b32.xlu1 %v2043_v17, %s6067_s22  ;;  %5018 = vst.msk [vmem:[%s11043_s1 + $0x53] ss:$8 sm:$0xc0] %vm6_vm4, %v244_v40   ;;  %v4995_v8 = vld [vmem:[%s11042_s0 + $0x340] ss:$8 sm:$0xf]  }
  0xc3   :  { %v5423_v61 = vld [vmem:[%s11042_s0 + $0x50d] ss:$16 sm:%s1984_s21]   ;;  %5021 = vst.msk [vmem:[%s11043_s1 + $0x84] ss:$8 sm:$0x3] %vm6_vm4, %v259_v55   ;;  %s2224_s21 = smov 192 }
  0xc4   :  { %v1172_v32 = vpop.permute.xlu2 %1171   ;;  %v1081_v37 = vpop.permute.xlu1 %1080   ;;  %v1987_v53 = vsel %vm425_vm0, %v5423_v61, %v5422_v58  ;;  %v5424_v16 = vld [vmem:[%s11042_s0 + $0x50d] ss:$16 sm:%s1989_s5]   ;;  %5022 = vst.msk [vmem:[%s11043_s1 + $0x75] ss:$8 sm:$0xc] %vm6_vm4, %v259_v55   ;;  %s2050_s5 = smov 3 }
  0xc5   :  { %1083 = vst.msk [vmem:[%s11043_s1] sm:$0xff] %vm1082_vm6, %v1081_v37   ;;  %v1992_v1 = vsel %vm430_vm1, %v5424_v16, %v1987_v53  ;;  %v5425_v3 = vld [vmem:[%s11042_s0 + $0x50d] ss:$16 sm:%s1994_s8]   ;;  %s2214_s8 = smov 12  ;;  %s2517_s30 = smov 48 }
  0xc6   :  { %2090 = vrot.lane.b32.xlu0 %v2089_v36, %s6067_s22  ;;  %5023 = vst.msk [vmem:[%s11043_s1 + $0x66] ss:$8 sm:$0x30] %vm6_vm4, %v259_v55   ;;  %v1997_v7 = vsel %vm435_vm2, %v5425_v3, %v1992_v1  ;;  %v5462_v22 = vld [vmem:[%s11042_s0 + $0x685] ss:$16 sm:%s2165_s18]   ;;  %s2352_s18 = smov 12 }
  0xc7   :  { %5024 = vst.msk [vmem:[%s11043_s1 + $0x57] ss:$8 sm:$0xc0] %vm6_vm4, %v259_v55   ;;  %v5463_v9 = vld [vmem:[%s11042_s0 + $0x685] ss:$16 sm:%s2168_s25]   ;;  %s2063_s25 = smov 192 }
  0xc8   :  { %v1126_v50 = vpop.permute.xlu0 %1125   ;;  %5108 = vst.msk [vmem:[%s11043_s1 + $0x80] sm:$0xff] %vm439_vm5, %v6759_v39   ;;  %v184_v39 = vsel %vm4_vm3, %v4990_v56, %v4989_v60  ;;  %v4996_v10 = vld [vmem:[%s11042_s0 + $0x340] ss:$8 sm:$0xf0]   ;;  %v2171_v15 = vsel %vm425_vm0, %v5463_v9, %v5462_v22  ;;  %v5464_v17 = vld [vmem:[%s11042_s0 + $0x685] ss:$16 sm:%s2173_s2]  }
  0xc9   :  { %5237 = vst.msk [vmem:[%s11043_s1 + $0x40] sm:$0xff] %vm1082_vm6, %v1126_v50   ;;  %v5465_v18 = vld [vmem:[%s11042_s0 + $0x685] ss:$16 sm:%s2178_s14]   ;;  %v199_v26 = vsel %vm4_vm3, %v4996_v10, %v4995_v8  ;;  %v5037_v36 = vld [vmem:[%s11042_s0 + $0x500] ss:$8 sm:$0xf]  }
  0xca   :  { %2113 = vrot.lane.b32.xlu1 %v2112_v48, %s6067_s22  ;;  %1998 = vrot.lane.b32.xlu2 %v1997_v7, %s6067_s22  ;;  %5247 = vst.msk [vmem:[%s11043_s1 + $0x80] sm:$0xff] %vm1082_vm6, %v1172_v32   ;;  %v5038_v37 = vld [vmem:[%s11042_s0 + $0x500] ss:$8 sm:$0xf0]   ;;  %s2234_s2 = smov 3  ;;  %s2237_s14 = smov 12 }
  0xcb   :  { %5143 = vst.msk [vmem:[%s11043_s1 + $0x88] sm:$0xff] %vm439_vm5, %v6921_v47   ;;  %v2176_v47 = vsel %vm430_vm1, %v5464_v17, %v2171_v15  ;;  %v5472_v24 = vld [vmem:[%s11042_s0 + $0x18d] ss:$16 sm:%s2211_s19]   ;;  %v5043_v50 = vld [vmem:[%s11042_s0 + $0x540] ss:$8 sm:$0xf]  }
  0xcc   :  { %v7663_v59 = vpop.permute.xlu2 %1240   ;;  %v7683_v0 = vpop.permute.xlu1 %1148   ;;  %4991 = vst.msk [vmem:[%s11043_s1 + $0x60] ss:$8 sm:$0x3] %vm6_vm4, %v184_v39   ;;  %v2181_v21 = vsel %vm435_vm2, %v5465_v18, %v2176_v47  ;;  %v5473_v27 = vld [vmem:[%s11042_s0 + $0x18d] ss:$16 sm:%s2214_s8]   ;;  %s2053_s8 = smov 12 }
  0xcd   :  { %4992 = vst.msk [vmem:[%s11043_s1 + $0x51] ss:$8 sm:$0xc] %vm6_vm4, %v184_v39   ;;  %v2217_v31 = vsel %vm425_vm0, %v5473_v27, %v5472_v24  ;;  %v5474_v32 = vld [vmem:[%s11042_s0 + $0x18d] ss:$16 sm:%s2219_s3]   ;;  %s2379_s19 = smov 48 }
  0xce   :  { %2159 = vrot.lane.b32.xlu0 %v2158_v63, %s6067_s22  ;;  %4993 = vst.msk [vmem:[%s11043_s1 + $0x42] ss:$8 sm:$0x30] %vm6_vm4, %v184_v39   ;;  %v2222_v4 = vsel %vm430_vm1, %v5474_v32, %v2217_v31  ;;  %v5475_v38 = vld [vmem:[%s11042_s0 + $0x18d] ss:$16 sm:%s2224_s21]   ;;  %s2132_s21 = smov 192 }
  0xcf   :  { %4994 = vst.msk [vmem:[%s11043_s1 + $0x33] ss:$8 sm:$0xc0] %vm6_vm4, %v184_v39   ;;  %v2227_v40 = vsel %vm435_vm2, %v5475_v38, %v2222_v4  ;;  %v5437_v43 = vld [vmem:[%s11042_s0 + $0x185] ss:$16 sm:%s2050_s5]   ;;  %s2188_s5 = smov 3 }
  0xd0   :  { %v7730_v14 = vpop.permute.xlu0 %1194   ;;  %4997 = vst.msk [vmem:[%s11043_s1 + $0x64] ss:$8 sm:$0x3] %vm6_vm4, %v199_v26   ;;  %v5438_v6 = vld [vmem:[%s11042_s0 + $0x185] ss:$16 sm:%s2053_s8]   ;;  %s2191_s8 = smov 12 }
  0xd1   :  { %4998 = vst.msk [vmem:[%s11043_s1 + $0x55] ss:$8 sm:$0xc] %vm6_vm4, %v199_v26   ;;  %v2056_v46 = vsel %vm425_vm0, %v5438_v6, %v5437_v43  ;;  %v5439_v48 = vld [vmem:[%s11042_s0 + $0x185] ss:$16 sm:%s2058_s26]   ;;  %s2196_s26 = smov 48 }
  0xd2   :  { %2182 = vrot.lane.b32.xlu1 %v2181_v21, %s6067_s22  ;;  %4999 = vst.msk [vmem:[%s11043_s1 + $0x46] ss:$8 sm:$0x30] %vm6_vm4, %v199_v26   ;;  %v2061_v51 = vsel %vm430_vm1, %v5439_v48, %v2056_v46  ;;  %v5440_v54 = vld [vmem:[%s11042_s0 + $0x185] ss:$16 sm:%s2063_s25]   ;;  %s6068_s25 = smov 64  }
  0xd3   :  { %5000 = vst.msk [vmem:[%s11043_s1 + $0x37] ss:$8 sm:$0xc0] %vm6_vm4, %v199_v26   ;;  %v5044_v55 = vld [vmem:[%s11042_s0 + $0x540] ss:$8 sm:$0xf0]   ;;  %v2066_v58 = vsel %vm435_vm2, %v5440_v54, %v2061_v51 }
  0xd4   :  { %v7762_v29 = vpop.permute.xlu1 %1217   ;;  %v7772_v33 = vpop.permute.xlu2 %1309   ;;  %5103 = vst.msk [vmem:[%s11043_s1 + $0x60] sm:$0xff] %vm439_vm5, %v6878_v28   ;;  %v304_v28 = vsel %vm4_vm3, %v5038_v37, %v5037_v36  ;;  %v5477_v60 = vld [vmem:[%s11042_s0 + $0x28d] ss:$16 sm:%s2234_s2]   ;;  %2067 = vrot.lane.b32.xlu2 %v2066_v58, %s6067_s22  ;;  %s2280_s2 = smov 3  ;;  %v319_v1 = vsel %vm4_vm3, %v5044_v55, %v5043_v50  ;;  %s2555_s3 = smov 3 }
  0xd5   :  { %5242 = vst.msk [vmem:[%s11043_s1 + $0x60] sm:$0xff] %vm1082_vm6, %v7683_v0   ;;  %v5478_v56 = vld [vmem:[%s11042_s0 + $0x28d] ss:$16 sm:%s2237_s14]   ;;  %v5061_v10 = vld [vmem:[%s11042_s0 + $0x600] ss:$8 sm:$0xf]  }
  0xd6   :  { %2228 = vrot.lane.b32.xlu0 %v2227_v40, %s6067_s22  ;;  %5138 = vst.msk [vmem:[%s11043_s1 + $0x68] sm:$0xff] %vm439_vm5, %v7026_v20   ;;  %v2240_v20 = vsel %vm425_vm0, %v5478_v56, %v5477_v60  ;;  %v5479_v63 = vld [vmem:[%s11042_s0 + $0x28d] ss:$16 sm:%s2242_s11]   ;;  %s2430_s14 = smov 192  ;;  %s2440_s11 = smov 3 }
  0xd7   :  { %5039 = vst.msk [vmem:[%s11043_s1 + $0xa0] ss:$8 sm:$0x3] %vm6_vm4, %v304_v28   ;;  %v2245_v53 = vsel %vm430_vm1, %v5479_v63, %v2240_v20  ;;  %v5480_v16 = vld [vmem:[%s11042_s0 + $0x28d] ss:$16 sm:%s2247_s17]   ;;  %s2122_s17 = smov 12 }
  0xd8   :  { %v7808_v45 = vpop.permute.xlu0 %1263   ;;  %5040 = vst.msk [vmem:[%s11043_s1 + $0x91] ss:$8 sm:$0xc] %vm6_vm4, %v304_v28   ;;  %v2250_v3 = vsel %vm435_vm2, %v5480_v16, %v2245_v53  ;;  %v5487_v7 = vld [vmem:[%s11042_s0 + $0x48d] ss:$16 sm:%s2280_s2]   ;;  %s2397_s2 = smov 12 }
  0xd9   :  { %5041 = vst.msk [vmem:[%s11043_s1 + $0x82] ss:$8 sm:$0x30] %vm6_vm4, %v304_v28   ;;  %v5488_v22 = vld [vmem:[%s11042_s0 + $0x48d] ss:$16 sm:%s2283_s29]   ;;  %s2770_s29 = smov 48 }
  0xda   :  { %2251 = vrot.lane.b32.xlu1 %v2250_v3, %s6067_s22  ;;  %5042 = vst.msk [vmem:[%s11043_s1 + $0x73] ss:$8 sm:$0xc0] %vm6_vm4, %v304_v28   ;;  %v2286_v39 = vsel %vm425_vm0, %v5488_v22, %v5487_v7  ;;  %v5489_v8 = vld [vmem:[%s11042_s0 + $0x48d] ss:$16 sm:%s2288_s6]   ;;  %s2512_s6 = smov 12 }
  0xdb   :  { %5045 = vst.msk [vmem:[%s11043_s1 + $0xa4] ss:$8 sm:$0x3] %vm6_vm4, %v319_v1   ;;  %v5062_v15 = vld [vmem:[%s11042_s0 + $0x600] ss:$8 sm:$0xf0]   ;;  %v2291_v17 = vsel %vm430_vm1, %v5489_v8, %v2286_v39 }
  0xdc   :  { %v7847_v61 = vpop.permute.xlu1 %1286   ;;  %v7858_v0 = vpop.permute.xlu2 %1378   ;;  %v5490_v47 = vld [vmem:[%s11042_s0 + $0x48d] ss:$16 sm:%s2293_s15]   ;;  %s2303_s15 = smov 3  ;;  %5046 = vst.msk [vmem:[%s11043_s1 + $0x95] ss:$8 sm:$0xc] %vm6_vm4, %v319_v1  }
  0xdd   :  { %v2296_v18 = vsel %vm435_vm2, %v5490_v47, %v2291_v17  ;;  %v5452_v21 = vld [vmem:[%s11042_s0 + $0x485] ss:$16 sm:%s2119_s27]   ;;  %s2306_s27 = smov 12  ;;  %5047 = vst.msk [vmem:[%s11043_s1 + $0x86] ss:$8 sm:$0x30] %vm6_vm4, %v319_v1  }
  0xde   :  { %2297 = vrot.lane.b32.xlu0 %v2296_v18, %s6067_s22  ;;  %v5453_v24 = vld [vmem:[%s11042_s0 + $0x485] ss:$16 sm:%s2122_s17]   ;;  %s2311_s17 = smov 48  ;;  %5048 = vst.msk [vmem:[%s11043_s1 + $0x77] ss:$8 sm:$0xc0] %vm6_vm4, %v319_v1  }
  0xdf   :  { %v2125_v27 = vsel %vm425_vm0, %v5453_v24, %v5452_v21  ;;  %v5454_v31 = vld [vmem:[%s11042_s0 + $0x485] ss:$16 sm:%s2127_s24]   ;;  %s2316_s24 = smov 192  ;;  %5113 = vst.msk [vmem:[%s11043_s1 + $0xa0] sm:$0xff] %vm439_vm5, %v6811_v62  }
  0xe0   :  { %v7893_v9 = vpop.permute.xlu0 %1332   ;;  %v5067_v62 = vld [vmem:[%s11042_s0 + $0x640] ss:$8 sm:$0xf]   ;;  %v2130_v36 = vsel %vm430_vm1, %v5454_v31, %v2125_v27  ;;  %v5455_v37 = vld [vmem:[%s11042_s0 + $0x485] ss:$16 sm:%s2132_s21]   ;;  %5252 = vst.msk [vmem:[%s11043_s1 + $0xa0] sm:$0xff] %vm1082_vm6, %v7730_v14   ;;  %v364_v14 = vsel %vm4_vm3, %v5062_v15, %v5061_v10 }
  0xe1   :  { %v5068_v4 = vld [vmem:[%s11042_s0 + $0x640] ss:$8 sm:$0xf0]   ;;  %v2135_v38 = vsel %vm435_vm2, %v5455_v37, %v2130_v36  ;;  %v5492_v40 = vld [vmem:[%s11042_s0 + $0x58d] ss:$16 sm:%s2303_s15]   ;;  %5148 = vst.msk [vmem:[%s11043_s1 + $0xa8] sm:$0xff] %vm439_vm5, %v7078_v34  }
  0xe2   :  { %2136 = vrot.lane.b32.xlu2 %v2135_v38, %s6067_s22  ;;  %v5493_v34 = vld [vmem:[%s11042_s0 + $0x58d] ss:$16 sm:%s2306_s27]   ;;  %5262 = vst.msk [vmem:[%s11043_s1 + $0x8] sm:$0xff] %vm1082_vm6, %v7663_v59   ;;  %v379_v50 = vsel %vm4_vm3, %v5068_v4, %v5067_v62  ;;  %s2374_s21 = smov 12  ;;  %s2384_s15 = smov 192 }
  0xe3   :  { %v2309_v59 = vsel %vm425_vm0, %v5493_v34, %v5492_v40  ;;  %v5494_v43 = vld [vmem:[%s11042_s0 + $0x58d] ss:$16 sm:%s2311_s17]   ;;  %s2357_s17 = smov 48  ;;  %5063 = vst.msk [vmem:[%s11043_s1 + $0xc0] ss:$8 sm:$0x3] %vm6_vm4, %v364_v14  }
  0xe4   :  { %v7925_v26 = vpop.permute.xlu1 %1355   ;;  %v7935_v32 = vpop.permute.xlu2 %1447   ;;  %v2314_v46 = vsel %vm430_vm1, %v5494_v43, %v2309_v59  ;;  %v5495_v48 = vld [vmem:[%s11042_s0 + $0x58d] ss:$16 sm:%s2316_s24]   ;;  %s2362_s24 = smov 192  ;;  %5064 = vst.msk [vmem:[%s11043_s1 + $0xb1] ss:$8 sm:$0xc] %vm6_vm4, %v364_v14  }
  0xe5   :  { %v2319_v51 = vsel %vm435_vm2, %v5495_v48, %v2314_v46  ;;  %v5502_v54 = vld [vmem:[%s11042_s0 + $0x4] ss:$16 sm:%s2349_s12]   ;;  %5065 = vst.msk [vmem:[%s11043_s1 + $0xa2] ss:$8 sm:$0x30] %vm6_vm4, %v364_v14   ;;  %s2489_s12 = smov 12 }
  0xe6   :  { %2320 = vrot.lane.b32.xlu1 %v2319_v51, %s6067_s22  ;;  %v5503_v28 = vld [vmem:[%s11042_s0 + $0x4] ss:$16 sm:%s2352_s18]   ;;  %5066 = vst.msk [vmem:[%s11043_s1 + $0x93] ss:$8 sm:$0xc0] %vm6_vm4, %v364_v14   ;;  %s2494_s18 = smov 48 }
  0xe7   :  { %v2355_v55 = vsel %vm425_vm0, %v5503_v28, %v5502_v54  ;;  %v5504_v58 = vld [vmem:[%s11042_s0 + $0x4] ss:$16 sm:%s2357_s17]   ;;  %5069 = vst.msk [vmem:[%s11043_s1 + $0xc4] ss:$8 sm:$0x3] %vm6_vm4, %v379_v50   ;;  %s2532_s27 = smov 3 }
  0xe8   :  { %v7980_v6 = vpop.permute.xlu0 %1401   ;;  %v2360_v60 = vsel %vm430_vm1, %v5504_v58, %v2355_v55  ;;  %v5505_v56 = vld [vmem:[%s11042_s0 + $0x4] ss:$16 sm:%s2362_s24]   ;;  %5070 = vst.msk [vmem:[%s11043_s1 + $0xb5] ss:$8 sm:$0xc] %vm6_vm4, %v379_v50   ;;  %s2334_s24 = smov 48 }
  0xe9   :  { %v2365_v20 = vsel %vm435_vm2, %v5505_v56, %v2360_v60  ;;  %v5467_v63 = vld [vmem:[%s11042_s0 + $0x8d] ss:$16 sm:%s2188_s5]   ;;  %5071 = vst.msk [vmem:[%s11043_s1 + $0xa6] ss:$8 sm:$0x30] %vm6_vm4, %v379_v50   ;;  %s2425_s5 = smov 48 }
  0xea   :  { %2366 = vrot.lane.b32.xlu0 %v2365_v20, %s6068_s25  ;;  %v5468_v53 = vld [vmem:[%s11042_s0 + $0x8d] ss:$16 sm:%s2191_s8]   ;;  %5072 = vst.msk [vmem:[%s11043_s1 + $0x97] ss:$8 sm:$0xc0] %vm6_vm4, %v379_v50   ;;  %s2578_s8 = smov 3 }
  0xeb   :  { %v2194_v1 = vsel %vm425_vm0, %v5468_v53, %v5467_v63  ;;  %v5469_v3 = vld [vmem:[%s11042_s0 + $0x8d] ss:$16 sm:%s2196_s26]   ;;  %5118 = vst.msk [vmem:[%s11043_s1 + $0xc0] sm:$0xff] %vm439_vm5, %v6907_v41   ;;  %v4977_v37 = vld [vmem:[%s11042_s0 + $0x280] ss:$8 sm:$0xf]  }
  0xec   :  { %v8039_v16 = vpop.permute.xlu1 %1424   ;;  %v2199_v41 = vsel %vm430_vm1, %v5469_v3, %v2194_v1  ;;  %v5470_v7 = vld [vmem:[%s11042_s0 + $0x8d] ss:$16 sm:%s2201_s20]   ;;  %5257 = vst.msk [vmem:[%s11043_s1 + $0xc0] sm:$0xff] %vm1082_vm6, %v7762_v29   ;;  %v4929_v29 = vld [vmem:[%s11042_s0 + $0x80] ss:$8 sm:$0xf]   ;;  %v8215_v40 = vpop.permute.xlu2 %1516  }
  0xed   :  { %v2204_v22 = vsel %vm435_vm2, %v5470_v7, %v2199_v41  ;;  %v5506_v39 = vld [vmem:[%s11042_s0 + $0x104] ss:$16 sm:%s2371_s13]   ;;  %5153 = vst.msk [vmem:[%s11043_s1 + $0xc8] sm:$0xff] %vm439_vm5, %v7120_v49   ;;  %s2417_s20 = smov 3  ;;  %s2499_s13 = smov 192 }
  0xee   :  { %2205 = vrot.lane.b32.xlu2 %v2204_v22, %s6067_s22  ;;  %v5507_v49 = vld [vmem:[%s11042_s0 + $0x104] ss:$16 sm:%s2374_s21]   ;;  %5267 = vst.msk [vmem:[%s11043_s1 + $0x28] sm:$0xff] %vm1082_vm6, %v7808_v45   ;;  %s2453_s21 = smov 192  ;;  %s2326_s26 = smov 3 }
  0xef   :  { %v4930_v45 = vld [vmem:[%s11042_s0 + $0x80] ss:$8 sm:$0xf0]   ;;  %v2377_v8 = vsel %vm425_vm0, %v5507_v49, %v5506_v39  ;;  %v5508_v10 = vld [vmem:[%s11042_s0 + $0x104] ss:$16 sm:%s2379_s19]   ;;  %5277 = vst.msk [vmem:[%s11043_s1 + $0x68] sm:$0xff] %vm1082_vm6, %v7772_v33  }
  0xf0   :  { %v2382_v33 = vsel %vm430_vm1, %v5508_v10, %v2377_v8  ;;  %v5509_v15 = vld [vmem:[%s11042_s0 + $0x104] ss:$16 sm:%s2384_s15]   ;;  %5272 = vst.msk [vmem:[%s11043_s1 + $0x48] sm:$0xff] %vm1082_vm6, %v7847_v61   ;;  %v4935_v61 = vld [vmem:[%s11042_s0 + $0xc0] ss:$8 sm:$0xf]   ;;  %v8148_v62 = vpop.permute.xlu0 %1470  }
  0xf1   :  { %v2387_v17 = vsel %vm435_vm2, %v5509_v15, %v2382_v33  ;;  %v5516_v47 = vld [vmem:[%s11042_s0 + $0x304] ss:$16 sm:%s2417_s20]   ;;  %5282 = vst.msk [vmem:[%s11043_s1 + $0x88] sm:$0xff] %vm1082_vm6, %v7893_v9   ;;  %v34_v9 = vsel %vm4_vm3, %v4930_v45, %v4929_v29  ;;  %v4978_v14 = vld [vmem:[%s11042_s0 + $0x280] ss:$8 sm:$0xf0]  }
  0xf2   :  { %2388 = vrot.lane.b32.xlu1 %v2387_v17, %s6068_s25  ;;  %v5517_v18 = vld [vmem:[%s11042_s0 + $0x304] ss:$16 sm:%s2420_s10]   ;;  %5292 = vst.msk [vmem:[%s11043_s1 + $0xc8] sm:$0xff] %vm1082_vm6, %v7858_v0   ;;  %s2448_s10 = smov 48  ;;  %s2486_s19 = smov 3 }
  0xf3   :  { %v4936_v0 = vld [vmem:[%s11042_s0 + $0xc0] ss:$8 sm:$0xf0]   ;;  %v2423_v21 = vsel %vm425_vm0, %v5517_v18, %v5516_v47  ;;  %v5518_v24 = vld [vmem:[%s11042_s0 + $0x304] ss:$16 sm:%s2425_s5]   ;;  %5287 = vst.msk [vmem:[%s11043_s1 + $0xa8] sm:$0xff] %vm1082_vm6, %v7925_v26  }
  0xf4   :  { %v2428_v26 = vsel %vm430_vm1, %v5518_v24, %v2423_v21  ;;  %v5519_v27 = vld [vmem:[%s11042_s0 + $0x304] ss:$16 sm:%s2430_s14]   ;;  %4931 = vst.msk [vmem:[%s11043_s1 + $0x10] ss:$8 sm:$0x3] %vm6_vm4, %v34_v9   ;;  %v49_v36 = vsel %vm4_vm3, %v4936_v0, %v4935_v61  ;;  %s2265_s5 = smov 48  ;;  %v8321_v22 = vpop.permute.xlu1 %1493  }
  0xf5   :  { %v2433_v31 = vsel %vm435_vm2, %v5519_v27, %v2428_v26  ;;  %4932 = vst.msk [vmem:[%s11043_s1 + $0x1] ss:$8 sm:$0xc] %vm6_vm4, %v34_v9   ;;  %v4983_v4 = vld [vmem:[%s11042_s0 + $0x2c0] ss:$8 sm:$0xf]  }
  0xf6   :  { %2434 = vrot.lane.b32.xlu0 %v2433_v31, %s6068_s25  ;;  %4933 = vst.msk [vmem:[%s11043_s1 - $0xe] ss:$8 sm:$0x30] %vm6_vm4, %v34_v9   ;;  %v4984_v38 = vld [vmem:[%s11042_s0 + $0x2c0] ss:$8 sm:$0xf0]  }
  0xf7   :  { %4934 = vst.msk [vmem:[%s11043_s1 - $0x1d] ss:$8 sm:$0xc0] %vm6_vm4, %v34_v9   ;;  %s2270_s14 = smov 192  ;;  %v169_v34 = vsel %vm4_vm3, %v4984_v38, %v4983_v4  ;;  %v5483_v59 = vld [vmem:[%s11042_s0 + $0x38d] ss:$16 sm:%s2260_s7]   ;;  %v8452_v9 = vpop.permute.xlu2 %1585  }
  0xf8   :  { %4937 = vst.msk [vmem:[%s11043_s1 + $0x14] ss:$8 sm:$0x3] %vm6_vm4, %v49_v36   ;;  %v4953_v46 = vld [vmem:[%s11042_s0 + $0x180] ss:$8 sm:$0xf]  }
  0xf9   :  { %4938 = vst.msk [vmem:[%s11043_s1 + $0x5] ss:$8 sm:$0xc] %vm6_vm4, %v49_v36   ;;  %v4954_v48 = vld [vmem:[%s11042_s0 + $0x180] ss:$8 sm:$0xf0]  }
  0xfa   :  { %4939 = vst.msk [vmem:[%s11043_s1 - $0xa] ss:$8 sm:$0x30] %vm6_vm4, %v49_v36   ;;  %v5485_v51 = vld [vmem:[%s11042_s0 + $0x38d] ss:$16 sm:%s2270_s14]   ;;  %s2329_s20 = smov 12 }
  0xfb   :  { %4940 = vst.msk [vmem:[%s11043_s1 - $0x19] ss:$8 sm:$0xc0] %vm6_vm4, %v49_v36   ;;  %v5521_v28 = vld [vmem:[%s11042_s0 + $0x404] ss:$16 sm:%s2440_s11]   ;;  %s2509_s7 = smov 3 }
  0xfc   :  { %5158 = vst.msk [vmem:[%s11043_s1 + $0x10] sm:$0xff] %vm439_vm5, %v7001_v13   ;;  %v154_v13 = vsel %vm4_vm3, %v4978_v14, %v4977_v37  ;;  %v5522_v55 = vld [vmem:[%s11042_s0 + $0x404] ss:$16 sm:%s2443_s28]   ;;  %v4959_v56 = vld [vmem:[%s11042_s0 + $0x1c0] ss:$8 sm:$0xf]   ;;  %v8462_v21 = vpop.permute.xlu1 %1562  }
  0xfd   :  { %5297 = vst.msk [vmem:[%s11043_s1 + $0x10] sm:$0xff] %vm1082_vm6, %v7980_v6   ;;  %v5484_v6 = vld [vmem:[%s11042_s0 + $0x38d] ss:$16 sm:%s2265_s5]   ;;  %v2446_v58 = vsel %vm425_vm0, %v5522_v55, %v5521_v28  ;;  %v4960_v53 = vld [vmem:[%s11042_s0 + $0x1c0] ss:$8 sm:$0xf0]  }
  0xfe   :  { %5193 = vst.msk [vmem:[%s11043_s1 + $0x18] sm:$0xff] %vm439_vm5, %v7382_v12   ;;  %v5482_v12 = vld [vmem:[%s11042_s0 + $0x38d] ss:$16 sm:%s2257_s9]   ;;  %v109_v39 = vsel %vm4_vm3, %v4960_v53, %v4959_v56  ;;  %v5001_v45 = vld [vmem:[%s11042_s0 + $0x380] ss:$8 sm:$0xf]  }
  0xff   :  { %4979 = vst.msk [vmem:[%s11043_s1 + $0x50] ss:$8 sm:$0x3] %vm6_vm4, %v154_v13   ;;  %v2263_v43 = vsel %vm425_vm0, %v5483_v59, %v5482_v12  ;;  %v5523_v60 = vld [vmem:[%s11042_s0 + $0x404] ss:$16 sm:%s2448_s10]   ;;  %s2339_s9 = smov 192 }
 0x100   :  { %4980 = vst.msk [vmem:[%s11043_s1 + $0x41] ss:$8 sm:$0xc] %vm6_vm4, %v154_v13   ;;  %v2268_v50 = vsel %vm430_vm1, %v5484_v6, %v2263_v43  ;;  %v2451_v20 = vsel %vm430_vm1, %v5523_v60, %v2446_v58  ;;  %v5524_v63 = vld [vmem:[%s11042_s0 + $0x404] ss:$16 sm:%s2453_s21]   ;;  %s2522_s10 = smov 192 }
 0x101   :  { %4981 = vst.msk [vmem:[%s11043_s1 + $0x32] ss:$8 sm:$0x30] %vm6_vm4, %v154_v13   ;;  %v2273_v54 = vsel %vm435_vm2, %v5485_v51, %v2268_v50  ;;  %v2456_v1 = vsel %vm435_vm2, %v5524_v63, %v2451_v20  ;;  %v5531_v3 = vld [vmem:[%s11042_s0 + $0x604] ss:$16 sm:%s2486_s19]   ;;  %s2558_s21 = smov 12  ;;  %v8536_v50 = vpop.permute.xlu2 %1654  }
 0x102   :  { %4982 = vst.msk [vmem:[%s11043_s1 + $0x23] ss:$8 sm:$0xc0] %vm6_vm4, %v154_v13   ;;  %2274 = vrot.lane.b32.xlu2 %v2273_v54, %s6067_s22  ;;  %2457 = vrot.lane.b32.xlu1 %v2456_v1, %s6068_s25  ;;  %v5002_v8 = vld [vmem:[%s11042_s0 + $0x380] ss:$8 sm:$0xf0]  }
 0x103   :  { %4985 = vst.msk [vmem:[%s11043_s1 + $0x54] ss:$8 sm:$0x3] %vm6_vm4, %v169_v34   ;;  %v5533_v41 = vld [vmem:[%s11042_s0 + $0x604] ss:$16 sm:%s2494_s18]   ;;  %s2563_s19 = smov 48 }
 0x104   :  { %4986 = vst.msk [vmem:[%s11043_s1 + $0x45] ss:$8 sm:$0xc] %vm6_vm4, %v169_v34   ;;  %v5534_v29 = vld [vmem:[%s11042_s0 + $0x604] ss:$16 sm:%s2499_s13]   ;;  %v8547_v51 = vpop.permute.xlu1 %1631   ;;  %s2407_s5 = smov 192 }
 0x105   :  { %4987 = vst.msk [vmem:[%s11043_s1 + $0x36] ss:$8 sm:$0x30] %vm6_vm4, %v169_v34   ;;  %v5007_v10 = vld [vmem:[%s11042_s0 + $0x3c0] ss:$8 sm:$0xf]  }
 0x106   :  { %4988 = vst.msk [vmem:[%s11043_s1 + $0x27] ss:$8 sm:$0xc0] %vm6_vm4, %v169_v34   ;;  %v5049_v15 = vld [vmem:[%s11042_s0 + $0x580] ss:$8 sm:$0xf]  }
 0x107   :  { %5168 = vst.msk [vmem:[%s11043_s1 + $0x50] sm:$0xff] %vm439_vm5, %v7214_v19   ;;  %v94_v19 = vsel %vm4_vm3, %v4954_v48, %v4953_v46  ;;  %v5050_v61 = vld [vmem:[%s11042_s0 + $0x580] ss:$8 sm:$0xf0]   ;;  %v5498_v0 = vld [vmem:[%s11042_s0 + $0x68d] ss:$16 sm:%s2329_s20]  }
 0x108   :  { %5307 = vst.msk [vmem:[%s11043_s1 + $0x50] sm:$0xff] %vm1082_vm6, %v7935_v32   ;;  %v5532_v32 = vld [vmem:[%s11042_s0 + $0x604] ss:$16 sm:%s2489_s12]   ;;  %v5055_v17 = vld [vmem:[%s11042_s0 + $0x5c0] ss:$8 sm:$0xf]  }
 0x109   :  { %5203 = vst.msk [vmem:[%s11043_s1 + $0x58] sm:$0xff] %vm439_vm5, %v7287_v44   ;;  %v2492_v44 = vsel %vm425_vm0, %v5532_v32, %v5531_v3  ;;  %v5056_v47 = vld [vmem:[%s11042_s0 + $0x5c0] ss:$8 sm:$0xf0]   ;;  %v5499_v26 = vld [vmem:[%s11042_s0 + $0x68d] ss:$16 sm:%s2334_s24]  }
 0x10a   :  { %4955 = vst.msk [vmem:[%s11043_s1 + $0x30] ss:$8 sm:$0x3] %vm6_vm4, %v94_v19   ;;  %v2497_v7 = vsel %vm430_vm1, %v5533_v41, %v2492_v44  ;;  %v349_v18 = vsel %vm4_vm3, %v5056_v47, %v5055_v17  ;;  %v5025_v31 = vld [vmem:[%s11042_s0 + $0x480] ss:$8 sm:$0xf]  }
 0x10b   :  { %4956 = vst.msk [vmem:[%s11043_s1 + $0x21] ss:$8 sm:$0xc] %vm6_vm4, %v94_v19   ;;  %v2502_v49 = vsel %vm435_vm2, %v5534_v29, %v2497_v7  ;;  %v5500_v37 = vld [vmem:[%s11042_s0 + $0x68d] ss:$16 sm:%s2339_s9]   ;;  %s2586_s20 = smov 48  ;;  %v8615_v29 = vpop.permute.xlu2 %1723  }
 0x10c   :  { %4957 = vst.msk [vmem:[%s11043_s1 + $0x12] ss:$8 sm:$0x30] %vm6_vm4, %v94_v19   ;;  %2503 = vrot.lane.b32.xlu0 %v2502_v49, %s6068_s25  ;;  %v5536_v13 = vld [vmem:[%s11042_s0 + $0xc] ss:$16 sm:%s2509_s7]   ;;  %v8625_v49 = vpop.permute.xlu1 %1700   ;;  %s2463_s11 = smov 3 }
 0x10d   :  { %4958 = vst.msk [vmem:[%s11043_s1 + $0x3] ss:$8 sm:$0xc0] %vm6_vm4, %v94_v19   ;;  %v5537_v4 = vld [vmem:[%s11042_s0 + $0xc] ss:$16 sm:%s2512_s6]   ;;  %s2466_s28 = smov 12 }
 0x10e   :  { %4961 = vst.msk [vmem:[%s11043_s1 + $0x34] ss:$8 sm:$0x3] %vm6_vm4, %v109_v39   ;;  %v2515_v38 = vsel %vm425_vm0, %v5537_v4, %v5536_v13  ;;  %v5538_v12 = vld [vmem:[%s11042_s0 + $0xc] ss:$16 sm:%s2517_s30]   ;;  %s2476_s13 = smov 192 }
 0x10f   :  { %4962 = vst.msk [vmem:[%s11043_s1 + $0x25] ss:$8 sm:$0xc] %vm6_vm4, %v109_v39   ;;  %v5031_v34 = vld [vmem:[%s11042_s0 + $0x4c0] ss:$8 sm:$0xf]   ;;  %v2520_v59 = vsel %vm430_vm1, %v5538_v12, %v2515_v38 }
 0x110   :  { %4963 = vst.msk [vmem:[%s11043_s1 + $0x16] ss:$8 sm:$0x30] %vm6_vm4, %v109_v39   ;;  %v5539_v43 = vld [vmem:[%s11042_s0 + $0xc] ss:$16 sm:%s2522_s10]   ;;  %s2471_s10 = smov 48 }
 0x111   :  { %4964 = vst.msk [vmem:[%s11043_s1 + $0x7] ss:$8 sm:$0xc0] %vm6_vm4, %v109_v39   ;;  %v5032_v6 = vld [vmem:[%s11042_s0 + $0x4c0] ss:$8 sm:$0xf0]   ;;  %v2525_v46 = vsel %vm435_vm2, %v5539_v43, %v2520_v59 }
 0x112   :  { %5163 = vst.msk [vmem:[%s11043_s1 + $0x30] sm:$0xff] %vm439_vm5, %v7172_v2   ;;  %v214_v2 = vsel %vm4_vm3, %v5002_v8, %v5001_v45  ;;  %v5546_v48 = vld [vmem:[%s11042_s0 + $0x20c] ss:$16 sm:%s2555_s3]   ;;  %2526 = vrot.lane.b32.xlu1 %v2525_v46, %s6068_s25  ;;  %s2394_s3 = smov 3  ;;  %v289_v60 = vsel %vm4_vm3, %v5032_v6, %v5031_v34  ;;  %s2647_s7 = smov 3 }
 0x113   :  { %5302 = vst.msk [vmem:[%s11043_s1 + $0x30] sm:$0xff] %vm1082_vm6, %v8039_v16   ;;  %v5008_v16 = vld [vmem:[%s11042_s0 + $0x3c0] ss:$8 sm:$0xf0]   ;;  %v5548_v54 = vld [vmem:[%s11042_s0 + $0x20c] ss:$16 sm:%s2563_s19]  }
 0x114   :  { %5198 = vst.msk [vmem:[%s11043_s1 + $0x38] sm:$0xff] %vm439_vm5, %v7425_v30   ;;  %v8386_v30 = vpop.permute.xlu0 %1539   ;;  %v229_v33 = vsel %vm4_vm3, %v5008_v16, %v5007_v10  ;;  %v5511_v20 = vld [vmem:[%s11042_s0 + $0x204] ss:$16 sm:%s2394_s3]   ;;  %v5073_v19 = vld [vmem:[%s11042_s0 + $0x680] ss:$8 sm:$0xf]  }
 0x115   :  { %5003 = vst.msk [vmem:[%s11043_s1 + $0x70] ss:$8 sm:$0x3] %vm6_vm4, %v214_v2   ;;  %v5512_v63 = vld [vmem:[%s11042_s0 + $0x204] ss:$16 sm:%s2397_s2]   ;;  %s2650_s6 = smov 12 }
 0x116   :  { %5004 = vst.msk [vmem:[%s11043_s1 + $0x61] ss:$8 sm:$0xc] %vm6_vm4, %v214_v2   ;;  %v5074_v53 = vld [vmem:[%s11042_s0 + $0x680] ss:$8 sm:$0xf0]   ;;  %v2400_v1 = vsel %vm425_vm0, %v5512_v63, %v5511_v20 }
 0x117   :  { %5005 = vst.msk [vmem:[%s11043_s1 + $0x52] ss:$8 sm:$0x30] %vm6_vm4, %v214_v2   ;;  %v5513_v3 = vld [vmem:[%s11042_s0 + $0x204] ss:$16 sm:%s2402_s4]   ;;  %s2655_s30 = smov 48 }
 0x118   :  { %5006 = vst.msk [vmem:[%s11043_s1 + $0x43] ss:$8 sm:$0xc0] %vm6_vm4, %v214_v2   ;;  %v2405_v32 = vsel %vm430_vm1, %v5513_v3, %v2400_v1  ;;  %v5514_v44 = vld [vmem:[%s11042_s0 + $0x204] ss:$16 sm:%s2407_s5]   ;;  %s2624_s5 = smov 3 }
 0x119   :  { %5009 = vst.msk [vmem:[%s11043_s1 + $0x74] ss:$8 sm:$0x3] %vm6_vm4, %v229_v33   ;;  %v2410_v41 = vsel %vm435_vm2, %v5514_v44, %v2405_v32  ;;  %v5551_v7 = vld [vmem:[%s11042_s0 + $0x30c] ss:$16 sm:%s2578_s8]   ;;  %s2627_s8 = smov 12 }
 0x11a   :  { %5010 = vst.msk [vmem:[%s11043_s1 + $0x65] ss:$8 sm:$0xc] %vm6_vm4, %v229_v33   ;;  %v5553_v8 = vld [vmem:[%s11042_s0 + $0x30c] ss:$16 sm:%s2586_s20]   ;;  %s2637_s20 = smov 192 }
 0x11b   :  { %5011 = vst.msk [vmem:[%s11043_s1 + $0x56] ss:$8 sm:$0x30] %vm6_vm4, %v229_v33   ;;  %v5079_v10 = vld [vmem:[%s11042_s0 + $0x6c0] ss:$8 sm:$0xf]  }
 0x11c   :  { %5012 = vst.msk [vmem:[%s11043_s1 + $0x47] ss:$8 sm:$0xc0] %vm6_vm4, %v229_v33   ;;  %v8472_v27 = vpop.permute.xlu0 %1608   ;;  %v5529_v4 = vld [vmem:[%s11042_s0 + $0x504] ss:$16 sm:%s2476_s13]   ;;  %s2696_s2 = smov 12 }
 0x11d   :  { %5173 = vst.msk [vmem:[%s11043_s1 + $0x70] sm:$0xff] %vm439_vm5, %v7095_v42   ;;  %v334_v42 = vsel %vm4_vm3, %v5050_v61, %v5049_v15  ;;  %v5561_v61 = vld [vmem:[%s11042_s0 + $0x50c] ss:$16 sm:%s2624_s5]   ;;  %s2701_s4 = smov 48  ;;  %s2706_s15 = smov 192 }
 0x11e   :  { %5312 = vst.msk [vmem:[%s11043_s1 + $0x70] sm:$0xff] %vm1082_vm6, %v8148_v62   ;;  %v5026_v62 = vld [vmem:[%s11042_s0 + $0x480] ss:$8 sm:$0xf0]   ;;  %v5566_v12 = vld [vmem:[%s11042_s0 + $0x60c] ss:$16 sm:%s2647_s7]  }
 0x11f   :  { %5208 = vst.msk [vmem:[%s11043_s1 + $0x78] sm:$0xff] %vm439_vm5, %v7489_v57   ;;  %v5497_v57 = vld [vmem:[%s11042_s0 + $0x68d] ss:$16 sm:%s2326_s26]   ;;  %s2568_s26 = smov 192  ;;  %s2535_s17 = smov 12 }
 0x120   :  { %5051 = vst.msk [vmem:[%s11043_s1 + $0xb0] ss:$8 sm:$0x3] %vm6_vm4, %v334_v42   ;;  %v2332_v24 = vsel %vm425_vm0, %v5498_v0, %v5497_v57  ;;  %v5549_v58 = vld [vmem:[%s11042_s0 + $0x20c] ss:$16 sm:%s2568_s26]   ;;  %s2581_s26 = smov 12 }
 0x121   :  { %5052 = vst.msk [vmem:[%s11043_s1 + $0xa1] ss:$8 sm:$0xc] %vm6_vm4, %v334_v42   ;;  %v2337_v36 = vsel %vm430_vm1, %v5499_v26, %v2332_v24  ;;  %v5552_v39 = vld [vmem:[%s11042_s0 + $0x30c] ss:$16 sm:%s2581_s26]   ;;  %s2632_s26 = smov 48  ;;  %v8696_v26 = vpop.permute.xlu2 %1791  }
 0x122   :  { %5053 = vst.msk [vmem:[%s11043_s1 + $0x92] ss:$8 sm:$0x30] %vm6_vm4, %v334_v42   ;;  %v2342_v14 = vsel %vm435_vm2, %v5500_v37, %v2337_v36  ;;  %v2584_v45 = vsel %vm425_vm0, %v5552_v39, %v5551_v7  ;;  %v5563_v17 = vld [vmem:[%s11042_s0 + $0x50c] ss:$16 sm:%s2632_s26]   ;;  %s2540_s9 = smov 48 }
 0x123   :  { %5054 = vst.msk [vmem:[%s11043_s1 + $0x83] ss:$8 sm:$0xc0] %vm6_vm4, %v334_v42   ;;  %2343 = vrot.lane.b32.xlu2 %v2342_v14, %s6067_s22  ;;  %s2591_s22 = smov 192  ;;  %v2589_v16 = vsel %vm430_vm1, %v5553_v8, %v2584_v45  ;;  %v5526_v24 = vld [vmem:[%s11042_s0 + $0x504] ss:$16 sm:%s2463_s11]  }
 0x124   :  { %5057 = vst.msk [vmem:[%s11043_s1 + $0xb4] ss:$8 sm:$0x3] %vm6_vm4, %v349_v18   ;;  %v8558_v28 = vpop.permute.xlu0 %1677   ;;  %v5554_v33 = vld [vmem:[%s11042_s0 + $0x30c] ss:$16 sm:%s2591_s22]   ;;  %s2545_s22 = smov 192 }
 0x125   :  { %5058 = vst.msk [vmem:[%s11043_s1 + $0xa5] ss:$8 sm:$0xc] %vm6_vm4, %v349_v18   ;;  %v2594_v15 = vsel %vm435_vm2, %v5554_v33, %v2589_v16  ;;  %v5528_v37 = vld [vmem:[%s11042_s0 + $0x504] ss:$16 sm:%s2471_s10]   ;;  %s2716_s5 = smov 3 }
 0x126   :  { %5059 = vst.msk [vmem:[%s11043_s1 + $0x96] ss:$8 sm:$0x30] %vm6_vm4, %v349_v18   ;;  %2595 = vrot.lane.b32.xlu1 %v2594_v15, %s6068_s25  ;;  %v5567_v34 = vld [vmem:[%s11042_s0 + $0x60c] ss:$16 sm:%s2650_s6]   ;;  %s2724_s26 = smov 48 }
 0x127   :  { %5060 = vst.msk [vmem:[%s11043_s1 + $0x87] ss:$8 sm:$0xc0] %vm6_vm4, %v349_v18   ;;  %v5564_v18 = vld [vmem:[%s11042_s0 + $0x50c] ss:$16 sm:%s2637_s20]   ;;  %s2765_s24 = smov 12 }
 0x128   :  { %5183 = vst.msk [vmem:[%s11043_s1 + $0xb0] sm:$0xff] %vm439_vm5, %v7311_v52   ;;  %v274_v52 = vsel %vm4_vm3, %v5026_v62, %v5025_v31  ;;  %v5527_v31 = vld [vmem:[%s11042_s0 + $0x504] ss:$16 sm:%s2466_s28]   ;;  %v8706_v62 = vpop.permute.xlu1 %1768   ;;  %s2614_s20 = smov 192  ;;  %s2798_s14 = smov 192 }
 0x129   :  { %5322 = vst.msk [vmem:[%s11043_s1 + $0xb0] sm:$0xff] %vm1082_vm6, %v8215_v40   ;;  %v5547_v40 = vld [vmem:[%s11042_s0 + $0x20c] ss:$16 sm:%s2558_s21]   ;;  %v2469_v36 = vsel %vm425_vm0, %v5527_v31, %v5526_v24  ;;  %v8769_v6 = vpop.permute.xlu2 %1860   ;;  %s2831_s11 = smov 3  ;;  %s2857_s28 = smov 12 }
 0x12a   :  { %5218 = vst.msk [vmem:[%s11043_s1 + $0xb8] sm:$0xff] %vm439_vm5, %v7405_v23   ;;  %v2561_v23 = vsel %vm425_vm0, %v5547_v40, %v5546_v48  ;;  %v2474_v13 = vsel %vm430_vm1, %v5528_v37, %v2469_v36  ;;  %v5568_v59 = vld [vmem:[%s11042_s0 + $0x60c] ss:$16 sm:%s2655_s30]   ;;  %s2900_s3 = smov 3  ;;  %s2969_s19 = smov 3 }
 0x12b   :  { %5027 = vst.msk [vmem:[%s11043_s1 + $0x90] ss:$8 sm:$0x3] %vm6_vm4, %v274_v52   ;;  %v2566_v55 = vsel %vm430_vm1, %v5548_v54, %v2561_v23  ;;  %2411 = vrot.lane.b32.xlu2 %v2410_v41, %s6068_s25  ;;  %v2479_v38 = vsel %vm435_vm2, %v5529_v4, %v2474_v13  ;;  %v5569_v43 = vld [vmem:[%s11042_s0 + $0x60c] ss:$16 sm:%s2660_s23]   ;;  %s2729_s23 = smov 192 }
 0x12c   :  { %5028 = vst.msk [vmem:[%s11043_s1 + $0x81] ss:$8 sm:$0xc] %vm6_vm4, %v274_v52   ;;  %v2571_v56 = vsel %vm435_vm2, %v5549_v58, %v2566_v55  ;;  %v8635_v2 = vpop.permute.xlu0 %1745   ;;  %v5578_v48 = vld [vmem:[%s11042_s0 + $0x184] ss:$16 sm:%s2701_s4]   ;;  %s2678_s4 = smov 48 }
 0x12d   :  { %5029 = vst.msk [vmem:[%s11043_s1 + $0x72] ss:$8 sm:$0x30] %vm6_vm4, %v274_v52   ;;  %2572 = vrot.lane.b32.xlu0 %v2571_v56, %s6068_s25  ;;  %v5579_v23 = vld [vmem:[%s11042_s0 + $0x184] ss:$16 sm:%s2706_s15]   ;;  %s2683_s15 = smov 192 }
 0x12e   :  { %5030 = vst.msk [vmem:[%s11043_s1 + $0x63] ss:$8 sm:$0xc0] %vm6_vm4, %v274_v52   ;;  %v5576_v52 = vld [vmem:[%s11042_s0 + $0x184] ss:$16 sm:%s2693_s16]   ;;  %s2762_s16 = smov 3 }
 0x12f   :  { %5033 = vst.msk [vmem:[%s11043_s1 + $0x94] ss:$8 sm:$0x3] %vm6_vm4, %v289_v60   ;;  %v5541_v54 = vld [vmem:[%s11042_s0 + $0x10c] ss:$16 sm:%s2532_s27]   ;;  %s2811_s21 = smov 12 }
 0x130   :  { %5034 = vst.msk [vmem:[%s11043_s1 + $0x85] ss:$8 sm:$0xc] %vm6_vm4, %v289_v60   ;;  %v8780_v46 = vpop.permute.xlu1 %1837   ;;  %v5543_v55 = vld [vmem:[%s11042_s0 + $0x10c] ss:$16 sm:%s2540_s9]   ;;  %s2992_s30 = smov 3 }
 0x131   :  { %5035 = vst.msk [vmem:[%s11043_s1 + $0x76] ss:$8 sm:$0x30] %vm6_vm4, %v289_v60   ;;  %v5581_v20 = vld [vmem:[%s11042_s0 + $0x284] ss:$16 sm:%s2716_s5]   ;;  %v8847_v63 = vpop.permute.xlu2 %1929   ;;  %s2601_s5 = smov 3 }
 0x132   :  { %5036 = vst.msk [vmem:[%s11043_s1 + $0x67] ss:$8 sm:$0xc0] %vm6_vm4, %v289_v60   ;;  %v5544_v60 = vld [vmem:[%s11042_s0 + $0x10c] ss:$16 sm:%s2545_s22]   ;;  %s2775_s22 = smov 192 }
 0x133   :  { %5178 = vst.msk [vmem:[%s11043_s1 + $0x90] sm:$0xff] %vm439_vm5, %v7270_v35   ;;  %v394_v35 = vsel %vm4_vm3, %v5074_v53, %v5073_v19  ;;  %2480 = vrot.lane.b32.xlu2 %v2479_v38, %s6068_s25  ;;  %v5583_v3 = vld [vmem:[%s11042_s0 + $0x284] ss:$16 sm:%s2724_s26]   ;;  %s2609_s26 = smov 48  ;;  %s2995_s12 = smov 12 }
 0x134   :  { %5317 = vst.msk [vmem:[%s11043_s1 + $0x90] sm:$0xff] %vm1082_vm6, %v8321_v22   ;;  %v5080_v22 = vld [vmem:[%s11042_s0 + $0x6c0] ss:$8 sm:$0xf0]   ;;  %v8716_v14 = vpop.permute.xlu0 %1814   ;;  %v5584_v32 = vld [vmem:[%s11042_s0 + $0x284] ss:$16 sm:%s2729_s23]  }
 0x135   :  { %5213 = vst.msk [vmem:[%s11043_s1 + $0x98] sm:$0xff] %vm439_vm5, %v7529_v5   ;;  %v5562_v5 = vld [vmem:[%s11042_s0 + $0x50c] ss:$16 sm:%s2627_s8]   ;;  %v409_v47 = vsel %vm4_vm3, %v5080_v22, %v5079_v10  ;;  %s2719_s8 = smov 12  ;;  %s2844_s23 = smov 192 }
 0x136   :  { %5075 = vst.msk [vmem:[%s11043_s1 + $0xd0] ss:$8 sm:$0x3] %vm6_vm4, %v394_v35   ;;  %v2630_v42 = vsel %vm425_vm0, %v5562_v5, %v5561_v61  ;;  %v5582_v19 = vld [vmem:[%s11042_s0 + $0x284] ss:$16 sm:%s2719_s8]   ;;  %s2604_s8 = smov 12 }
 0x137   :  { %5076 = vst.msk [vmem:[%s11043_s1 + $0xc1] ss:$8 sm:$0xc] %vm6_vm4, %v394_v35   ;;  %v2635_v57 = vsel %vm430_vm1, %v5563_v17, %v2630_v42  ;;  %v2722_v1 = vsel %vm425_vm0, %v5582_v19, %v5581_v20  ;;  %v5591_v7 = vld [vmem:[%s11042_s0 + $0x484] ss:$16 sm:%s2762_s16]   ;;  %s2785_s16 = smov 3 }
 0x138   :  { %5077 = vst.msk [vmem:[%s11043_s1 + $0xb2] ss:$8 sm:$0x30] %vm6_vm4, %v394_v35   ;;  %v2640_v0 = vsel %vm435_vm2, %v5564_v18, %v2635_v57  ;;  %v8858_v53 = vpop.permute.xlu1 %1906   ;;  %v2727_v41 = vsel %vm430_vm1, %v5583_v3, %v2722_v1  ;;  %v5593_v45 = vld [vmem:[%s11042_s0 + $0x484] ss:$16 sm:%s2770_s29]   ;;  %s2793_s29 = smov 48 }
 0x139   :  { %5078 = vst.msk [vmem:[%s11043_s1 + $0xa3] ss:$8 sm:$0xc0] %vm6_vm4, %v394_v35   ;;  %2641 = vrot.lane.b32.xlu0 %v2640_v0, %s6068_s25  ;;  %v2732_v39 = vsel %vm435_vm2, %v5584_v32, %v2727_v41  ;;  %v5594_v8 = vld [vmem:[%s11042_s0 + $0x484] ss:$16 sm:%s2775_s22]   ;;  %v8920_v42 = vpop.permute.xlu2 %1998   ;;  %s3000_s10 = smov 48 }
 0x13a   :  { %5081 = vst.msk [vmem:[%s11043_s1 + $0xd4] ss:$8 sm:$0x3] %vm6_vm4, %v409_v47   ;;  %v5556_v35 = vld [vmem:[%s11042_s0 + $0x40c] ss:$16 sm:%s2601_s5]   ;;  %s3037_s9 = smov 3 }
 0x13b   :  { %5082 = vst.msk [vmem:[%s11043_s1 + $0xc5] ss:$8 sm:$0xc] %vm6_vm4, %v409_v47   ;;  %v5557_v16 = vld [vmem:[%s11042_s0 + $0x40c] ss:$16 sm:%s2604_s8]   ;;  %s2834_s8 = smov 12 }
 0x13c   :  { %5083 = vst.msk [vmem:[%s11043_s1 + $0xb6] ss:$8 sm:$0x30] %vm6_vm4, %v409_v47   ;;  %v8791_v40 = vpop.permute.xlu0 %1883   ;;  %v2607_v33 = vsel %vm425_vm0, %v5557_v16, %v5556_v35  ;;  %v5558_v22 = vld [vmem:[%s11042_s0 + $0x40c] ss:$16 sm:%s2609_s26]   ;;  %s2839_s26 = smov 48 }
 0x13d   :  { %5084 = vst.msk [vmem:[%s11043_s1 + $0xa7] ss:$8 sm:$0xc0] %vm6_vm4, %v409_v47   ;;  %v2612_v15 = vsel %vm430_vm1, %v5558_v22, %v2607_v33  ;;  %v5559_v61 = vld [vmem:[%s11042_s0 + $0x40c] ss:$16 sm:%s2614_s20]   ;;  %s2752_s20 = smov 192 }
 0x13e   :  { %5188 = vst.msk [vmem:[%s11043_s1 + $0xd0] sm:$0xff] %vm439_vm5, %v7190_v11   ;;  %v2653_v11 = vsel %vm425_vm0, %v5567_v34, %v5566_v12  ;;  %v5596_v5 = vld [vmem:[%s11042_s0 + $0x584] ss:$16 sm:%s2785_s16]   ;;  %v2617_v17 = vsel %vm435_vm2, %v5559_v61, %v2612_v15  ;;  %s2670_s16 = smov 3  ;;  %s3063_s7 = smov 12 }
 0x13f   :  { %5327 = vst.msk [vmem:[%s11043_s1 + $0xd0] sm:$0xff] %vm1082_vm6, %v8386_v30   ;;  %v2658_v30 = vsel %vm430_vm1, %v5568_v59, %v2653_v11  ;;  %v5598_v57 = vld [vmem:[%s11042_s0 + $0x584] ss:$16 sm:%s2793_s29]   ;;  %s3109_s27 = smov 12  ;;  %s2946_s29 = smov 3 }
 0x140   :  { %5223 = vst.msk [vmem:[%s11043_s1 + $0xd8] sm:$0xff] %vm439_vm5, %v7579_v25   ;;  %v2663_v25 = vsel %vm435_vm2, %v5569_v43, %v2658_v30  ;;  %v8929_v18 = vpop.permute.xlu1 %1975   ;;  %v5599_v24 = vld [vmem:[%s11042_s0 + $0x584] ss:$16 sm:%s2798_s14]   ;;  %s2913_s14 = smov 192  ;;  %s2949_s22 = smov 12 }
 0x141   :  { %5337 = vst.msk [vmem:[%s11043_s1 + $0x38] sm:$0xff] %vm1082_vm6, %v8452_v9   ;;  %2664 = vrot.lane.b32.xlu1 %v2663_v25, %s6068_s25  ;;  %v5577_v9 = vld [vmem:[%s11042_s0 + $0x184] ss:$16 sm:%s2696_s2]   ;;  %s2788_s2 = smov 12  ;;  %s2954_s5 = smov 48 }
 0x142   :  { %5332 = vst.msk [vmem:[%s11043_s1 + $0x18] sm:$0xff] %vm1082_vm6, %v8462_v21   ;;  %v2699_v21 = vsel %vm425_vm0, %v5577_v9, %v5576_v52  ;;  %v5597_v47 = vld [vmem:[%s11042_s0 + $0x584] ss:$16 sm:%s2788_s2]   ;;  %s2673_s2 = smov 12  ;;  %s3017_s18 = smov 12 }
 0x143   :  { %5342 = vst.msk [vmem:[%s11043_s1 + $0x58] sm:$0xff] %vm1082_vm6, %v8472_v27   ;;  %v2704_v27 = vsel %vm430_vm1, %v5578_v48, %v2699_v21  ;;  %v2791_v0 = vsel %vm425_vm0, %v5597_v47, %v5596_v5  ;;  %v5607_v36 = vld [vmem:[%s11042_s0 + $0x8c] ss:$16 sm:%s2834_s8]   ;;  %s3106_s8 = smov 3  ;;  %s3206_s6 = smov 48 }
 0x144   :  { %5352 = vst.msk [vmem:[%s11043_s1 + $0x98] sm:$0xff] %vm1082_vm6, %v8536_v50   ;;  %v2709_v50 = vsel %vm435_vm2, %v5579_v23, %v2704_v27  ;;  %v8867_v44 = vpop.permute.xlu0 %1952   ;;  %v2796_v31 = vsel %vm430_vm1, %v5598_v57, %v2791_v0  ;;  %v5608_v13 = vld [vmem:[%s11042_s0 + $0x8c] ss:$16 sm:%s2839_s26]   ;;  %s2862_s26 = smov 48  ;;  %s3303_s13 = smov 192 }
 0x145   :  { %5347 = vst.msk [vmem:[%s11043_s1 + $0x78] sm:$0xff] %vm1082_vm6, %v8547_v51   ;;  %2710 = vrot.lane.b32.xlu0 %v2709_v50, %s6068_s25  ;;  %v5542_v51 = vld [vmem:[%s11042_s0 + $0x10c] ss:$16 sm:%s2535_s17]   ;;  %v2801_v37 = vsel %vm435_vm2, %v5599_v24, %v2796_v31  ;;  %s2867_s17 = smov 192 }
 0x146   :  { %5357 = vst.msk [vmem:[%s11043_s1 + $0xb8] sm:$0xff] %vm1082_vm6, %v8558_v28   ;;  %v2538_v28 = vsel %vm425_vm0, %v5542_v51, %v5541_v54  ;;  %v5609_v4 = vld [vmem:[%s11042_s0 + $0x8c] ss:$16 sm:%s2844_s23]   ;;  %s3132_s23 = smov 12 }
 0x147   :  { %1726 = vst.msk [vmem:[%s11043_s1] sm:$0xff] %vm1725_vm7, %v8615_v29   ;;  %v2543_v58 = vsel %vm430_vm1, %v5543_v55, %v2538_v28  ;;  %v5592_v29 = vld [vmem:[%s11042_s0 + $0x484] ss:$16 sm:%s2765_s24]   ;;  %s3027_s24 = smov 192 }
 0x148   :  { %5362 = vst.msk [vmem:[%s11043_s1 + $0xd8] sm:$0xff] %vm1082_vm6, %v8625_v49   ;;  %v2548_v56 = vsel %vm435_vm2, %v5544_v60, %v2543_v58  ;;  %v2768_v49 = vsel %vm425_vm0, %v5592_v29, %v5591_v7  ;;  %v5571_v12 = vld [vmem:[%s11042_s0 + $0x84] ss:$16 sm:%s2670_s16]   ;;  %v9003_v48 = vpop.permute.xlu1 %2044   ;;  %s3119_s16 = smov 192 }
 0x149   :  { %5371 = vst.msk [vmem:[%s11043_s1 + $0x20] sm:$0xff] %vm1725_vm7, %v8635_v2   ;;  %2549 = vrot.lane.b32.xlu2 %v2548_v56, %s6068_s25  ;;  %2733 = vrot.lane.b32.xlu1 %v2732_v39, %s6068_s25  ;;  %v2773_v2 = vsel %vm430_vm1, %v5593_v45, %v2768_v49 }
 0x14a   :  { %5381 = vst.msk [vmem:[%s11043_s1 + $0x60] sm:$0xff] %vm1725_vm7, %v8696_v26   ;;  %v2778_v10 = vsel %vm435_vm2, %v5594_v8, %v2773_v2  ;;  %v5572_v11 = vld [vmem:[%s11042_s0 + $0x84] ss:$16 sm:%s2673_s2]   ;;  %s2903_s2 = smov 12 }
 0x14b   :  { %5376 = vst.msk [vmem:[%s11043_s1 + $0x40] sm:$0xff] %vm1725_vm7, %v8706_v62   ;;  %v5606_v62 = vld [vmem:[%s11042_s0 + $0x8c] ss:$16 sm:%s2831_s11]   ;;  %s2854_s11 = smov 3  ;;  %v2676_v59 = vsel %vm425_vm0, %v5572_v11, %v5571_v12 }
 0x14c   :  { %5386 = vst.msk [vmem:[%s11043_s1 + $0x80] sm:$0xff] %vm1725_vm7, %v8716_v14   ;;  %v8941_v26 = vpop.permute.xlu0 %2021   ;;  %v2837_v14 = vsel %vm425_vm0, %v5607_v36, %v5606_v62  ;;  %v5573_v30 = vld [vmem:[%s11042_s0 + $0x84] ss:$16 sm:%s2678_s4]   ;;  %s2908_s4 = smov 48 }
 0x14d   :  { %2779 = vrot.lane.b32.xlu0 %v2778_v10, %s6068_s25  ;;  %5396 = vst.msk [vmem:[%s11043_s1 + $0xc0] sm:$0xff] %vm1725_vm7, %v8769_v6   ;;  %v2842_v38 = vsel %vm430_vm1, %v5608_v13, %v2837_v14  ;;  %v2681_v43 = vsel %vm430_vm1, %v5573_v30, %v2676_v59  ;;  %v5574_v25 = vld [vmem:[%s11042_s0 + $0x84] ss:$16 sm:%s2683_s15]   ;;  %v8994_v6 = vpop.permute.xlu2 %2067   ;;  %s2821_s15 = smov 192 }
 0x14e   :  { %5391 = vst.msk [vmem:[%s11043_s1 + $0xa0] sm:$0xff] %vm1725_vm7, %v8780_v46   ;;  %v2847_v34 = vsel %vm435_vm2, %v5609_v4, %v2842_v38  ;;  %v5611_v52 = vld [vmem:[%s11042_s0 + $0x18c] ss:$16 sm:%s2854_s11]   ;;  %v2686_v9 = vsel %vm435_vm2, %v5574_v25, %v2681_v43  ;;  %s2739_s11 = smov 3 }
 0x14f   :  { %5401 = vst.msk [vmem:[%s11043_s1 + $0x8] sm:$0xff] %vm1725_vm7, %v8791_v40   ;;  %v5612_v46 = vld [vmem:[%s11042_s0 + $0x18c] ss:$16 sm:%s2857_s28]   ;;  %s2742_s28 = smov 12 }
 0x150   :  { %5411 = vst.msk [vmem:[%s11043_s1 + $0x48] sm:$0xff] %vm1725_vm7, %v8847_v63   ;;  %v5613_v21 = vld [vmem:[%s11042_s0 + $0x18c] ss:$16 sm:%s2862_s26]   ;;  %v2860_v40 = vsel %vm425_vm0, %v5612_v46, %v5611_v52  ;;  %s2747_s26 = smov 48  ;;  %v9076_v8 = vpop.permute.xlu1 %2113  }
 0x151   :  { %2618 = vrot.lane.b32.xlu2 %v2617_v17, %s6068_s25  ;;  %2802 = vrot.lane.b32.xlu1 %v2801_v37, %s6068_s25  ;;  %v5614_v27 = vld [vmem:[%s11042_s0 + $0x18c] ss:$16 sm:%s2867_s17]   ;;  %v2865_v50 = vsel %vm430_vm1, %v5613_v21, %v2860_v40  ;;  %s3022_s17 = smov 48 }
 0x152   :  { %5406 = vst.msk [vmem:[%s11043_s1 + $0x28] sm:$0xff] %vm1725_vm7, %v8858_v53   ;;  %v5621_v54 = vld [vmem:[%s11042_s0 + $0x38c] ss:$16 sm:%s2900_s3]   ;;  %v2870_v28 = vsel %vm435_vm2, %v5614_v27, %v2865_v50  ;;  %s2923_s3 = smov 3 }
 0x153   :  { %v5622_v51 = vld [vmem:[%s11042_s0 + $0x38c] ss:$16 sm:%s2903_s2]   ;;  %5416 = vst.msk [vmem:[%s11043_s1 + $0x68] sm:$0xff] %vm1725_vm7, %v8867_v44   ;;  %s2926_s2 = smov 12 }
 0x154   :  { %v9015_v23 = vpop.permute.xlu0 %2090   ;;  %v2906_v55 = vsel %vm425_vm0, %v5622_v51, %v5621_v54  ;;  %v5623_v58 = vld [vmem:[%s11042_s0 + $0x38c] ss:$16 sm:%s2908_s4]   ;;  %v5586_v20 = vld [vmem:[%s11042_s0 + $0x384] ss:$16 sm:%s2739_s11]   ;;  %s2931_s4 = smov 48  ;;  %s2877_s11 = smov 3 }
 0x155   :  { %2848 = vrot.lane.b32.xlu0 %v2847_v34, %s6068_s25  ;;  %v5624_v60 = vld [vmem:[%s11042_s0 + $0x38c] ss:$16 sm:%s2913_s14]   ;;  %v2911_v56 = vsel %vm430_vm1, %v5623_v58, %v2906_v55  ;;  %s2936_s14 = smov 192  ;;  %5426 = vst.msk [vmem:[%s11043_s1 + $0xa8] sm:$0xff] %vm1725_vm7, %v8920_v42   ;;  %v9066_v7 = vpop.permute.xlu2 %2136  }
 0x156   :  { %v2916_v63 = vsel %vm435_vm2, %v5624_v60, %v2911_v56  ;;  %v5587_v19 = vld [vmem:[%s11042_s0 + $0x384] ss:$16 sm:%s2742_s28]   ;;  %v5626_v44 = vld [vmem:[%s11042_s0 + $0x48c] ss:$16 sm:%s2923_s3]   ;;  %s2972_s28 = smov 12  ;;  %s2808_s3 = smov 3 }
 0x157   :  { %v5588_v53 = vld [vmem:[%s11042_s0 + $0x384] ss:$16 sm:%s2747_s26]   ;;  %v2745_v1 = vsel %vm425_vm0, %v5587_v19, %v5586_v20  ;;  %v5627_v41 = vld [vmem:[%s11042_s0 + $0x48c] ss:$16 sm:%s2926_s2]   ;;  %s2977_s26 = smov 48  ;;  %s6069_s2 = smov 48  }
 0x158   :  { %v5589_v3 = vld [vmem:[%s11042_s0 + $0x384] ss:$16 sm:%s2752_s20]   ;;  %v2750_v32 = vsel %vm430_vm1, %v5588_v53, %v2745_v1  ;;  %v2929_v39 = vsel %vm425_vm0, %v5627_v41, %v5626_v44  ;;  %v5628_v49 = vld [vmem:[%s11042_s0 + $0x48c] ss:$16 sm:%s2931_s4]   ;;  %s2982_s20 = smov 192  ;;  %s2816_s4 = smov 48  ;;  %v9150_v4 = vpop.permute.xlu1 %2182  }
 0x159   :  { %2687 = vrot.lane.b32.xlu2 %v2686_v9, %s6068_s25  ;;  %2871 = vrot.lane.b32.xlu1 %v2870_v28, %s6068_s25  ;;  %v2755_v29 = vsel %vm435_vm2, %v5589_v3, %v2750_v32  ;;  %v5629_v45 = vld [vmem:[%s11042_s0 + $0x48c] ss:$16 sm:%s2936_s14]   ;;  %v2934_v2 = vsel %vm430_vm1, %v5628_v49, %v2929_v39  ;;  %s3183_s14 = smov 48 }
 0x15a   :  { %v5636_v35 = vld [vmem:[%s11042_s0 + $0x68c] ss:$16 sm:%s2969_s19]   ;;  %5421 = vst.msk [vmem:[%s11043_s1 + $0x88] sm:$0xff] %vm1725_vm7, %v8929_v18   ;;  %v2939_v16 = vsel %vm435_vm2, %v5629_v45, %v2934_v2  ;;  %s3096_s19 = smov 192 }
 0x15b   :  { %v5637_v33 = vld [vmem:[%s11042_s0 + $0x68c] ss:$16 sm:%s2972_s28]   ;;  %5431 = vst.msk [vmem:[%s11043_s1 + $0xc8] sm:$0xff] %vm1725_vm7, %v8941_v26   ;;  %s2880_s28 = smov 12 }
 0x15c   :  { %v9088_v10 = vpop.permute.xlu0 %2159   ;;  %v5638_v22 = vld [vmem:[%s11042_s0 + $0x68c] ss:$16 sm:%s2977_s26]   ;;  %v2975_v15 = vsel %vm425_vm0, %v5637_v33, %v5636_v35  ;;  %v5601_v42 = vld [vmem:[%s11042_s0 + $0x684] ss:$16 sm:%s2808_s3]   ;;  %s3060_s3 = smov 3  ;;  %s3385_s26 = smov 12 }
 0x15d   :  { %2917 = vrot.lane.b32.xlu0 %v2916_v63, %s6068_s25  ;;  %v5639_v61 = vld [vmem:[%s11042_s0 + $0x68c] ss:$16 sm:%s2982_s20]   ;;  %v2980_v5 = vsel %vm430_vm1, %v5638_v22, %v2975_v15  ;;  %5441 = vst.msk [vmem:[%s11043_s1 + $0x30] sm:$0xff] %vm1725_vm7, %v8994_v6   ;;  %s3005_s20 = smov 192  ;;  %v9140_v62 = vpop.permute.xlu2 %2205  }
 0x15e   :  { %v2985_v17 = vsel %vm435_vm2, %v5639_v61, %v2980_v5  ;;  %v5602_v47 = vld [vmem:[%s11042_s0 + $0x684] ss:$16 sm:%s2811_s21]   ;;  %5436 = vst.msk [vmem:[%s11043_s1 + $0x10] sm:$0xff] %vm1725_vm7, %v9003_v48   ;;  %s3040_s21 = smov 12 }
 0x15f   :  { %v5603_v57 = vld [vmem:[%s11042_s0 + $0x684] ss:$16 sm:%s2816_s4]   ;;  %v2814_v18 = vsel %vm425_vm0, %v5602_v47, %v5601_v42  ;;  %v5641_v26 = vld [vmem:[%s11042_s0 + $0x3] ss:$16 sm:%s2992_s30]   ;;  %s3045_s4 = smov 48  ;;  %s3129_s30 = smov 3 }
 0x160   :  { %v5604_v0 = vld [vmem:[%s11042_s0 + $0x684] ss:$16 sm:%s2821_s15]   ;;  %v2819_v24 = vsel %vm430_vm1, %v5603_v57, %v2814_v18  ;;  %v5642_v31 = vld [vmem:[%s11042_s0 + $0x3] ss:$16 sm:%s2995_s12]   ;;  %s3050_s15 = smov 192  ;;  %v9222_v56 = vpop.permute.xlu1 %2251   ;;  %s3014_s12 = smov 3 }
 0x161   :  { %2756 = vrot.lane.b32.xlu2 %v2755_v29, %s6068_s25  ;;  %2940 = vrot.lane.b32.xlu1 %v2939_v16, %s6068_s25  ;;  %v2824_v36 = vsel %vm435_vm2, %v5604_v0, %v2819_v24  ;;  %v2998_v37 = vsel %vm425_vm0, %v5642_v31, %v5641_v26  ;;  %v5643_v14 = vld [vmem:[%s11042_s0 + $0x3] ss:$16 sm:%s3000_s10]   ;;  %s2885_s10 = smov 48 }
 0x162   :  { %v5644_v13 = vld [vmem:[%s11042_s0 + $0x3] ss:$16 sm:%s3005_s20]   ;;  %v3003_v38 = vsel %vm430_vm1, %v5643_v14, %v2998_v37  ;;  %5446 = vst.msk [vmem:[%s11043_s1 + $0x50] sm:$0xff] %vm1725_vm7, %v9015_v23   ;;  %s2890_s20 = smov 192 }
 0x163   :  { %v5650_v12 = vld [vmem:[%s11042_s0 + $0x203] ss:$16 sm:%s3037_s9]   ;;  %v3008_v11 = vsel %vm435_vm2, %v5644_v13, %v3003_v38  ;;  %v5616_v52 = vld [vmem:[%s11042_s0 + $0x28c] ss:$16 sm:%s2877_s11]   ;;  %s3073_s11 = smov 192  ;;  %s3336_s9 = smov 3 }
 0x164   :  { %v9162_v34 = vpop.permute.xlu0 %2228   ;;  %v5651_v59 = vld [vmem:[%s11042_s0 + $0x203] ss:$16 sm:%s3040_s21]   ;;  %v5617_v9 = vld [vmem:[%s11042_s0 + $0x28c] ss:$16 sm:%s2880_s28]   ;;  %s3068_s21 = smov 48  ;;  %s3290_s28 = smov 3 }
 0x165   :  { %2986 = vrot.lane.b32.xlu0 %v2985_v17, %s6068_s25  ;;  %v5652_v30 = vld [vmem:[%s11042_s0 + $0x203] ss:$16 sm:%s3045_s4]   ;;  %v3043_v43 = vsel %vm425_vm0, %v5651_v59, %v5650_v12  ;;  %5456 = vst.msk [vmem:[%s11043_s1 + $0x90] sm:$0xff] %vm1725_vm7, %v9066_v7   ;;  %v2883_v21 = vsel %vm425_vm0, %v5617_v9, %v5616_v52  ;;  %v9213_v28 = vpop.permute.xlu2 %2274   ;;  %s3454_s4 = smov 12 }
 0x166   :  { %v5653_v25 = vld [vmem:[%s11042_s0 + $0x203] ss:$16 sm:%s3050_s15]   ;;  %v3048_v6 = vsel %vm430_vm1, %v5652_v30, %v3043_v43  ;;  %v5618_v48 = vld [vmem:[%s11042_s0 + $0x28c] ss:$16 sm:%s2885_s10]   ;;  %s3137_s10 = smov 48  ;;  %s3428_s15 = smov 3 }
 0x167   :  { %v3053_v46 = vsel %vm435_vm2, %v5653_v25, %v3048_v6  ;;  %v5619_v40 = vld [vmem:[%s11042_s0 + $0x28c] ss:$16 sm:%s2890_s20]   ;;  %v2888_v27 = vsel %vm430_vm1, %v5618_v48, %v2883_v21  ;;  %v5655_v23 = vld [vmem:[%s11042_s0 + $0x303] ss:$16 sm:%s3060_s3]   ;;  %s3114_s20 = smov 48  ;;  %s3313_s3 = smov 3 }
 0x168   :  { %5451 = vst.msk [vmem:[%s11043_s1 + $0x70] sm:$0xff] %vm1725_vm7, %v9076_v8   ;;  %v2893_v50 = vsel %vm435_vm2, %v5619_v40, %v2888_v27  ;;  %v5656_v54 = vld [vmem:[%s11042_s0 + $0x303] ss:$16 sm:%s3063_s7]   ;;  %s3178_s7 = smov 12  ;;  %v9293_v42 = vpop.permute.xlu1 %2320  }
 0x169   :  { %2825 = vrot.lane.b32.xlu2 %v2824_v36, %s6068_s25  ;;  %3009 = vrot.lane.b32.xlu1 %v3008_v11, %s6069_s2  ;;  %v5657_v51 = vld [vmem:[%s11042_s0 + $0x303] ss:$16 sm:%s3068_s21]   ;;  %v3066_v55 = vsel %vm425_vm0, %v5656_v54, %v5655_v23  ;;  %s3620_s21 = smov 48 }
 0x16a   :  { %v5658_v58 = vld [vmem:[%s11042_s0 + $0x303] ss:$16 sm:%s3073_s11]   ;;  %v3071_v20 = vsel %vm430_vm1, %v5657_v51, %v3066_v55  ;;  %5461 = vst.msk [vmem:[%s11043_s1 + $0xb0] sm:$0xff] %vm1725_vm7, %v9088_v10   ;;  %s3211_s11 = smov 192 }
 0x16b   :  { %v5665_v60 = vld [vmem:[%s11042_s0 + $0x503] ss:$16 sm:%s3106_s8]   ;;  %v3076_v53 = vsel %vm435_vm2, %v5658_v58, %v3071_v20  ;;  %s2959_s8 = smov 192  ;;  %v5631_v41 = vld [vmem:[%s11042_s0 + $0x58c] ss:$16 sm:%s2946_s29]   ;;  %s3316_s29 = smov 12 }
 0x16c   :  { %v5666_v63 = vld [vmem:[%s11042_s0 + $0x503] ss:$16 sm:%s3109_s27]   ;;  %v9234_v19 = vpop.permute.xlu0 %2297   ;;  %v5632_v7 = vld [vmem:[%s11042_s0 + $0x58c] ss:$16 sm:%s2949_s22]   ;;  %s3175_s22 = smov 3  ;;  %s3431_s27 = smov 12 }
 0x16d   :  { %3054 = vrot.lane.b32.xlu0 %v3053_v46, %s6069_s2  ;;  %v3112_v1 = vsel %vm425_vm0, %v5666_v63, %v5665_v60  ;;  %v5667_v3 = vld [vmem:[%s11042_s0 + $0x503] ss:$16 sm:%s3114_s20]   ;;  %v2952_v39 = vsel %vm425_vm0, %v5632_v7, %v5631_v41  ;;  %s3142_s20 = smov 192  ;;  %5471 = vst.msk [vmem:[%s11043_s1 + $0x18] sm:$0xff] %vm1725_vm7, %v9140_v62  }
 0x16e   :  { %v5668_v32 = vld [vmem:[%s11042_s0 + $0x503] ss:$16 sm:%s3119_s16]   ;;  %v3117_v44 = vsel %vm430_vm1, %v5667_v3, %v3112_v1  ;;  %v5633_v49 = vld [vmem:[%s11042_s0 + $0x58c] ss:$16 sm:%s2954_s5]   ;;  %s3224_s5 = smov 12  ;;  %s3413_s16 = smov 48 }
 0x16f   :  { %v3122_v29 = vsel %vm435_vm2, %v5668_v32, %v3117_v44  ;;  %v2957_v45 = vsel %vm430_vm1, %v5633_v49, %v2952_v39  ;;  %v5634_v8 = vld [vmem:[%s11042_s0 + $0x58c] ss:$16 sm:%s2959_s8]   ;;  %v5670_v2 = vld [vmem:[%s11042_s0 + $0x603] ss:$16 sm:%s3129_s30]   ;;  %s3188_s30 = smov 192  ;;  %s3244_s8 = smov 3 }
 0x170   :  { %v2962_v35 = vsel %vm435_vm2, %v5634_v8, %v2957_v45  ;;  %v5671_v10 = vld [vmem:[%s11042_s0 + $0x603] ss:$16 sm:%s3132_s23]   ;;  %5466 = vst.msk [vmem:[%s11043_s1 + $0xd0] sm:$0xff] %vm1725_vm7, %v9150_v4   ;;  %v9363_v9 = vpop.permute.xlu1 %2388   ;;  %s3390_s23 = smov 48 }
 0x171   :  { %2894 = vrot.lane.b32.xlu2 %v2893_v50, %s6068_s25  ;;  %3077 = vrot.lane.b32.xlu1 %v3076_v53, %s6069_s2  ;;  %v3135_v16 = vsel %vm425_vm0, %v5671_v10, %v5670_v2  ;;  %v5672_v33 = vld [vmem:[%s11042_s0 + $0x603] ss:$16 sm:%s3137_s10]   ;;  %s3298_s10 = smov 48 }
 0x172   :  { %v5673_v22 = vld [vmem:[%s11042_s0 + $0x603] ss:$16 sm:%s3142_s20]   ;;  %v3140_v15 = vsel %vm430_vm1, %v5672_v33, %v3135_v16  ;;  %v5680_v61 = vld [vmem:[%s11042_s0 + $0x10b] ss:$16 sm:%s3175_s22]   ;;  %s3198_s22 = smov 3  ;;  %s3257_s20 = smov 192 }
 0x173   :  { %v5681_v5 = vld [vmem:[%s11042_s0 + $0x10b] ss:$16 sm:%s3178_s7]   ;;  %v3145_v17 = vsel %vm435_vm2, %v5673_v22, %v3140_v15  ;;  %5476 = vst.msk [vmem:[%s11043_s1 + $0x38] sm:$0xff] %vm1725_vm7, %v9162_v34   ;;  %s3201_s7 = smov 12 }
 0x174   :  { %v3181_v47 = vsel %vm425_vm0, %v5681_v5, %v5680_v61  ;;  %v5682_v57 = vld [vmem:[%s11042_s0 + $0x10b] ss:$16 sm:%s3183_s14]   ;;  %v9306_v18 = vpop.permute.xlu0 %2366   ;;  %v5645_v26 = vld [vmem:[%s11042_s0 + $0x103] ss:$16 sm:%s3014_s12]   ;;  %s3267_s12 = smov 3  ;;  %s3459_s14 = smov 48 }
 0x175   :  { %3123 = vrot.lane.b32.xlu0 %v3122_v29, %s6069_s2  ;;  %v3186_v0 = vsel %vm430_vm1, %v5682_v57, %v3181_v47  ;;  %v5683_v24 = vld [vmem:[%s11042_s0 + $0x10b] ss:$16 sm:%s3188_s30]   ;;  %5486 = vst.msk [vmem:[%s11043_s1 + $0x78] sm:$0xff] %vm1725_vm7, %v9213_v28   ;;  %s3234_s30 = smov 192 }
 0x176   :  { %v3191_v31 = vsel %vm435_vm2, %v5683_v24, %v3186_v0  ;;  %v5646_v62 = vld [vmem:[%s11042_s0 + $0x103] ss:$16 sm:%s3017_s18]   ;;  %v5685_v4 = vld [vmem:[%s11042_s0 + $0x20b] ss:$16 sm:%s3198_s22]   ;;  %s3247_s18 = smov 12  ;;  %s3083_s22 = smov 3 }
 0x177   :  { %v5647_v36 = vld [vmem:[%s11042_s0 + $0x103] ss:$16 sm:%s3022_s17]   ;;  %v3020_v37 = vsel %vm425_vm0, %v5646_v62, %v5645_v26  ;;  %v5686_v38 = vld [vmem:[%s11042_s0 + $0x20b] ss:$16 sm:%s3201_s7]   ;;  %s3252_s17 = smov 48  ;;  %s3086_s7 = smov 12 }
 0x178   :  { %v5648_v14 = vld [vmem:[%s11042_s0 + $0x103] ss:$16 sm:%s3027_s24]   ;;  %v3025_v13 = vsel %vm430_vm1, %v5647_v36, %v3020_v37  ;;  %v3204_v34 = vsel %vm425_vm0, %v5686_v38, %v5685_v4  ;;  %v5687_v11 = vld [vmem:[%s11042_s0 + $0x20b] ss:$16 sm:%s3206_s6]   ;;  %s3091_s6 = smov 48  ;;  %s3280_s24 = smov 192  ;;  %v2458_v29 = vpop.permute.xlu1 %2457  }
 0x179   :  { %2963 = vrot.lane.b32.xlu2 %v2962_v35, %s6068_s25  ;;  %3146 = vrot.lane.b32.xlu1 %v3145_v17, %s6069_s2  ;;  %v3030_v12 = vsel %vm435_vm2, %v5648_v14, %v3025_v13  ;;  %5481 = vst.msk [vmem:[%s11043_s1 + $0x58] sm:$0xff] %vm1725_vm7, %v9222_v56   ;;  %v3209_v30 = vsel %vm430_vm1, %v5687_v11, %v3204_v34  ;;  %s3293_s25 = smov 12 }
 0x17a   :  { %v5688_v43 = vld [vmem:[%s11042_s0 + $0x20b] ss:$16 sm:%s3211_s11]   ;;  %5491 = vst.msk [vmem:[%s11043_s1 + $0x98] sm:$0xff] %vm1725_vm7, %v9234_v19   ;;  %s3372_s11 = smov 192 }
 0x17b   :  { %v5695_v25 = vld [vmem:[%s11042_s0 + $0x40b] ss:$16 sm:%s3244_s8]   ;;  %v3214_v46 = vsel %vm435_vm2, %v5688_v43, %v3209_v30  ;;  %v5660_v23 = vld [vmem:[%s11042_s0 + $0x403] ss:$16 sm:%s3083_s22]   ;;  %s3221_s22 = smov 3  ;;  %s3795_s8 = smov 3 }
 0x17c   :  { %v5696_v52 = vld [vmem:[%s11042_s0 + $0x40b] ss:$16 sm:%s3247_s18]   ;;  %v9376_v40 = vpop.permute.xlu0 %2434   ;;  %v5661_v50 = vld [vmem:[%s11042_s0 + $0x403] ss:$16 sm:%s3086_s7]   ;;  %s3270_s18 = smov 12  ;;  %s3339_s7 = smov 12 }
 0x17d   :  { %3192 = vrot.lane.b32.xlu0 %v3191_v31, %s6069_s2  ;;  %v2344_v59 = vpop.permute.xlu2 %2343   ;;  %v5697_v6 = vld [vmem:[%s11042_s0 + $0x40b] ss:$16 sm:%s3252_s17]   ;;  %v3250_v21 = vsel %vm425_vm0, %v5696_v52, %v5695_v25  ;;  %s3275_s17 = smov 48  ;;  %v3089_v51 = vsel %vm425_vm0, %v5661_v50, %v5660_v23  ;;  %5496 = vst.msk [vmem:[%s11043_s1 + $0xb8] sm:$0xff] %vm1725_vm7, %v9293_v42  }
 0x17e   :  { %v5698_v48 = vld [vmem:[%s11042_s0 + $0x40b] ss:$16 sm:%s3257_s20]   ;;  %v3255_v27 = vsel %vm430_vm1, %v5697_v6, %v3250_v21  ;;  %v5662_v28 = vld [vmem:[%s11042_s0 + $0x403] ss:$16 sm:%s3091_s6]   ;;  %s3321_s6 = smov 48  ;;  %s3749_s20 = smov 3 }
 0x17f   :  { %v3260_v54 = vsel %vm435_vm2, %v5698_v48, %v3255_v27  ;;  %v5663_v55 = vld [vmem:[%s11042_s0 + $0x403] ss:$16 sm:%s3096_s19]   ;;  %v3094_v58 = vsel %vm430_vm1, %v5662_v28, %v3089_v51  ;;  %v5700_v60 = vld [vmem:[%s11042_s0 + $0x50b] ss:$16 sm:%s3267_s12]   ;;  %s3326_s19 = smov 192  ;;  %s3152_s12 = smov 3 }
 0x180   :  { %5501 = vst.msk [vmem:[%s11043_s1 + $0xd8] sm:$0xff] %vm1725_vm7, %v2344_v59   ;;  %v5701_v56 = vld [vmem:[%s11042_s0 + $0x50b] ss:$16 sm:%s3270_s18]   ;;  %v3099_v63 = vsel %vm435_vm2, %v5663_v55, %v3094_v58  ;;  %s3155_s18 = smov 12 }
 0x181   :  { %3031 = vrot.lane.b32.xlu2 %v3030_v12, %s6069_s2  ;;  %3215 = vrot.lane.b32.xlu1 %v3214_v46, %s6069_s2  ;;  %v5702_v20 = vld [vmem:[%s11042_s0 + $0x50b] ss:$16 sm:%s3275_s17]   ;;  %v3273_v19 = vsel %vm425_vm0, %v5701_v56, %v5700_v60  ;;  %s3160_s17 = smov 48 }
 0x182   :  { %v5703_v53 = vld [vmem:[%s11042_s0 + $0x50b] ss:$16 sm:%s3280_s24]   ;;  %v3278_v1 = vsel %vm430_vm1, %v5702_v20, %v3273_v19  ;;  %v5710_v3 = vld [vmem:[%s11042_s0 + $0x83] ss:$16 sm:%s3313_s3]   ;;  %s3165_s24 = smov 192  ;;  %s3474_s3 = smov 3 }
 0x183   :  { %v5711_v32 = vld [vmem:[%s11042_s0 + $0x83] ss:$16 sm:%s3316_s29]   ;;  %v3283_v39 = vsel %vm435_vm2, %v5703_v53, %v3278_v1  ;;  %2369 = vst.msk [vmem:[%s11043_s1] sm:$0xff] %vm2368_vm8, %v9306_v18   ;;  %s3592_s29 = smov 12 }
 0x184   :  { %v3319_v44 = vsel %vm425_vm0, %v5711_v32, %v5710_v3  ;;  %v5712_v41 = vld [vmem:[%s11042_s0 + $0x83] ss:$16 sm:%s3321_s6]   ;;  %v5675_v45 = vld [vmem:[%s11042_s0 + $0xb] ss:$16 sm:%s3152_s12]   ;;  %v2504_v8 = vpop.permute.xlu0 %2503   ;;  %s3344_s6 = smov 48  ;;  %s3382_s12 = smov 3  ;;  %v2527_v58 = vpop.permute.xlu1 %2526  }
 0x185   :  { %3261 = vrot.lane.b32.xlu0 %v3260_v54, %s6069_s2  ;;  %v5713_v7 = vld [vmem:[%s11042_s0 + $0x83] ss:$16 sm:%s3326_s19]   ;;  %v3324_v49 = vsel %vm430_vm1, %v5712_v41, %v3319_v44  ;;  %s3349_s19 = smov 192  ;;  %v2412_v10 = vpop.permute.xlu2 %2411   ;;  %5510 = vst.msk [vmem:[%s11043_s1 + $0x20] sm:$0xff] %vm2368_vm8, %v9363_v9  }
 0x186   :  { %v5676_v2 = vld [vmem:[%s11042_s0 + $0xb] ss:$16 sm:%s3155_s18]   ;;  %v3329_v16 = vsel %vm435_vm2, %v5713_v7, %v3324_v49  ;;  %v5715_v15 = vld [vmem:[%s11042_s0 + $0x183] ss:$16 sm:%s3336_s9]   ;;  %s3546_s18 = smov 12  ;;  %s3612_s9 = smov 3 }
 0x187   :  { %v5677_v35 = vld [vmem:[%s11042_s0 + $0xb] ss:$16 sm:%s3160_s17]   ;;  %v3158_v33 = vsel %vm425_vm0, %v5676_v2, %v5675_v45  ;;  %v5716_v5 = vld [vmem:[%s11042_s0 + $0x183] ss:$16 sm:%s3339_s7]   ;;  %s3477_s7 = smov 12  ;;  %s3551_s17 = smov 48 }
 0x188   :  { %v5678_v22 = vld [vmem:[%s11042_s0 + $0xb] ss:$16 sm:%s3165_s24]   ;;  %v3163_v61 = vsel %vm430_vm1, %v5677_v35, %v3158_v33  ;;  %5515 = vst.msk [vmem:[%s11043_s1 + $0x40] sm:$0xff] %vm2368_vm8, %v2412_v10   ;;  %v3342_v42 = vsel %vm425_vm0, %v5716_v5, %v5715_v15  ;;  %s3395_s24 = smov 192 }
 0x189   :  { %3100 = vrot.lane.b32.xlu2 %v3099_v63, %s6069_s2  ;;  %3284 = vrot.lane.b32.xlu1 %v3283_v39, %s6069_s2  ;;  %v5717_v17 = vld [vmem:[%s11042_s0 + $0x183] ss:$16 sm:%s3344_s6]   ;;  %v3168_v57 = vsel %vm435_vm2, %v5678_v22, %v3163_v61  ;;  %s3229_s6 = smov 48 }
 0x18a   :  { %v5718_v47 = vld [vmem:[%s11042_s0 + $0x183] ss:$16 sm:%s3349_s19]   ;;  %v3347_v18 = vsel %vm430_vm1, %v5717_v17, %v3342_v42  ;;  %5520 = vst.msk [vmem:[%s11043_s1 + $0x60] sm:$0xff] %vm2368_vm8, %v9376_v40   ;;  %s3487_s19 = smov 192 }
 0x18b   :  { %v5725_v0 = vld [vmem:[%s11042_s0 + $0x383] ss:$16 sm:%s3382_s12]   ;;  %s3405_s12 = smov 3  ;;  %v3352_v36 = vsel %vm435_vm2, %v5718_v47, %v3347_v18  ;;  %v5690_v14 = vld [vmem:[%s11042_s0 + $0x30b] ss:$16 sm:%s3221_s22]   ;;  %s3451_s22 = smov 3 }
 0x18c   :  { %v5726_v24 = vld [vmem:[%s11042_s0 + $0x383] ss:$16 sm:%s3385_s26]   ;;  %s3408_s26 = smov 12  ;;  %5525 = vst.msk [vmem:[%s11043_s1 + $0x80] sm:$0xff] %vm2368_vm8, %v2458_v29  }
 0x18d   :  { %3330 = vrot.lane.b32.xlu0 %v3329_v16, %s6069_s2  ;;  %v5727_v26 = vld [vmem:[%s11042_s0 + $0x383] ss:$16 sm:%s3390_s23]   ;;  %v3388_v31 = vsel %vm425_vm0, %v5726_v24, %v5725_v0  ;;  %5535 = vst.msk [vmem:[%s11043_s1 + $0xc0] sm:$0xff] %vm2368_vm8, %v2504_v8   ;;  %v2481_v21 = vpop.permute.xlu2 %2480   ;;  %s3528_s23 = smov 48 }
 0x18e   :  { %v5728_v62 = vld [vmem:[%s11042_s0 + $0x383] ss:$16 sm:%s3395_s24]   ;;  %v3393_v37 = vsel %vm430_vm1, %v5727_v26, %v3388_v31  ;;  %v5691_v13 = vld [vmem:[%s11042_s0 + $0x30b] ss:$16 sm:%s3224_s5]   ;;  %s3418_s24 = smov 192  ;;  %s3602_s5 = smov 192 }
 0x18f   :  { %v5692_v4 = vld [vmem:[%s11042_s0 + $0x30b] ss:$16 sm:%s3229_s6]   ;;  %v3398_v38 = vsel %vm435_vm2, %v5728_v62, %v3393_v37  ;;  %v3227_v12 = vsel %vm425_vm0, %v5691_v13, %v5690_v14  ;;  %v5730_v11 = vld [vmem:[%s11042_s0 + $0x483] ss:$16 sm:%s3405_s12]   ;;  %s3482_s6 = smov 48  ;;  %s3520_s12 = smov 3 }
 0x190   :  { %v5693_v34 = vld [vmem:[%s11042_s0 + $0x30b] ss:$16 sm:%s3234_s30]   ;;  %v3232_v59 = vsel %vm430_vm1, %v5692_v4, %v3227_v12  ;;  %v5731_v30 = vld [vmem:[%s11042_s0 + $0x483] ss:$16 sm:%s3408_s26]   ;;  %s3464_s30 = smov 192  ;;  %s3523_s26 = smov 12 }
 0x191   :  { %3169 = vrot.lane.b32.xlu2 %v3168_v57, %s6069_s2  ;;  %3353 = vrot.lane.b32.xlu1 %v3352_v36, %s6069_s2  ;;  %v3411_v43 = vsel %vm425_vm0, %v5731_v30, %v5730_v11  ;;  %v5732_v25 = vld [vmem:[%s11042_s0 + $0x483] ss:$16 sm:%s3413_s16]   ;;  %v3237_v6 = vsel %vm435_vm2, %v5693_v34, %v3232_v59  ;;  %s3497_s16 = smov 3 }
 0x192   :  { %v5733_v52 = vld [vmem:[%s11042_s0 + $0x483] ss:$16 sm:%s3418_s24]   ;;  %v3416_v9 = vsel %vm430_vm1, %v5732_v25, %v3411_v43  ;;  %5530 = vst.msk [vmem:[%s11043_s1 + $0xa0] sm:$0xff] %vm2368_vm8, %v2481_v21   ;;  %s3533_s24 = smov 192 }
 0x193   :  { %v5740_v46 = vld [vmem:[%s11042_s0 + $0x683] ss:$16 sm:%s3451_s22]   ;;  %v3421_v50 = vsel %vm435_vm2, %v5733_v52, %v3416_v9  ;;  %v5705_v51 = vld [vmem:[%s11042_s0 + $0x60b] ss:$16 sm:%s3290_s28]   ;;  %s3436_s28 = smov 48  ;;  %s3505_s22 = smov 48 }
 0x194   :  { %v5741_v48 = vld [vmem:[%s11042_s0 + $0x683] ss:$16 sm:%s3454_s4]   ;;  %v5706_v28 = vld [vmem:[%s11042_s0 + $0x60b] ss:$16 sm:%s3293_s25]   ;;  %s3362_s4 = smov 12  ;;  %s3441_s25 = smov 192 }
 0x195   :  { %3399 = vrot.lane.b32.xlu0 %v3398_v38, %s6069_s2  ;;  %v5742_v40 = vld [vmem:[%s11042_s0 + $0x683] ss:$16 sm:%s3459_s14]   ;;  %v3457_v27 = vsel %vm425_vm0, %v5741_v48, %v5740_v46  ;;  %v3296_v56 = vsel %vm425_vm0, %v5706_v28, %v5705_v51  ;;  %5540 = vst.msk [vmem:[%s11043_s1 + $0x8] sm:$0xff] %vm2368_vm8, %v2527_v58   ;;  %s3367_s14 = smov 48 }
 0x196   :  { %v5743_v23 = vld [vmem:[%s11042_s0 + $0x683] ss:$16 sm:%s3464_s30]   ;;  %v3462_v54 = vsel %vm430_vm1, %v5742_v40, %v3457_v27  ;;  %v5707_v55 = vld [vmem:[%s11042_s0 + $0x60b] ss:$16 sm:%s3298_s10]   ;;  %s3566_s30 = smov 3  ;;  %s4359_s10 = smov 192 }
 0x197   :  { %v3467_v60 = vsel %vm435_vm2, %v5743_v23, %v3462_v54  ;;  %v5708_v20 = vld [vmem:[%s11042_s0 + $0x60b] ss:$16 sm:%s3303_s13]   ;;  %v3301_v19 = vsel %vm430_vm1, %v5707_v55, %v3296_v56  ;;  %v5721_v33 = vld [vmem:[%s11042_s0 + $0x283] ss:$16 sm:%s3362_s4]   ;;  %s6070_s4 = smov 32   ;;  %s3638_s13 = smov 12 }
 0x198   :  { %v5745_v63 = vld [vmem:[%s11042_s0 + $0x8b] ss:$16 sm:%s3474_s3]   ;;  %v3306_v44 = vsel %vm435_vm2, %v5708_v20, %v3301_v19  ;;  %s3359_s3 = smov 3  ;;  %v5722_v22 = vld [vmem:[%s11042_s0 + $0x283] ss:$16 sm:%s3367_s14]   ;;  %s3597_s14 = smov 48  ;;  %v2596_v26 = vpop.permute.xlu1 %2595  }
 0x199   :  { %3238 = vrot.lane.b32.xlu2 %v3237_v6, %s6069_s2  ;;  %3422 = vrot.lane.b32.xlu1 %v3421_v50, %s6069_s2  ;;  %v5746_v53 = vld [vmem:[%s11042_s0 + $0x8b] ss:$16 sm:%s3477_s7]   ;;  %s3615_s7 = smov 12 }
 0x19a   :  { %v3480_v1 = vsel %vm425_vm0, %v5746_v53, %v5745_v63  ;;  %v5747_v3 = vld [vmem:[%s11042_s0 + $0x8b] ss:$16 sm:%s3482_s6]   ;;  %v5720_v10 = vld [vmem:[%s11042_s0 + $0x283] ss:$16 sm:%s3359_s3]   ;;  %s3589_s3 = smov 3  ;;  %s3739_s6 = smov 192 }
 0x19b   :  { %v5748_v32 = vld [vmem:[%s11042_s0 + $0x8b] ss:$16 sm:%s3487_s19]   ;;  %v3485_v41 = vsel %vm430_vm1, %v5747_v3, %v3480_v1  ;;  %v3365_v61 = vsel %vm425_vm0, %v5721_v33, %v5720_v10  ;;  %v5723_v5 = vld [vmem:[%s11042_s0 + $0x283] ss:$16 sm:%s3372_s11]   ;;  %s3625_s19 = smov 192  ;;  %s4369_s11 = smov 3 }
 0x19c   :  { %v5755_v7 = vld [vmem:[%s11042_s0 + $0x28b] ss:$16 sm:%s3520_s12]   ;;  %v3490_v2 = vsel %vm435_vm2, %v5748_v32, %v3485_v41  ;;  %s3543_s12 = smov 3  ;;  %v3370_v42 = vsel %vm430_vm1, %v5722_v22, %v3365_v61  ;;  %5555 = vst.msk [vmem:[%s11043_s1 + $0x68] sm:$0xff] %vm2368_vm8, %v2596_v26  }
 0x19d   :  { %3468 = vrot.lane.b32.xlu0 %v3467_v60, %s6069_s2  ;;  %v5756_v39 = vld [vmem:[%s11042_s0 + $0x28b] ss:$16 sm:%s3523_s26]   ;;  %v3375_v18 = vsel %vm435_vm2, %v5723_v5, %v3370_v42  ;;  %s3798_s26 = smov 12 }
 0x19e   :  { %v5757_v49 = vld [vmem:[%s11042_s0 + $0x28b] ss:$16 sm:%s3528_s23]   ;;  %v3526_v45 = vsel %vm425_vm0, %v5756_v39, %v5755_v7  ;;  %v5735_v12 = vld [vmem:[%s11042_s0 + $0x583] ss:$16 sm:%s3428_s15]   ;;  %s3680_s15 = smov 3  ;;  %s3803_s23 = smov 48 }
 0x19f   :  { %v2573_v29 = vpop.permute.xlu0 %2572   ;;  %v5758_v8 = vld [vmem:[%s11042_s0 + $0x28b] ss:$16 sm:%s3533_s24]   ;;  %v3531_v35 = vsel %vm430_vm1, %v5757_v49, %v3526_v45  ;;  %s3556_s24 = smov 192  ;;  %v5736_v11 = vld [vmem:[%s11042_s0 + $0x583] ss:$16 sm:%s3431_s27]   ;;  %s3660_s27 = smov 12 }
 0x1a0   :  { %5550 = vst.msk [vmem:[%s11043_s1 + $0x48] sm:$0xff] %vm2368_vm8, %v2573_v29   ;;  %v3536_v15 = vsel %vm435_vm2, %v5758_v8, %v3531_v35  ;;  %v5760_v17 = vld [vmem:[%s11042_s0 + $0x38b] ss:$16 sm:%s3543_s12]   ;;  %v3434_v25 = vsel %vm425_vm0, %v5736_v11, %v5735_v12  ;;  %s3657_s12 = smov 3 }
 0x1a1   :  { %3307 = vrot.lane.b32.xlu2 %v3306_v44, %s6069_s2  ;;  %3491 = vrot.lane.b32.xlu1 %v3490_v2, %s6069_s2  ;;  %v5761_v47 = vld [vmem:[%s11042_s0 + $0x38b] ss:$16 sm:%s3546_s18]   ;;  %s3574_s18 = smov 48 }
 0x1a2   :  { %v5762_v57 = vld [vmem:[%s11042_s0 + $0x38b] ss:$16 sm:%s3551_s17]   ;;  %v3549_v0 = vsel %vm425_vm0, %v5761_v47, %v5760_v17  ;;  %v5737_v59 = vld [vmem:[%s11042_s0 + $0x583] ss:$16 sm:%s3436_s28]   ;;  %s3665_s17 = smov 48  ;;  %s3688_s28 = smov 48 }
 0x1a3   :  { %v2550_v16 = vpop.permute.xlu2 %2549   ;;  %v5763_v24 = vld [vmem:[%s11042_s0 + $0x38b] ss:$16 sm:%s3556_s24]   ;;  %v3554_v31 = vsel %vm430_vm1, %v5762_v57, %v3549_v0  ;;  %v5738_v52 = vld [vmem:[%s11042_s0 + $0x583] ss:$16 sm:%s3441_s25]   ;;  %v3439_v6 = vsel %vm430_vm1, %v5737_v59, %v3434_v25  ;;  %s3670_s25 = smov 192  ;;  %s4497_s24 = smov 192 }
 0x1a4   :  { %5545 = vst.msk [vmem:[%s11043_s1 + $0x28] sm:$0xff] %vm2368_vm8, %v2550_v16   ;;  %v5770_v62 = vld [vmem:[%s11042_s0 + $0x58b] ss:$16 sm:%s3589_s3]   ;;  %v3559_v4 = vsel %vm435_vm2, %v5763_v24, %v3554_v31  ;;  %v3444_v48 = vsel %vm435_vm2, %v5738_v52, %v3439_v6  ;;  %s3752_s3 = smov 12 }
 0x1a5   :  { %3537 = vrot.lane.b32.xlu0 %v3536_v15, %s6069_s2  ;;  %v5771_v36 = vld [vmem:[%s11042_s0 + $0x58b] ss:$16 sm:%s3592_s29]   ;;  %s3500_s29 = smov 12 }
 0x1a6   :  { %v3595_v37 = vsel %vm425_vm0, %v5771_v36, %v5770_v62  ;;  %v5772_v14 = vld [vmem:[%s11042_s0 + $0x58b] ss:$16 sm:%s3597_s14]   ;;  %v5784_v50 = vld [vmem:[%s11042_s0 + $0x102] ss:$16 sm:%s3657_s12]   ;;  %s3569_s12 = smov 12  ;;  %s3648_s14 = smov 192 }
 0x1a7   :  { %v5773_v13 = vld [vmem:[%s11042_s0 + $0x58b] ss:$16 sm:%s3602_s5]   ;;  %v3600_v38 = vsel %vm430_vm1, %v5772_v14, %v3595_v37  ;;  %v5785_v54 = vld [vmem:[%s11042_s0 + $0x102] ss:$16 sm:%s3660_s27]   ;;  %s3510_s5 = smov 192  ;;  %s3683_s27 = smov 12 }
 0x1a8   :  { %v3605_v30 = vsel %vm435_vm2, %v5773_v13, %v3600_v38  ;;  %v5775_v9 = vld [vmem:[%s11042_s0 + $0x68b] ss:$16 sm:%s3612_s9]   ;;  %v3663_v51 = vsel %vm425_vm0, %v5785_v54, %v5784_v50  ;;  %v5786_v28 = vld [vmem:[%s11042_s0 + $0x102] ss:$16 sm:%s3665_s17]   ;;  %s3726_s9 = smov 3  ;;  %s3579_s17 = smov 192 }
 0x1a9   :  { %3376 = vrot.lane.b32.xlu2 %v3375_v18, %s6069_s2  ;;  %3560 = vrot.lane.b32.xlu1 %v3559_v4, %s6069_s2  ;;  %v5776_v46 = vld [vmem:[%s11042_s0 + $0x68b] ss:$16 sm:%s3615_s7]   ;;  %v3668_v60 = vsel %vm430_vm1, %v5786_v28, %v3663_v51  ;;  %s3729_s7 = smov 12 }
 0x1aa   :  { %v5777_v21 = vld [vmem:[%s11042_s0 + $0x68b] ss:$16 sm:%s3620_s21]   ;;  %v3618_v40 = vsel %vm425_vm0, %v5776_v46, %v5775_v9  ;;  %v5787_v55 = vld [vmem:[%s11042_s0 + $0x102] ss:$16 sm:%s3670_s25]   ;;  %s3693_s25 = smov 192  ;;  %s3734_s21 = smov 48 }
 0x1ab   :  { %v2642_v34 = vpop.permute.xlu0 %2641   ;;  %v2619_v43 = vpop.permute.xlu2 %2618   ;;  %v5778_v27 = vld [vmem:[%s11042_s0 + $0x68b] ss:$16 sm:%s3625_s19]   ;;  %v3623_v23 = vsel %vm430_vm1, %v5777_v21, %v3618_v40  ;;  %v3673_v53 = vsel %vm435_vm2, %v5787_v55, %v3668_v60  ;;  %v5789_v41 = vld [vmem:[%s11042_s0 + $0x202] ss:$16 sm:%s3680_s15]   ;;  %s3818_s15 = smov 3  ;;  %s4428_s19 = smov 192 }
 0x1ac   :  { %5565 = vst.msk [vmem:[%s11043_s1 + $0xa8] sm:$0xff] %vm2368_vm8, %v2642_v34   ;;  %v3628_v58 = vsel %vm435_vm2, %v5778_v27, %v3623_v23  ;;  %v5750_v56 = vld [vmem:[%s11042_s0 + $0x18b] ss:$16 sm:%s3497_s16]   ;;  %s3887_s16 = smov 3 }
 0x1ad   :  { %5560 = vst.msk [vmem:[%s11043_s1 + $0x88] sm:$0xff] %vm2368_vm8, %v2619_v43   ;;  %3606 = vrot.lane.b32.xlu0 %v3605_v30, %s6069_s2  ;;  %v5751_v63 = vld [vmem:[%s11042_s0 + $0x18b] ss:$16 sm:%s3500_s29]   ;;  %s3757_s29 = smov 48 }
 0x1ae   :  { %v5752_v19 = vld [vmem:[%s11042_s0 + $0x18b] ss:$16 sm:%s3505_s22]   ;;  %v3503_v3 = vsel %vm425_vm0, %v5751_v63, %v5750_v56  ;;  %v5790_v7 = vld [vmem:[%s11042_s0 + $0x202] ss:$16 sm:%s3683_s27]   ;;  %s3821_s27 = smov 12  ;;  %s3895_s22 = smov 48 }
 0x1af   :  { %v5753_v32 = vld [vmem:[%s11042_s0 + $0x18b] ss:$16 sm:%s3510_s5]   ;;  %v3508_v44 = vsel %vm430_vm1, %v5752_v19, %v3503_v3  ;;  %v5791_v29 = vld [vmem:[%s11042_s0 + $0x202] ss:$16 sm:%s3688_s28]   ;;  %v3686_v45 = vsel %vm425_vm0, %v5790_v7, %v5789_v41  ;;  %s3762_s5 = smov 192  ;;  %s3826_s28 = smov 48 }
 0x1b0   :  { %v3513_v49 = vsel %vm435_vm2, %v5753_v32, %v3508_v44  ;;  %v5792_v8 = vld [vmem:[%s11042_s0 + $0x202] ss:$16 sm:%s3693_s25]   ;;  %v3691_v2 = vsel %vm430_vm1, %v5791_v29, %v3686_v45  ;;  %v5765_v5 = vld [vmem:[%s11042_s0 + $0x48b] ss:$16 sm:%s3566_s30]   ;;  %s3808_s25 = smov 192  ;;  %s3706_s30 = smov 12 }
 0x1b1   :  { %3445 = vrot.lane.b32.xlu2 %v3444_v48, %s6069_s2  ;;  %3629 = vrot.lane.b32.xlu1 %v3628_v58, %s6069_s2  ;;  %v5799_v35 = vld [vmem:[%s11042_s0 + $0x402] ss:$16 sm:%s3726_s9]   ;;  %v3696_v33 = vsel %vm435_vm2, %v5792_v8, %v3691_v2  ;;  %s3635_s9 = smov 3 }
 0x1b2   :  { %v5800_v10 = vld [vmem:[%s11042_s0 + $0x402] ss:$16 sm:%s3729_s7]   ;;  %v5766_v42 = vld [vmem:[%s11042_s0 + $0x48b] ss:$16 sm:%s3569_s12]   ;;  %s3867_s7 = smov 12  ;;  %s4255_s12 = smov 3 }
 0x1b3   :  { %v2665_v20 = vpop.permute.xlu1 %2664   ;;  %v2688_v1 = vpop.permute.xlu2 %2687   ;;  %v5801_v16 = vld [vmem:[%s11042_s0 + $0x402] ss:$16 sm:%s3734_s21]   ;;  %v3732_v22 = vsel %vm425_vm0, %v5800_v10, %v5799_v35  ;;  %v3572_v57 = vsel %vm425_vm0, %v5766_v42, %v5765_v5  ;;  %v5767_v18 = vld [vmem:[%s11042_s0 + $0x48b] ss:$16 sm:%s3574_s18]   ;;  %s3643_s21 = smov 48  ;;  %s3716_s18 = smov 192 }
 0x1b4   :  { %5570 = vst.msk [vmem:[%s11043_s1 + $0xc8] sm:$0xff] %vm2368_vm8, %v2665_v20   ;;  %v5802_v15 = vld [vmem:[%s11042_s0 + $0x402] ss:$16 sm:%s3739_s6]   ;;  %v3737_v61 = vsel %vm430_vm1, %v5801_v16, %v3732_v22  ;;  %v3577_v24 = vsel %vm430_vm1, %v5767_v18, %v3572_v57  ;;  %s3877_s6 = smov 192 }
 0x1b5   :  { %5575 = vst.msk [vmem:[%s11043_s1 + $0x10] sm:$0xff] %vm2368_vm8, %v2688_v1   ;;  %3674 = vrot.lane.b32.xlu0 %v3673_v53, %s6070_s4  ;;  %v3742_v17 = vsel %vm435_vm2, %v5802_v15, %v3737_v61  ;;  %v5768_v0 = vld [vmem:[%s11042_s0 + $0x48b] ss:$16 sm:%s3579_s17]   ;;  %s4515_s17 = smov 48 }
 0x1b6   :  { %v5804_v26 = vld [vmem:[%s11042_s0 + $0x502] ss:$16 sm:%s3749_s20]   ;;  %v3582_v37 = vsel %vm435_vm2, %v5768_v0, %v3577_v24  ;;  %v5814_v38 = vld [vmem:[%s11042_s0 + $0xa] ss:$16 sm:%s3795_s8]   ;;  %s3703_s8 = smov 3  ;;  %s4382_s20 = smov 192 }
 0x1b7   :  { %v2711_v39 = vpop.permute.xlu0 %2710   ;;  %v5805_v31 = vld [vmem:[%s11042_s0 + $0x502] ss:$16 sm:%s3752_s3]   ;;  %v5815_v34 = vld [vmem:[%s11042_s0 + $0xa] ss:$16 sm:%s3798_s26]   ;;  %s3936_s26 = smov 12  ;;  %s4189_s3 = smov 12 }
 0x1b8   :  { %5580 = vst.msk [vmem:[%s11043_s1 + $0x30] sm:$0xff] %vm2368_vm8, %v2711_v39   ;;  %v5806_v62 = vld [vmem:[%s11042_s0 + $0x502] ss:$16 sm:%s3757_s29]   ;;  %v3755_v14 = vsel %vm425_vm0, %v5805_v31, %v5804_v26  ;;  %v3801_v30 = vsel %vm425_vm0, %v5815_v34, %v5814_v38  ;;  %s3890_s29 = smov 12 }
 0x1b9   :  { %3514 = vrot.lane.b32.xlu2 %v3513_v49, %s6069_s2  ;;  %3697 = vrot.lane.b32.xlu1 %v3696_v33, %s6070_s4  ;;  %v5807_v13 = vld [vmem:[%s11042_s0 + $0x502] ss:$16 sm:%s3762_s5]   ;;  %v3760_v4 = vsel %vm430_vm1, %v5806_v62, %v3755_v14  ;;  %s4199_s5 = smov 192 }
 0x1ba   :  { %v5816_v11 = vld [vmem:[%s11042_s0 + $0xa] ss:$16 sm:%s3803_s23]   ;;  %v3765_v59 = vsel %vm435_vm2, %v5807_v13, %v3760_v4  ;;  %v5780_v52 = vld [vmem:[%s11042_s0 + $0x2] ss:$16 sm:%s3635_s9]   ;;  %s3864_s9 = smov 3  ;;  %s3711_s23 = smov 48 }
 0x1bb   :  { %v2757_v47 = vpop.permute.xlu2 %2756   ;;  %v2734_v36 = vpop.permute.xlu1 %2733   ;;  %v5817_v43 = vld [vmem:[%s11042_s0 + $0xa] ss:$16 sm:%s3808_s25]   ;;  %v3806_v25 = vsel %vm430_vm1, %v5816_v11, %v3801_v30  ;;  %v5781_v6 = vld [vmem:[%s11042_s0 + $0x2] ss:$16 sm:%s3638_s13]   ;;  %s3831_s25 = smov 192  ;;  %s3775_s13 = smov 12 }
 0x1bc   :  { %5590 = vst.msk [vmem:[%s11043_s1 + $0x70] sm:$0xff] %vm2368_vm8, %v2757_v47   ;;  %v3811_v9 = vsel %vm435_vm2, %v5817_v43, %v3806_v25  ;;  %v3641_v21 = vsel %vm425_vm0, %v5781_v6, %v5780_v52  ;;  %v5782_v48 = vld [vmem:[%s11042_s0 + $0x2] ss:$16 sm:%s3643_s21]   ;;  %s3872_s21 = smov 48 }
 0x1bd   :  { %3743 = vrot.lane.b32.xlu0 %v3742_v17, %s6070_s4  ;;  %5585 = vst.msk [vmem:[%s11043_s1 + $0x50] sm:$0xff] %vm2368_vm8, %v2734_v36   ;;  %v5783_v40 = vld [vmem:[%s11042_s0 + $0x2] ss:$16 sm:%s3648_s14]   ;;  %v3646_v27 = vsel %vm430_vm1, %v5782_v48, %v3641_v21  ;;  %s3785_s14 = smov 192 }
 0x1be   :  { %v5819_v23 = vld [vmem:[%s11042_s0 + $0x10a] ss:$16 sm:%s3818_s15]   ;;  %v3651_v28 = vsel %vm435_vm2, %v5783_v40, %v3646_v27  ;;  %v5794_v44 = vld [vmem:[%s11042_s0 + $0x302] ss:$16 sm:%s3703_s8]   ;;  %s3933_s8 = smov 3  ;;  %s3956_s15 = smov 3 }
 0x1bf   :  { %v2780_v12 = vpop.permute.xlu0 %2779   ;;  %v5820_v50 = vld [vmem:[%s11042_s0 + $0x10a] ss:$16 sm:%s3821_s27]   ;;  %v5795_v41 = vld [vmem:[%s11042_s0 + $0x302] ss:$16 sm:%s3706_s30]   ;;  %s3959_s27 = smov 12  ;;  %s3844_s30 = smov 12 }
 0x1c0   :  { %5595 = vst.msk [vmem:[%s11043_s1 + $0x90] sm:$0xff] %vm2368_vm8, %v2780_v12   ;;  %v5821_v54 = vld [vmem:[%s11042_s0 + $0x10a] ss:$16 sm:%s3826_s28]   ;;  %v3824_v55 = vsel %vm425_vm0, %v5820_v50, %v5819_v23  ;;  %v3709_v39 = vsel %vm425_vm0, %v5795_v41, %v5794_v44  ;;  %s3964_s28 = smov 48 }
 0x1c1   :  { %3583 = vrot.lane.b32.xlu2 %v3582_v37, %s6069_s2  ;;  %3766 = vrot.lane.b32.xlu1 %v3765_v59, %s6070_s4  ;;  %v5822_v58 = vld [vmem:[%s11042_s0 + $0x10a] ss:$16 sm:%s3831_s25]   ;;  %v3829_v60 = vsel %vm430_vm1, %v5821_v54, %v3824_v55  ;;  %s3946_s25 = smov 192  ;;  %s4331_s2 = smov 48 }
 0x1c2   :  { %v5829_v56 = vld [vmem:[%s11042_s0 + $0x30a] ss:$16 sm:%s3864_s9]   ;;  %v3834_v53 = vsel %vm435_vm2, %v5822_v58, %v3829_v60  ;;  %v5796_v49 = vld [vmem:[%s11042_s0 + $0x302] ss:$16 sm:%s3711_s23]   ;;  %s3941_s23 = smov 48  ;;  %s3772_s9 = smov 3 }
 0x1c3   :  { %v2826_v46 = vpop.permute.xlu2 %2825   ;;  %v2803_v51 = vpop.permute.xlu1 %2802   ;;  %v5830_v63 = vld [vmem:[%s11042_s0 + $0x30a] ss:$16 sm:%s3867_s7]   ;;  %v5797_v45 = vld [vmem:[%s11042_s0 + $0x302] ss:$16 sm:%s3716_s18]   ;;  %v3714_v8 = vsel %vm430_vm1, %v5796_v49, %v3709_v39  ;;  %s4005_s7 = smov 12  ;;  %s3854_s18 = smov 192 }
 0x1c4   :  { %5605 = vst.msk [vmem:[%s11043_s1 + $0xd0] sm:$0xff] %vm2368_vm8, %v2826_v46   ;;  %v5831_v19 = vld [vmem:[%s11042_s0 + $0x30a] ss:$16 sm:%s3872_s21]   ;;  %v3870_v1 = vsel %vm425_vm0, %v5830_v63, %v5829_v56  ;;  %v3719_v33 = vsel %vm435_vm2, %v5797_v45, %v3714_v8  ;;  %s3780_s21 = smov 48 }
 0x1c5   :  { %3812 = vrot.lane.b32.xlu0 %v3811_v9, %s6070_s4  ;;  %5600 = vst.msk [vmem:[%s11043_s1 + $0xb0] sm:$0xff] %vm2368_vm8, %v2803_v51   ;;  %v5832_v3 = vld [vmem:[%s11042_s0 + $0x30a] ss:$16 sm:%s3877_s6]   ;;  %v3875_v32 = vsel %vm430_vm1, %v5831_v19, %v3870_v1  ;;  %s3900_s6 = smov 192 }
 0x1c6   :  { %v3880_v7 = vsel %vm435_vm2, %v5832_v3, %v3875_v32  ;;  %v5834_v2 = vld [vmem:[%s11042_s0 + $0x40a] ss:$16 sm:%s3887_s16]   ;;  %v5809_v26 = vld [vmem:[%s11042_s0 + $0x602] ss:$16 sm:%s3772_s9]   ;;  %s4002_s9 = smov 3  ;;  %s4025_s16 = smov 3 }
 0x1c7   :  { %v2849_v20 = vpop.permute.xlu0 %2848   ;;  %v5835_v35 = vld [vmem:[%s11042_s0 + $0x40a] ss:$16 sm:%s3890_s29]   ;;  %v5810_v31 = vld [vmem:[%s11042_s0 + $0x602] ss:$16 sm:%s3775_s13]   ;;  %s4028_s29 = smov 12  ;;  %s3913_s13 = smov 12 }
 0x1c8   :  { %5610 = vst.msk [vmem:[%s11043_s1 + $0x18] sm:$0xff] %vm2368_vm8, %v2849_v20   ;;  %v5836_v10 = vld [vmem:[%s11042_s0 + $0x40a] ss:$16 sm:%s3895_s22]   ;;  %v3893_v22 = vsel %vm425_vm0, %v5835_v35, %v5834_v2  ;;  %v3778_v37 = vsel %vm425_vm0, %v5810_v31, %v5809_v26  ;;  %s4033_s22 = smov 48 }
 0x1c9   :  { %3652 = vrot.lane.b32.xlu2 %v3651_v28, %s6070_s4  ;;  %3835 = vrot.lane.b32.xlu1 %v3834_v53, %s6070_s4  ;;  %v5837_v15 = vld [vmem:[%s11042_s0 + $0x40a] ss:$16 sm:%s3900_s6]   ;;  %v3898_v61 = vsel %vm430_vm1, %v5836_v10, %v3893_v22  ;;  %s4015_s6 = smov 192 }
 0x1ca   :  { %v5844_v5 = vld [vmem:[%s11042_s0 + $0x60a] ss:$16 sm:%s3933_s8]   ;;  %v3903_v57 = vsel %vm435_vm2, %v5837_v15, %v3898_v61  ;;  %v5811_v14 = vld [vmem:[%s11042_s0 + $0x602] ss:$16 sm:%s3780_s21]   ;;  %s4010_s21 = smov 48  ;;  %s3841_s8 = smov 3 }
 0x1cb   :  { %v2895_v29 = vpop.permute.xlu2 %2894   ;;  %v2872_v16 = vpop.permute.xlu1 %2871   ;;  %v5845_v17 = vld [vmem:[%s11042_s0 + $0x60a] ss:$16 sm:%s3936_s26]   ;;  %v5812_v13 = vld [vmem:[%s11042_s0 + $0x602] ss:$16 sm:%s3785_s14]   ;;  %v3783_v4 = vsel %vm430_vm1, %v5811_v14, %v3778_v37  ;;  %s4074_s26 = smov 12  ;;  %s3923_s14 = smov 192 }
 0x1cc   :  { %5620 = vst.msk [vmem:[%s11043_s1 + $0x58] sm:$0xff] %vm2368_vm8, %v2895_v29   ;;  %v5846_v47 = vld [vmem:[%s11042_s0 + $0x60a] ss:$16 sm:%s3941_s23]   ;;  %v3939_v18 = vsel %vm425_vm0, %v5845_v17, %v5844_v5  ;;  %v3788_v59 = vsel %vm435_vm2, %v5812_v13, %v3783_v4  ;;  %s3849_s23 = smov 48 }
 0x1cd   :  { %3881 = vrot.lane.b32.xlu0 %v3880_v7, %s6070_s4  ;;  %5615 = vst.msk [vmem:[%s11043_s1 + $0x38] sm:$0xff] %vm2368_vm8, %v2872_v16   ;;  %v5847_v0 = vld [vmem:[%s11042_s0 + $0x60a] ss:$16 sm:%s3946_s25]   ;;  %v3944_v24 = vsel %vm430_vm1, %v5846_v47, %v3939_v18  ;;  %s3969_s25 = smov 192 }
 0x1ce   :  { %v3949_v62 = vsel %vm435_vm2, %v5847_v0, %v3944_v24  ;;  %v5849_v38 = vld [vmem:[%s11042_s0 + $0x82] ss:$16 sm:%s3956_s15]   ;;  %v5824_v23 = vld [vmem:[%s11042_s0 + $0x20a] ss:$16 sm:%s3841_s8]   ;;  %s4071_s8 = smov 3  ;;  %s4094_s15 = smov 3 }
 0x1cf   :  { %v2918_v42 = vpop.permute.xlu0 %2917   ;;  %v5850_v12 = vld [vmem:[%s11042_s0 + $0x82] ss:$16 sm:%s3959_s27]   ;;  %v5825_v50 = vld [vmem:[%s11042_s0 + $0x20a] ss:$16 sm:%s3844_s30]   ;;  %s4097_s27 = smov 12  ;;  %s3982_s30 = smov 12 }
 0x1d0   :  { %5625 = vst.msk [vmem:[%s11043_s1 + $0x78] sm:$0xff] %vm2368_vm8, %v2918_v42   ;;  %v5851_v34 = vld [vmem:[%s11042_s0 + $0x82] ss:$16 sm:%s3964_s28]   ;;  %v3962_v30 = vsel %vm425_vm0, %v5850_v12, %v5849_v38  ;;  %v3847_v28 = vsel %vm425_vm0, %v5825_v50, %v5824_v23  ;;  %s4102_s28 = smov 48 }
 0x1d1   :  { %3720 = vrot.lane.b32.xlu2 %v3719_v33, %s6070_s4  ;;  %3904 = vrot.lane.b32.xlu1 %v3903_v57, %s6070_s4  ;;  %v5852_v43 = vld [vmem:[%s11042_s0 + $0x82] ss:$16 sm:%s3969_s25]   ;;  %v3967_v25 = vsel %vm430_vm1, %v5851_v34, %v3962_v30  ;;  %s4084_s25 = smov 192 }
 0x1d2   :  { %v5859_v52 = vld [vmem:[%s11042_s0 + $0x282] ss:$16 sm:%s4002_s9]   ;;  %v3972_v21 = vsel %vm435_vm2, %v5852_v43, %v3967_v25  ;;  %v5826_v55 = vld [vmem:[%s11042_s0 + $0x20a] ss:$16 sm:%s3849_s23]   ;;  %s4079_s23 = smov 48  ;;  %s3910_s9 = smov 3 }
 0x1d3   :  { %v2964_v36 = vpop.permute.xlu2 %2963   ;;  %v2941_v11 = vpop.permute.xlu1 %2940   ;;  %v5860_v9 = vld [vmem:[%s11042_s0 + $0x282] ss:$16 sm:%s4005_s7]   ;;  %v5827_v58 = vld [vmem:[%s11042_s0 + $0x20a] ss:$16 sm:%s3854_s18]   ;;  %v3852_v60 = vsel %vm430_vm1, %v5826_v55, %v3847_v28  ;;  %s4143_s7 = smov 12  ;;  %s3992_s18 = smov 192 }
 0x1d4   :  { %5635 = vst.msk [vmem:[%s11043_s1 + $0xb8] sm:$0xff] %vm2368_vm8, %v2964_v36   ;;  %v5861_v46 = vld [vmem:[%s11042_s0 + $0x282] ss:$16 sm:%s4010_s21]   ;;  %v4008_v48 = vsel %vm425_vm0, %v5860_v9, %v5859_v52  ;;  %v3857_v53 = vsel %vm435_vm2, %v5827_v58, %v3852_v60  ;;  %s3918_s21 = smov 48 }
 0x1d5   :  { %3950 = vrot.lane.b32.xlu0 %v3949_v62, %s6070_s4  ;;  %5630 = vst.msk [vmem:[%s11043_s1 + $0x98] sm:$0xff] %vm2368_vm8, %v2941_v11   ;;  %v5862_v40 = vld [vmem:[%s11042_s0 + $0x282] ss:$16 sm:%s4015_s6]   ;;  %v4013_v27 = vsel %vm430_vm1, %v5861_v46, %v4008_v48  ;;  %s4038_s6 = smov 192 }
 0x1d6   :  { %v4018_v54 = vsel %vm435_vm2, %v5862_v40, %v4013_v27  ;;  %v5864_v56 = vld [vmem:[%s11042_s0 + $0x382] ss:$16 sm:%s4025_s16]   ;;  %v5839_v2 = vld [vmem:[%s11042_s0 + $0x50a] ss:$16 sm:%s3910_s9]   ;;  %s4140_s9 = smov 3  ;;  %s4163_s16 = smov 3 }
 0x1d7   :  { %v2987_v6 = vpop.permute.xlu0 %2986   ;;  %v5865_v20 = vld [vmem:[%s11042_s0 + $0x382] ss:$16 sm:%s4028_s29]   ;;  %v5840_v35 = vld [vmem:[%s11042_s0 + $0x50a] ss:$16 sm:%s3913_s13]   ;;  %s4166_s29 = smov 12  ;;  %s4051_s13 = smov 12 }
 0x1d8   :  { %5640 = vst.msk [vmem:[%s11043_s1 + $0xd8] sm:$0xff] %vm2368_vm8, %v2987_v6   ;;  %v5866_v63 = vld [vmem:[%s11042_s0 + $0x382] ss:$16 sm:%s4033_s22]   ;;  %v4031_v1 = vsel %vm425_vm0, %v5865_v20, %v5864_v56  ;;  %v3916_v33 = vsel %vm425_vm0, %v5840_v35, %v5839_v2  ;;  %s4171_s22 = smov 48 }
 0x1d9   :  { %3789 = vrot.lane.b32.xlu2 %v3788_v59, %s6070_s4  ;;  %3973 = vrot.lane.b32.xlu1 %v3972_v21, %s6070_s4  ;;  %v5867_v3 = vld [vmem:[%s11042_s0 + $0x382] ss:$16 sm:%s4038_s6]   ;;  %v4036_v32 = vsel %vm430_vm1, %v5866_v63, %v4031_v1  ;;  %s4153_s6 = smov 192 }
 0x1da   :  { %v5874_v44 = vld [vmem:[%s11042_s0 + $0x582] ss:$16 sm:%s4071_s8]   ;;  %v4041_v39 = vsel %vm435_vm2, %v5867_v3, %v4036_v32  ;;  %v5841_v22 = vld [vmem:[%s11042_s0 + $0x50a] ss:$16 sm:%s3918_s21]   ;;  %s4148_s21 = smov 48  ;;  %s3979_s8 = smov 3 }
 0x1db   :  { %v3032_v51 = vpop.permute.xlu2 %3031   ;;  %v3010_v19 = vpop.permute.xlu1 %3009   ;;  %v5875_v7 = vld [vmem:[%s11042_s0 + $0x582] ss:$16 sm:%s4074_s26]   ;;  %v5842_v15 = vld [vmem:[%s11042_s0 + $0x50a] ss:$16 sm:%s3923_s14]   ;;  %v3921_v61 = vsel %vm430_vm1, %v5841_v22, %v3916_v33  ;;  %s4212_s26 = smov 12  ;;  %s4061_s14 = smov 192 }
 0x1dc   :  { %5649 = vst.msk [vmem:[%s11043_s1 + $0x20] sm:$0xff] %vm3011_vm9, %v3032_v51   ;;  %v5876_v29 = vld [vmem:[%s11042_s0 + $0x582] ss:$16 sm:%s4079_s23]   ;;  %v4077_v49 = vsel %vm425_vm0, %v5875_v7, %v5874_v44  ;;  %v3926_v57 = vsel %vm435_vm2, %v5842_v15, %v3921_v61  ;;  %s3987_s23 = smov 48 }
 0x1dd   :  { %4019 = vrot.lane.b32.xlu0 %v4018_v54, %s6070_s4  ;;  %3012 = vst.msk [vmem:[%s11043_s1] sm:$0xff] %vm3011_vm9, %v3010_v19   ;;  %v5877_v45 = vld [vmem:[%s11042_s0 + $0x582] ss:$16 sm:%s4084_s25]   ;;  %v4082_v8 = vsel %vm430_vm1, %v5876_v29, %v4077_v49  ;;  %s4107_s25 = smov 192 }
 0x1de   :  { %v4087_v10 = vsel %vm435_vm2, %v5877_v45, %v4082_v8  ;;  %v5879_v5 = vld [vmem:[%s11042_s0 + $0x682] ss:$16 sm:%s4094_s15]   ;;  %v5889_v26 = vld [vmem:[%s11042_s0 + $0x18a] ss:$16 sm:%s4140_s9]   ;;  %s4048_s9 = smov 3  ;;  %s4232_s15 = smov 3 }
 0x1df   :  { %v3055_v41 = vpop.permute.xlu0 %3054   ;;  %v5880_v42 = vld [vmem:[%s11042_s0 + $0x682] ss:$16 sm:%s4097_s27]   ;;  %v5890_v62 = vld [vmem:[%s11042_s0 + $0x18a] ss:$16 sm:%s4143_s7]   ;;  %s4235_s27 = smov 12  ;;  %s4281_s7 = smov 12 }
 0x1e0   :  { %5654 = vst.msk [vmem:[%s11043_s1 + $0x40] sm:$0xff] %vm3011_vm9, %v3055_v41   ;;  %v5881_v17 = vld [vmem:[%s11042_s0 + $0x682] ss:$16 sm:%s4102_s28]   ;;  %v4100_v18 = vsel %vm425_vm0, %v5880_v42, %v5879_v5  ;;  %v4146_v14 = vsel %vm425_vm0, %v5890_v62, %v5889_v26  ;;  %s4240_s28 = smov 48 }
 0x1e1   :  { %3858 = vrot.lane.b32.xlu2 %v3857_v53, %s6070_s4  ;;  %4042 = vrot.lane.b32.xlu1 %v4041_v39, %s6070_s4  ;;  %v5882_v0 = vld [vmem:[%s11042_s0 + $0x682] ss:$16 sm:%s4107_s25]   ;;  %v4105_v24 = vsel %vm430_vm1, %v5881_v17, %v4100_v18  ;;  %s4222_s25 = smov 192 }
 0x1e2   :  { %v5891_v36 = vld [vmem:[%s11042_s0 + $0x18a] ss:$16 sm:%s4148_s21]   ;;  %v4110_v37 = vsel %vm435_vm2, %v5882_v0, %v4105_v24  ;;  %v5854_v38 = vld [vmem:[%s11042_s0 + $0x182] ss:$16 sm:%s3979_s8]   ;;  %s4209_s8 = smov 3  ;;  %s4056_s21 = smov 48 }
 0x1e3   :  { %v3101_v16 = vpop.permute.xlu2 %3100   ;;  %v3078_v47 = vpop.permute.xlu1 %3077   ;;  %v5892_v13 = vld [vmem:[%s11042_s0 + $0x18a] ss:$16 sm:%s4153_s6]   ;;  %v4151_v4 = vsel %vm430_vm1, %v5891_v36, %v4146_v14  ;;  %v5855_v12 = vld [vmem:[%s11042_s0 + $0x182] ss:$16 sm:%s3982_s30]   ;;  %s4176_s6 = smov 192  ;;  %s4120_s30 = smov 12 }
 0x1e4   :  { %5664 = vst.msk [vmem:[%s11043_s1 + $0x80] sm:$0xff] %vm3011_vm9, %v3101_v16   ;;  %v4156_v34 = vsel %vm435_vm2, %v5892_v13, %v4151_v4  ;;  %v3985_v59 = vsel %vm425_vm0, %v5855_v12, %v5854_v38  ;;  %v5856_v30 = vld [vmem:[%s11042_s0 + $0x182] ss:$16 sm:%s3987_s23]   ;;  %s4217_s23 = smov 48 }
 0x1e5   :  { %4088 = vrot.lane.b32.xlu0 %v4087_v10, %s6070_s4  ;;  %5659 = vst.msk [vmem:[%s11043_s1 + $0x60] sm:$0xff] %vm3011_vm9, %v3078_v47   ;;  %v5857_v43 = vld [vmem:[%s11042_s0 + $0x182] ss:$16 sm:%s3992_s18]   ;;  %v3990_v25 = vsel %vm430_vm1, %v5856_v30, %v3985_v59  ;;  %s4130_s18 = smov 192 }
 0x1e6   :  { %v5894_v52 = vld [vmem:[%s11042_s0 + $0x28a] ss:$16 sm:%s4163_s16]   ;;  %v3995_v21 = vsel %vm435_vm2, %v5857_v43, %v3990_v25  ;;  %v5869_v56 = vld [vmem:[%s11042_s0 + $0x482] ss:$16 sm:%s4048_s9]   ;;  %s4278_s9 = smov 3  ;;  %s4300_s16 = smov 3 }
 0x1e7   :  { %v3124_v31 = vpop.permute.xlu0 %3123   ;;  %v5895_v6 = vld [vmem:[%s11042_s0 + $0x28a] ss:$16 sm:%s4166_s29]   ;;  %v5870_v20 = vld [vmem:[%s11042_s0 + $0x482] ss:$16 sm:%s4051_s13]   ;;  %s4303_s29 = smov 12  ;;  %s4186_s13 = smov 3 }
 0x1e8   :  { %5669 = vst.msk [vmem:[%s11043_s1 + $0xa0] sm:$0xff] %vm3011_vm9, %v3124_v31   ;;  %v5896_v9 = vld [vmem:[%s11042_s0 + $0x28a] ss:$16 sm:%s4171_s22]   ;;  %v4169_v48 = vsel %vm425_vm0, %v5895_v6, %v5894_v52  ;;  %v4054_v53 = vsel %vm425_vm0, %v5870_v20, %v5869_v56  ;;  %s4308_s22 = smov 48 }
 0x1e9   :  { %3927 = vrot.lane.b32.xlu2 %v3926_v57, %s6070_s4  ;;  %4111 = vrot.lane.b32.xlu1 %v4110_v37, %s6070_s4  ;;  %v5897_v40 = vld [vmem:[%s11042_s0 + $0x28a] ss:$16 sm:%s4176_s6]   ;;  %v4174_v27 = vsel %vm430_vm1, %v5896_v9, %v4169_v48  ;;  %s4291_s6 = smov 192 }
 0x1ea   :  { %v5904_v23 = vld [vmem:[%s11042_s0 + $0x48a] ss:$16 sm:%s4209_s8]   ;;  %v4179_v28 = vsel %vm435_vm2, %v5897_v40, %v4174_v27  ;;  %v5871_v1 = vld [vmem:[%s11042_s0 + $0x482] ss:$16 sm:%s4056_s21]   ;;  %s4286_s21 = smov 48  ;;  %s4117_s8 = smov 3 }
 0x1eb   :  { %v3170_v11 = vpop.permute.xlu2 %3169   ;;  %v3147_v46 = vpop.permute.xlu1 %3146   ;;  %v5905_v54 = vld [vmem:[%s11042_s0 + $0x48a] ss:$16 sm:%s4212_s26]   ;;  %v5872_v3 = vld [vmem:[%s11042_s0 + $0x482] ss:$16 sm:%s4061_s14]   ;;  %v4059_v32 = vsel %vm430_vm1, %v5871_v1, %v4054_v53  ;;  %s4349_s26 = smov 12  ;;  %s4194_s14 = smov 48 }
 0x1ec   :  { %5679 = vst.msk [vmem:[%s11043_s1 + $0x8] sm:$0xff] %vm3011_vm9, %v3170_v11   ;;  %v5906_v51 = vld [vmem:[%s11042_s0 + $0x48a] ss:$16 sm:%s4217_s23]   ;;  %v4215_v55 = vsel %vm425_vm0, %v5905_v54, %v5904_v23  ;;  %v4064_v39 = vsel %vm435_vm2, %v5872_v3, %v4059_v32  ;;  %s4125_s23 = smov 48 }
 0x1ed   :  { %4157 = vrot.lane.b32.xlu0 %v4156_v34, %s6070_s4  ;;  %5674 = vst.msk [vmem:[%s11043_s1 + $0xc0] sm:$0xff] %vm3011_vm9, %v3147_v46   ;;  %v5907_v58 = vld [vmem:[%s11042_s0 + $0x48a] ss:$16 sm:%s4222_s25]   ;;  %v4220_v60 = vsel %vm430_vm1, %v5906_v51, %v4215_v55  ;;  %s4245_s25 = smov 192 }
 0x1ee   :  { %v4225_v63 = vsel %vm435_vm2, %v5907_v58, %v4220_v60  ;;  %v5909_v44 = vld [vmem:[%s11042_s0 + $0x58a] ss:$16 sm:%s4232_s15]   ;;  %v5919_v2 = vld [vmem:[%s11042_s0 + $0x1] ss:$16 sm:%s4278_s9]   ;;  %s4451_s15 = smov 192 }
 0x1ef   :  { %v3193_v50 = vpop.permute.xlu0 %3192   ;;  %v5910_v41 = vld [vmem:[%s11042_s0 + $0x58a] ss:$16 sm:%s4235_s27]   ;;  %v5920_v10 = vld [vmem:[%s11042_s0 + $0x1] ss:$16 sm:%s4281_s7]   ;;  %s4258_s27 = smov 12  ;;  %s4326_s7 = smov 12 }
 0x1f0   :  { %5684 = vst.msk [vmem:[%s11043_s1 + $0x28] sm:$0xff] %vm3011_vm9, %v3193_v50   ;;  %v5911_v7 = vld [vmem:[%s11042_s0 + $0x58a] ss:$16 sm:%s4240_s28]   ;;  %v4238_v49 = vsel %vm425_vm0, %v5910_v41, %v5909_v44  ;;  %v4284_v22 = vsel %vm425_vm0, %v5920_v10, %v5919_v2  ;;  %s4372_s28 = smov 12 }
 0x1f1   :  { %3996 = vrot.lane.b32.xlu2 %v3995_v21, %s6070_s4  ;;  %4180 = vrot.lane.b32.xlu1 %v4179_v28, %s6070_s4  ;;  %v5912_v45 = vld [vmem:[%s11042_s0 + $0x58a] ss:$16 sm:%s4245_s25]   ;;  %v4243_v8 = vsel %vm430_vm1, %v5911_v7, %v4238_v49  ;;  %s4263_s25 = smov 48 }
 0x1f2   :  { %v5921_v16 = vld [vmem:[%s11042_s0 + $0x1] ss:$16 sm:%s4286_s21]   ;;  %v4248_v33 = vsel %vm435_vm2, %v5912_v45, %v4243_v8  ;;  %v5884_v5 = vld [vmem:[%s11042_s0 + $0x8a] ss:$16 sm:%s4117_s8]   ;;  %s4346_s8 = smov 3  ;;  %s4441_s21 = smov 12 }
 0x1f3   :  { %v3239_v19 = vpop.permute.xlu2 %3238   ;;  %v3216_v29 = vpop.permute.xlu1 %3215   ;;  %v5922_v15 = vld [vmem:[%s11042_s0 + $0x1] ss:$16 sm:%s4291_s6]   ;;  %v4289_v61 = vsel %vm430_vm1, %v5921_v16, %v4284_v22  ;;  %v5885_v42 = vld [vmem:[%s11042_s0 + $0x8a] ss:$16 sm:%s4120_s30]   ;;  %s4313_s6 = smov 192  ;;  %s4507_s30 = smov 3 }
 0x1f4   :  { %5694 = vst.msk [vmem:[%s11043_s1 + $0x68] sm:$0xff] %vm3011_vm9, %v3239_v19   ;;  %v4294_v17 = vsel %vm435_vm2, %v5922_v15, %v4289_v61  ;;  %v4123_v57 = vsel %vm425_vm0, %v5885_v42, %v5884_v5  ;;  %v5886_v18 = vld [vmem:[%s11042_s0 + $0x8a] ss:$16 sm:%s4125_s23]   ;;  %s4354_s23 = smov 48 }
 0x1f5   :  { %4226 = vrot.lane.b32.xlu0 %v4225_v63, %s6070_s4  ;;  %5689 = vst.msk [vmem:[%s11043_s1 + $0x48] sm:$0xff] %vm3011_vm9, %v3216_v29   ;;  %v5887_v0 = vld [vmem:[%s11042_s0 + $0x8a] ss:$16 sm:%s4130_s18]   ;;  %v4128_v24 = vsel %vm430_vm1, %v5886_v18, %v4123_v57  ;;  %s6071_s18 = smov 16  }
 0x1f6   :  { %v5923_v26 = vld [vmem:[%s11042_s0 + $0x101] ss:$16 sm:%s4300_s16]   ;;  %v4133_v37 = vsel %vm435_vm2, %v5887_v0, %v4128_v24  ;;  %v5899_v52 = vld [vmem:[%s11042_s0 + $0x38a] ss:$16 sm:%s4186_s13]   ;;  %s4438_s13 = smov 3 }
 0x1f7   :  { %v3262_v35 = vpop.permute.xlu0 %3261   ;;  %v5924_v31 = vld [vmem:[%s11042_s0 + $0x101] ss:$16 sm:%s4303_s29]   ;;  %v5900_v6 = vld [vmem:[%s11042_s0 + $0x38a] ss:$16 sm:%s4189_s3]   ;;  %s4415_s3 = smov 3 }
 0x1f8   :  { %5699 = vst.msk [vmem:[%s11043_s1 + $0x88] sm:$0xff] %vm3011_vm9, %v3262_v35   ;;  %v5925_v62 = vld [vmem:[%s11042_s0 + $0x101] ss:$16 sm:%s4308_s22]   ;;  %v4306_v14 = vsel %vm425_vm0, %v5924_v31, %v5923_v26  ;;  %v4192_v21 = vsel %vm425_vm0, %v5900_v6, %v5899_v52  ;;  %s4323_s22 = smov 3 }
 0x1f9   :  { %4065 = vrot.lane.b32.xlu2 %v4064_v39, %s6070_s4  ;;  %4249 = vrot.lane.b32.xlu1 %v4248_v33, %s6070_s4  ;;  %v5926_v13 = vld [vmem:[%s11042_s0 + $0x101] ss:$16 sm:%s4313_s6]   ;;  %v4311_v4 = vsel %vm430_vm1, %v5925_v62, %v4306_v14  ;;  %s4556_s6 = smov 12 }
 0x1fa   :  { %v5933_v38 = vld [vmem:[%s11042_s0 + $0x301] ss:$16 sm:%s4346_s8]   ;;  %v4316_v59 = vsel %vm435_vm2, %v5926_v13, %v4311_v4  ;;  %v5901_v48 = vld [vmem:[%s11042_s0 + $0x38a] ss:$16 sm:%s4194_s14]   ;;  %s4418_s14 = smov 12 }
 0x1fb   :  { %v3308_v47 = vpop.permute.xlu2 %3307   ;;  %v3285_v36 = vpop.permute.xlu1 %3284   ;;  %v5934_v34 = vld [vmem:[%s11042_s0 + $0x301] ss:$16 sm:%s4349_s26]   ;;  %s4377_s26 = smov 48  ;;  %v5902_v40 = vld [vmem:[%s11042_s0 + $0x38a] ss:$16 sm:%s4199_s5]   ;;  %v4197_v27 = vsel %vm430_vm1, %v5901_v48, %v4192_v21  ;;  %s4423_s5 = smov 48 }
 0x1fc   :  { %5709 = vst.msk [vmem:[%s11043_s1 + $0xc8] sm:$0xff] %vm3011_vm9, %v3308_v47   ;;  %v5935_v11 = vld [vmem:[%s11042_s0 + $0x301] ss:$16 sm:%s4354_s23]   ;;  %v4352_v30 = vsel %vm425_vm0, %v5934_v34, %v5933_v38  ;;  %v4202_v28 = vsel %vm435_vm2, %v5902_v40, %v4197_v27  ;;  %s4510_s23 = smov 12 }
 0x1fd   :  { %4295 = vrot.lane.b32.xlu0 %v4294_v17, %s6071_s18  ;;  %5704 = vst.msk [vmem:[%s11043_s1 + $0xa8] sm:$0xff] %vm3011_vm9, %v3285_v36   ;;  %v5936_v43 = vld [vmem:[%s11042_s0 + $0x301] ss:$16 sm:%s4359_s10]   ;;  %v4357_v25 = vsel %vm430_vm1, %v5935_v11, %v4352_v30  ;;  %s4268_s10 = smov 192 }
 0x1fe   :  { %v4362_v9 = vsel %vm435_vm2, %v5936_v43, %v4357_v25  ;;  %v5938_v23 = vld [vmem:[%s11042_s0 + $0x401] ss:$16 sm:%s4369_s11]   ;;  %v5914_v44 = vld [vmem:[%s11042_s0 + $0x68a] ss:$16 sm:%s4255_s12]   ;;  %s4566_s11 = smov 192 }
 0x1ff   :  { %v3331_v12 = vpop.permute.xlu0 %3330   ;;  %v5939_v50 = vld [vmem:[%s11042_s0 + $0x401] ss:$16 sm:%s4372_s28]   ;;  %v5915_v41 = vld [vmem:[%s11042_s0 + $0x68a] ss:$16 sm:%s4258_s27]   ;;  %s4484_s27 = smov 3  ;;  %s4395_s28 = smov 12 }
 0x200   :  { %5714 = vst.msk [vmem:[%s11043_s1 + $0x10] sm:$0xff] %vm3011_vm9, %v3331_v12   ;;  %v5940_v54 = vld [vmem:[%s11042_s0 + $0x401] ss:$16 sm:%s4377_s26]   ;;  %v4375_v55 = vsel %vm425_vm0, %v5939_v50, %v5938_v23  ;;  %v4261_v39 = vsel %vm425_vm0, %v5915_v41, %v5914_v44  ;;  %s4806_s26 = smov 3 }
 0x201   :  { %4134 = vrot.lane.b32.xlu2 %v4133_v37, %s6070_s4  ;;  %4317 = vrot.lane.b32.xlu1 %v4316_v59, %s6071_s18  ;;  %v5941_v58 = vld [vmem:[%s11042_s0 + $0x401] ss:$16 sm:%s4382_s20]   ;;  %v4380_v60 = vsel %vm430_vm1, %v5940_v54, %v4375_v55  ;;  %s4405_s20 = smov 192 }
 0x202   :  { %v5948_v56 = vld [vmem:[%s11042_s0 + $0x601] ss:$16 sm:%s4415_s3]   ;;  %v4385_v53 = vsel %vm435_vm2, %v5941_v58, %v4380_v60  ;;  %v5916_v49 = vld [vmem:[%s11042_s0 + $0x68a] ss:$16 sm:%s4263_s25]   ;;  %s4487_s25 = smov 12  ;;  %s4576_s3 = smov 3 }
 0x203   :  { %v3377_v46 = vpop.permute.xlu2 %3376   ;;  %v3354_v51 = vpop.permute.xlu1 %3353   ;;  %v5949_v63 = vld [vmem:[%s11042_s0 + $0x601] ss:$16 sm:%s4418_s14]   ;;  %s4446_s14 = smov 48  ;;  %v5917_v45 = vld [vmem:[%s11042_s0 + $0x68a] ss:$16 sm:%s4268_s10]   ;;  %v4266_v8 = vsel %vm430_vm1, %v5916_v49, %v4261_v39  ;;  %s4492_s10 = smov 48 }
 0x204   :  { %5724 = vst.msk [vmem:[%s11043_s1 + $0x50] sm:$0xff] %vm3011_vm9, %v3377_v46   ;;  %v5950_v19 = vld [vmem:[%s11042_s0 + $0x601] ss:$16 sm:%s4423_s5]   ;;  %v4421_v1 = vsel %vm425_vm0, %v5949_v63, %v5948_v56  ;;  %v4271_v33 = vsel %vm435_vm2, %v5917_v45, %v4266_v8  ;;  %s4584_s5 = smov 48 }
 0x205   :  { %4363 = vrot.lane.b32.xlu0 %v4362_v9, %s6071_s18  ;;  %5719 = vst.msk [vmem:[%s11043_s1 + $0x30] sm:$0xff] %vm3011_vm9, %v3354_v51   ;;  %v5951_v3 = vld [vmem:[%s11042_s0 + $0x601] ss:$16 sm:%s4428_s19]   ;;  %v4426_v32 = vsel %vm430_vm1, %v5950_v19, %v4421_v1  ;;  %s4336_s19 = smov 192 }
 0x206   :  { %v4431_v7 = vsel %vm435_vm2, %v5951_v3, %v4426_v32  ;;  %v5953_v2 = vld [vmem:[%s11042_s0 + $0x9] ss:$16 sm:%s4438_s13]   ;;  %v5928_v26 = vld [vmem:[%s11042_s0 + $0x201] ss:$16 sm:%s4323_s22]   ;;  %s4553_s22 = smov 3 }
 0x207   :  { %v3400_v20 = vpop.permute.xlu0 %3399   ;;  %v5954_v35 = vld [vmem:[%s11042_s0 + $0x9] ss:$16 sm:%s4441_s21]   ;;  %v5929_v31 = vld [vmem:[%s11042_s0 + $0x201] ss:$16 sm:%s4326_s7]   ;;  %s4464_s7 = smov 12 }
 0x208   :  { %5729 = vst.msk [vmem:[%s11043_s1 + $0x70] sm:$0xff] %vm3011_vm9, %v3400_v20   ;;  %v5955_v10 = vld [vmem:[%s11042_s0 + $0x9] ss:$16 sm:%s4446_s14]   ;;  %v4444_v22 = vsel %vm425_vm0, %v5954_v35, %v5953_v2  ;;  %v4329_v37 = vsel %vm425_vm0, %v5929_v31, %v5928_v26  ;;  %s4579_s14 = smov 12 }
 0x209   :  { %4203 = vrot.lane.b32.xlu2 %v4202_v28, %s6070_s4  ;;  %4386 = vrot.lane.b32.xlu1 %v4385_v53, %s6071_s18  ;;  %v5956_v15 = vld [vmem:[%s11042_s0 + $0x9] ss:$16 sm:%s4451_s15]   ;;  %v4449_v61 = vsel %vm430_vm1, %v5955_v10, %v4444_v22  ;;  %s4875_s15 = smov 3 }
 0x20a   :  { %v5963_v5 = vld [vmem:[%s11042_s0 + $0x209] ss:$16 sm:%s4484_s27]   ;;  %v4454_v57 = vsel %vm435_vm2, %v5956_v15, %v4449_v61  ;;  %v5930_v14 = vld [vmem:[%s11042_s0 + $0x201] ss:$16 sm:%s4331_s2]   ;;  %s4561_s2 = smov 48  ;;  %s4392_s27 = smov 3 }
 0x20b   :  { %v3446_v29 = vpop.permute.xlu2 %3445   ;;  %v3423_v16 = vpop.permute.xlu1 %3422   ;;  %v5964_v17 = vld [vmem:[%s11042_s0 + $0x209] ss:$16 sm:%s4487_s25]   ;;  %v5931_v13 = vld [vmem:[%s11042_s0 + $0x201] ss:$16 sm:%s4336_s19]   ;;  %v4334_v4 = vsel %vm430_vm1, %v5930_v14, %v4329_v37  ;;  %s4625_s25 = smov 12  ;;  %s4474_s19 = smov 192 }
 0x20c   :  { %5739 = vst.msk [vmem:[%s11043_s1 + $0xb0] sm:$0xff] %vm3011_vm9, %v3446_v29   ;;  %v5965_v47 = vld [vmem:[%s11042_s0 + $0x209] ss:$16 sm:%s4492_s10]   ;;  %v4490_v18 = vsel %vm425_vm0, %v5964_v17, %v5963_v5  ;;  %v4339_v59 = vsel %vm435_vm2, %v5931_v13, %v4334_v4  ;;  %s4400_s10 = smov 48 }
 0x20d   :  { %4432 = vrot.lane.b32.xlu0 %v4431_v7, %s6071_s18  ;;  %5734 = vst.msk [vmem:[%s11043_s1 + $0x90] sm:$0xff] %vm3011_vm9, %v3423_v16   ;;  %v5966_v0 = vld [vmem:[%s11042_s0 + $0x209] ss:$16 sm:%s4497_s24]   ;;  %v4495_v24 = vsel %vm430_vm1, %v5965_v47, %v4490_v18  ;;  %s4520_s24 = smov 192 }
 0x20e   :  { %v4500_v62 = vsel %vm435_vm2, %v5966_v0, %v4495_v24  ;;  %v5968_v38 = vld [vmem:[%s11042_s0 + $0x309] ss:$16 sm:%s4507_s30]   ;;  %v5943_v23 = vld [vmem:[%s11042_s0 + $0x501] ss:$16 sm:%s4392_s27]   ;;  %s4622_s27 = smov 3  ;;  %s4645_s30 = smov 3 }
 0x20f   :  { %v3469_v42 = vpop.permute.xlu0 %3468   ;;  %v5969_v12 = vld [vmem:[%s11042_s0 + $0x309] ss:$16 sm:%s4510_s23]   ;;  %v5944_v50 = vld [vmem:[%s11042_s0 + $0x501] ss:$16 sm:%s4395_s28]   ;;  %s4648_s23 = smov 12  ;;  %s4533_s28 = smov 12 }
 0x210   :  { %5744 = vst.msk [vmem:[%s11043_s1 + $0xd0] sm:$0xff] %vm3011_vm9, %v3469_v42   ;;  %v5970_v34 = vld [vmem:[%s11042_s0 + $0x309] ss:$16 sm:%s4515_s17]   ;;  %v4513_v30 = vsel %vm425_vm0, %v5969_v12, %v5968_v38  ;;  %v4398_v28 = vsel %vm425_vm0, %v5944_v50, %v5943_v23  ;;  %s4653_s17 = smov 48 }
 0x211   :  { %4272 = vrot.lane.b32.xlu2 %v4271_v33, %s6070_s4  ;;  %4455 = vrot.lane.b32.xlu1 %v4454_v57, %s6071_s18  ;;  %v5971_v43 = vld [vmem:[%s11042_s0 + $0x309] ss:$16 sm:%s4520_s24]   ;;  %v4518_v25 = vsel %vm430_vm1, %v5970_v34, %v4513_v30  ;;  %s4635_s24 = smov 192 }
 0x212   :  { %v5978_v52 = vld [vmem:[%s11042_s0 + $0x509] ss:$16 sm:%s4553_s22]   ;;  %v4523_v21 = vsel %vm435_vm2, %v5971_v43, %v4518_v25  ;;  %v5945_v55 = vld [vmem:[%s11042_s0 + $0x501] ss:$16 sm:%s4400_s10]   ;;  %s4630_s10 = smov 48  ;;  %s4461_s22 = smov 3 }
 0x213   :  { %v3515_v36 = vpop.permute.xlu2 %3514   ;;  %v3492_v11 = vpop.permute.xlu1 %3491   ;;  %v5979_v9 = vld [vmem:[%s11042_s0 + $0x509] ss:$16 sm:%s4556_s6]   ;;  %v5946_v58 = vld [vmem:[%s11042_s0 + $0x501] ss:$16 sm:%s4405_s20]   ;;  %v4403_v60 = vsel %vm430_vm1, %v5945_v55, %v4398_v28  ;;  %s4694_s6 = smov 12  ;;  %s4543_s20 = smov 192 }
 0x214   :  { %5754 = vst.msk [vmem:[%s11043_s1 + $0x38] sm:$0xff] %vm3011_vm9, %v3515_v36   ;;  %v5980_v46 = vld [vmem:[%s11042_s0 + $0x509] ss:$16 sm:%s4561_s2]   ;;  %v4559_v48 = vsel %vm425_vm0, %v5979_v9, %v5978_v52  ;;  %v4408_v53 = vsel %vm435_vm2, %v5946_v58, %v4403_v60  ;;  %s4469_s2 = smov 48 }
 0x215   :  { %4501 = vrot.lane.b32.xlu0 %v4500_v62, %s6071_s18  ;;  %5749 = vst.msk [vmem:[%s11043_s1 + $0x18] sm:$0xff] %vm3011_vm9, %v3492_v11   ;;  %v5981_v40 = vld [vmem:[%s11042_s0 + $0x509] ss:$16 sm:%s4566_s11]   ;;  %v4564_v27 = vsel %vm430_vm1, %v5980_v46, %v4559_v48  ;;  %s4589_s11 = smov 192 }
 0x216   :  { %v4569_v54 = vsel %vm435_vm2, %v5981_v40, %v4564_v27  ;;  %v5983_v56 = vld [vmem:[%s11042_s0 + $0x609] ss:$16 sm:%s4576_s3]   ;;  %v5993_v44 = vld [vmem:[%s11042_s0 + $0x181] ss:$16 sm:%s4622_s27]   ;;  %s4530_s27 = smov 3  ;;  %s4714_s3 = smov 3 }
 0x217   :  { %v3538_v6 = vpop.permute.xlu0 %3537   ;;  %v5984_v20 = vld [vmem:[%s11042_s0 + $0x609] ss:$16 sm:%s4579_s14]   ;;  %v5994_v7 = vld [vmem:[%s11042_s0 + $0x181] ss:$16 sm:%s4625_s25]   ;;  %s4717_s14 = smov 12  ;;  %s4763_s25 = smov 12 }
 0x218   :  { %5759 = vst.msk [vmem:[%s11043_s1 + $0x58] sm:$0xff] %vm3011_vm9, %v3538_v6   ;;  %v5985_v63 = vld [vmem:[%s11042_s0 + $0x609] ss:$16 sm:%s4584_s5]   ;;  %v4582_v1 = vsel %vm425_vm0, %v5984_v20, %v5983_v56  ;;  %v4628_v49 = vsel %vm425_vm0, %v5994_v7, %v5993_v44  ;;  %s4722_s5 = smov 48 }
 0x219   :  { %4340 = vrot.lane.b32.xlu2 %v4339_v59, %s6071_s18  ;;  %4524 = vrot.lane.b32.xlu1 %v4523_v21, %s6071_s18  ;;  %v5986_v3 = vld [vmem:[%s11042_s0 + $0x609] ss:$16 sm:%s4589_s11]   ;;  %v4587_v32 = vsel %vm430_vm1, %v5985_v63, %v4582_v1  ;;  %s4704_s11 = smov 192 }
 0x21a   :  { %v5995_v29 = vld [vmem:[%s11042_s0 + $0x181] ss:$16 sm:%s4630_s10]   ;;  %v4592_v39 = vsel %vm435_vm2, %v5986_v3, %v4587_v32  ;;  %v5958_v2 = vld [vmem:[%s11042_s0 + $0x109] ss:$16 sm:%s4461_s22]   ;;  %s4691_s22 = smov 3  ;;  %s4538_s10 = smov 48 }
 0x21b   :  { %v3584_v51 = vpop.permute.xlu2 %3583   ;;  %v3561_v19 = vpop.permute.xlu1 %3560   ;;  %v5996_v45 = vld [vmem:[%s11042_s0 + $0x181] ss:$16 sm:%s4635_s24]   ;;  %v4633_v8 = vsel %vm430_vm1, %v5995_v29, %v4628_v49  ;;  %v5959_v35 = vld [vmem:[%s11042_s0 + $0x109] ss:$16 sm:%s4464_s7]   ;;  %s4658_s24 = smov 192  ;;  %s4602_s7 = smov 12 }
 0x21c   :  { %5769 = vst.msk [vmem:[%s11043_s1 + $0x98] sm:$0xff] %vm3011_vm9, %v3584_v51   ;;  %v4638_v10 = vsel %vm435_vm2, %v5996_v45, %v4633_v8  ;;  %v4467_v33 = vsel %vm425_vm0, %v5959_v35, %v5958_v2  ;;  %v5960_v22 = vld [vmem:[%s11042_s0 + $0x109] ss:$16 sm:%s4469_s2]   ;;  %s4699_s2 = smov 48 }
 0x21d   :  { %4570 = vrot.lane.b32.xlu0 %v4569_v54, %s6071_s18  ;;  %5764 = vst.msk [vmem:[%s11043_s1 + $0x78] sm:$0xff] %vm3011_vm9, %v3561_v19   ;;  %v5961_v15 = vld [vmem:[%s11042_s0 + $0x109] ss:$16 sm:%s4474_s19]   ;;  %v4472_v61 = vsel %vm430_vm1, %v5960_v22, %v4467_v33  ;;  %s4612_s19 = smov 192 }
 0x21e   :  { %v5998_v5 = vld [vmem:[%s11042_s0 + $0x281] ss:$16 sm:%s4645_s30]   ;;  %v4477_v57 = vsel %vm435_vm2, %v5961_v15, %v4472_v61  ;;  %v5973_v38 = vld [vmem:[%s11042_s0 + $0x409] ss:$16 sm:%s4530_s27]   ;;  %s4760_s27 = smov 3  ;;  %s4783_s30 = smov 3 }
 0x21f   :  { %v3607_v41 = vpop.permute.xlu0 %3606   ;;  %v5999_v42 = vld [vmem:[%s11042_s0 + $0x281] ss:$16 sm:%s4648_s23]   ;;  %v5974_v12 = vld [vmem:[%s11042_s0 + $0x409] ss:$16 sm:%s4533_s28]   ;;  %s4786_s23 = smov 12  ;;  %s4671_s28 = smov 12 }
 0x220   :  { %5774 = vst.msk [vmem:[%s11043_s1 + $0xb8] sm:$0xff] %vm3011_vm9, %v3607_v41   ;;  %v6000_v17 = vld [vmem:[%s11042_s0 + $0x281] ss:$16 sm:%s4653_s17]   ;;  %v4651_v18 = vsel %vm425_vm0, %v5999_v42, %v5998_v5  ;;  %v4536_v59 = vsel %vm425_vm0, %v5974_v12, %v5973_v38  ;;  %s4791_s17 = smov 48 }
 0x221   :  { %4409 = vrot.lane.b32.xlu2 %v4408_v53, %s6071_s18  ;;  %4593 = vrot.lane.b32.xlu1 %v4592_v39, %s6071_s18  ;;  %v6001_v0 = vld [vmem:[%s11042_s0 + $0x281] ss:$16 sm:%s4658_s24]   ;;  %v4656_v24 = vsel %vm430_vm1, %v6000_v17, %v4651_v18  ;;  %s4773_s24 = smov 192 }
 0x222   :  { %v6008_v26 = vld [vmem:[%s11042_s0 + $0x481] ss:$16 sm:%s4691_s22]   ;;  %v4661_v37 = vsel %vm435_vm2, %v6001_v0, %v4656_v24  ;;  %v5975_v30 = vld [vmem:[%s11042_s0 + $0x409] ss:$16 sm:%s4538_s10]   ;;  %s4768_s10 = smov 48  ;;  %s4599_s22 = smov 3 }
 0x223   :  { %v3653_v16 = vpop.permute.xlu2 %3652   ;;  %v3630_v47 = vpop.permute.xlu1 %3629   ;;  %v6009_v62 = vld [vmem:[%s11042_s0 + $0x481] ss:$16 sm:%s4694_s6]   ;;  %v5976_v43 = vld [vmem:[%s11042_s0 + $0x409] ss:$16 sm:%s4543_s20]   ;;  %v4541_v25 = vsel %vm430_vm1, %v5975_v30, %v4536_v59  ;;  %s4832_s6 = smov 12  ;;  %s4681_s20 = smov 192 }
 0x224   :  { %3655 = vst.msk [vmem:[%s11043_s1] sm:$0xff] %vm3654_vm10, %v3653_v16   ;;  %v6010_v36 = vld [vmem:[%s11042_s0 + $0x481] ss:$16 sm:%s4699_s2]   ;;  %v4697_v14 = vsel %vm425_vm0, %v6009_v62, %v6008_v26  ;;  %v4546_v21 = vsel %vm435_vm2, %v5976_v43, %v4541_v25  ;;  %s4607_s2 = smov 48 }
 0x225   :  { %4639 = vrot.lane.b32.xlu0 %v4638_v10, %s6071_s18  ;;  %5779 = vst.msk [vmem:[%s11043_s1 + $0xd8] sm:$0xff] %vm3011_vm9, %v3630_v47   ;;  %v6011_v13 = vld [vmem:[%s11042_s0 + $0x481] ss:$16 sm:%s4704_s11]   ;;  %v4702_v4 = vsel %vm430_vm1, %v6010_v36, %v4697_v14  ;;  %s4727_s11 = smov 192 }
 0x226   :  { %v4707_v34 = vsel %vm435_vm2, %v6011_v13, %v4702_v4  ;;  %v6013_v52 = vld [vmem:[%s11042_s0 + $0x581] ss:$16 sm:%s4714_s3]   ;;  %v6023_v23 = vld [vmem:[%s11042_s0 + $0x89] ss:$16 sm:%s4760_s27]   ;;  %s4668_s27 = smov 3  ;;  %s4852_s3 = smov 3 }
 0x227   :  { %v3675_v31 = vpop.permute.xlu0 %3674   ;;  %v6014_v6 = vld [vmem:[%s11042_s0 + $0x581] ss:$16 sm:%s4717_s14]   ;;  %v6024_v54 = vld [vmem:[%s11042_s0 + $0x89] ss:$16 sm:%s4763_s25]   ;;  %s4855_s14 = smov 12  ;;  %s4901_s25 = smov 12 }
 0x228   :  { %5788 = vst.msk [vmem:[%s11043_s1 + $0x20] sm:$0xff] %vm3654_vm10, %v3675_v31   ;;  %v6015_v9 = vld [vmem:[%s11042_s0 + $0x581] ss:$16 sm:%s4722_s5]   ;;  %v4720_v48 = vsel %vm425_vm0, %v6014_v6, %v6013_v52  ;;  %v4766_v55 = vsel %vm425_vm0, %v6024_v54, %v6023_v23  ;;  %s4860_s5 = smov 48 }
 0x229   :  { %4478 = vrot.lane.b32.xlu2 %v4477_v57, %s6071_s18  ;;  %4662 = vrot.lane.b32.xlu1 %v4661_v37, %s6071_s18  ;;  %v6016_v40 = vld [vmem:[%s11042_s0 + $0x581] ss:$16 sm:%s4727_s11]   ;;  %v4725_v27 = vsel %vm430_vm1, %v6015_v9, %v4720_v48  ;;  %s4842_s11 = smov 192 }
 0x22a   :  { %v6025_v51 = vld [vmem:[%s11042_s0 + $0x89] ss:$16 sm:%s4768_s10]   ;;  %v4730_v28 = vsel %vm435_vm2, %v6016_v40, %v4725_v27  ;;  %v5988_v56 = vld [vmem:[%s11042_s0 + $0x81] ss:$16 sm:%s4599_s22]   ;;  %s4829_s22 = smov 3  ;;  %s4676_s10 = smov 48 }
 0x22b   :  { %v3721_v11 = vpop.permute.xlu2 %3720   ;;  %v3698_v46 = vpop.permute.xlu1 %3697   ;;  %v6026_v58 = vld [vmem:[%s11042_s0 + $0x89] ss:$16 sm:%s4773_s24]   ;;  %v4771_v60 = vsel %vm430_vm1, %v6025_v51, %v4766_v55  ;;  %v5989_v20 = vld [vmem:[%s11042_s0 + $0x81] ss:$16 sm:%s4602_s7]   ;;  %s4796_s24 = smov 192  ;;  %s4740_s7 = smov 12 }
 0x22c   :  { %5798 = vst.msk [vmem:[%s11043_s1 + $0x60] sm:$0xff] %vm3654_vm10, %v3721_v11   ;;  %v4776_v63 = vsel %vm435_vm2, %v6026_v58, %v4771_v60  ;;  %v4605_v53 = vsel %vm425_vm0, %v5989_v20, %v5988_v56  ;;  %v5990_v1 = vld [vmem:[%s11042_s0 + $0x81] ss:$16 sm:%s4607_s2]   ;;  %s4837_s2 = smov 48 }
 0x22d   :  { %4708 = vrot.lane.b32.xlu0 %v4707_v34, %s6071_s18  ;;  %5793 = vst.msk [vmem:[%s11043_s1 + $0x40] sm:$0xff] %vm3654_vm10, %v3698_v46   ;;  %v5991_v3 = vld [vmem:[%s11042_s0 + $0x81] ss:$16 sm:%s4612_s19]   ;;  %v4610_v32 = vsel %vm430_vm1, %v5990_v1, %v4605_v53  ;;  %s4750_s19 = smov 192 }
 0x22e   :  { %v6028_v44 = vld [vmem:[%s11042_s0 + $0x189] ss:$16 sm:%s4783_s30]   ;;  %v4615_v39 = vsel %vm435_vm2, %v5991_v3, %v4610_v32  ;;  %v6003_v5 = vld [vmem:[%s11042_s0 + $0x381] ss:$16 sm:%s4668_s27]   ;;  %s4898_s27 = smov 3 }
 0x22f   :  { %v3744_v50 = vpop.permute.xlu0 %3743   ;;  %v6029_v41 = vld [vmem:[%s11042_s0 + $0x189] ss:$16 sm:%s4786_s23]   ;;  %v6004_v42 = vld [vmem:[%s11042_s0 + $0x381] ss:$16 sm:%s4671_s28]   ;;  %s4809_s23 = smov 12 }
 0x230   :  { %5803 = vst.msk [vmem:[%s11043_s1 + $0x80] sm:$0xff] %vm3654_vm10, %v3744_v50   ;;  %v6030_v7 = vld [vmem:[%s11042_s0 + $0x189] ss:$16 sm:%s4791_s17]   ;;  %v4789_v49 = vsel %vm425_vm0, %v6029_v41, %v6028_v44  ;;  %v4674_v57 = vsel %vm425_vm0, %v6004_v42, %v6003_v5  ;;  %s4883_s17 = smov 48 }
 0x231   :  { %4547 = vrot.lane.b32.xlu2 %v4546_v21, %s6071_s18  ;;  %4731 = vrot.lane.b32.xlu1 %v4730_v28, %s6071_s18  ;;  %v6031_v45 = vld [vmem:[%s11042_s0 + $0x189] ss:$16 sm:%s4796_s24]   ;;  %v4794_v8 = vsel %vm430_vm1, %v6030_v7, %v4789_v49  ;;  %s4911_s24 = smov 192 }
 0x232   :  { %v6038_v2 = vld [vmem:[%s11042_s0 + $0x389] ss:$16 sm:%s4829_s22]   ;;  %v4799_v33 = vsel %vm435_vm2, %v6031_v45, %v4794_v8  ;;  %v6005_v18 = vld [vmem:[%s11042_s0 + $0x381] ss:$16 sm:%s4676_s10]   ;;  %s4906_s10 = smov 48  ;;  %s4737_s22 = smov 3 }
 0x233   :  { %v3790_v19 = vpop.permute.xlu2 %3789   ;;  %v3767_v29 = vpop.permute.xlu1 %3766   ;;  %v6039_v10 = vld [vmem:[%s11042_s0 + $0x389] ss:$16 sm:%s4832_s6]   ;;  %v6006_v0 = vld [vmem:[%s11042_s0 + $0x381] ss:$16 sm:%s4681_s20]   ;;  %v4679_v24 = vsel %vm430_vm1, %v6005_v18, %v4674_v57  ;;  %s4819_s6 = smov 192 }
 0x234   :  { %5813 = vst.msk [vmem:[%s11043_s1 + $0xc0] sm:$0xff] %vm3654_vm10, %v3790_v19   ;;  %v6040_v16 = vld [vmem:[%s11042_s0 + $0x389] ss:$16 sm:%s4837_s2]   ;;  %v4835_v22 = vsel %vm425_vm0, %v6039_v10, %v6038_v2  ;;  %v4684_v37 = vsel %vm435_vm2, %v6006_v0, %v4679_v24  ;;  %s4745_s2 = smov 48 }
 0x235   :  { %4777 = vrot.lane.b32.xlu0 %v4776_v63, %s6071_s18  ;;  %5808 = vst.msk [vmem:[%s11043_s1 + $0xa0] sm:$0xff] %vm3654_vm10, %v3767_v29   ;;  %v6041_v15 = vld [vmem:[%s11042_s0 + $0x389] ss:$16 sm:%s4842_s11]   ;;  %v4840_v61 = vsel %vm430_vm1, %v6040_v16, %v4835_v22  ;;  %s4865_s11 = smov 192 }
 0x236   :  { %v4845_v17 = vsel %vm435_vm2, %v6041_v15, %v4840_v61  ;;  %v6043_v26 = vld [vmem:[%s11042_s0 + $0x489] ss:$16 sm:%s4852_s3]   ;;  %v6018_v52 = vld [vmem:[%s11042_s0 + $0x681] ss:$16 sm:%s4737_s22]   ;;  %s4814_s22 = smov 48 }
 0x237   :  { %v3813_v35 = vpop.permute.xlu0 %3812   ;;  %v6044_v31 = vld [vmem:[%s11042_s0 + $0x489] ss:$16 sm:%s4855_s14]   ;;  %v6019_v6 = vld [vmem:[%s11042_s0 + $0x681] ss:$16 sm:%s4740_s7]  }
 0x238   :  { %5818 = vst.msk [vmem:[%s11043_s1 + $0x8] sm:$0xff] %vm3654_vm10, %v3813_v35   ;;  %v6045_v62 = vld [vmem:[%s11042_s0 + $0x489] ss:$16 sm:%s4860_s5]   ;;  %v4858_v14 = vsel %vm425_vm0, %v6044_v31, %v6043_v26  ;;  %v4743_v21 = vsel %vm425_vm0, %v6019_v6, %v6018_v52 }
 0x239   :  { %4616 = vrot.lane.b32.xlu2 %v4615_v39, %s6071_s18  ;;  %4800 = vrot.lane.b32.xlu1 %v4799_v33, %s6071_s18  ;;  %v6046_v13 = vld [vmem:[%s11042_s0 + $0x489] ss:$16 sm:%s4865_s11]   ;;  %v4863_v4 = vsel %vm430_vm1, %v6045_v62, %v4858_v14  ;;  %s4878_s11 = smov 12 }
 0x23a   :  { %v6053_v38 = vld [vmem:[%s11042_s0 + $0x689] ss:$16 sm:%s4898_s27]   ;;  %v4868_v59 = vsel %vm435_vm2, %v6046_v13, %v4863_v4  ;;  %v6020_v48 = vld [vmem:[%s11042_s0 + $0x681] ss:$16 sm:%s4745_s2]  }
 0x23b   :  { %v3859_v47 = vpop.permute.xlu2 %3858   ;;  %v3836_v36 = vpop.permute.xlu1 %3835   ;;  %v6054_v34 = vld [vmem:[%s11042_s0 + $0x689] ss:$16 sm:%s4901_s25]   ;;  %v6021_v40 = vld [vmem:[%s11042_s0 + $0x681] ss:$16 sm:%s4750_s19]   ;;  %v4748_v27 = vsel %vm430_vm1, %v6020_v48, %v4743_v21 }
 0x23c   :  { %5828 = vst.msk [vmem:[%s11043_s1 + $0x48] sm:$0xff] %vm3654_vm10, %v3859_v47   ;;  %v6055_v11 = vld [vmem:[%s11042_s0 + $0x689] ss:$16 sm:%s4906_s10]   ;;  %v4904_v30 = vsel %vm425_vm0, %v6054_v34, %v6053_v38  ;;  %v4753_v51 = vsel %vm435_vm2, %v6021_v40, %v4748_v27 }
 0x23d   :  { %4846 = vrot.lane.b32.xlu0 %v4845_v17, %s6071_s18  ;;  %5823 = vst.msk [vmem:[%s11043_s1 + $0x28] sm:$0xff] %vm3654_vm10, %v3836_v36   ;;  %v6056_v43 = vld [vmem:[%s11042_s0 + $0x689] ss:$16 sm:%s4911_s24]   ;;  %v4909_v25 = vsel %vm430_vm1, %v6055_v11, %v4904_v30  ;;  %s4888_s24 = smov 192 }
 0x23e   :  { %v4914_v9 = vsel %vm435_vm2, %v6056_v43, %v4909_v25  ;;  %v6033_v23 = vld [vmem:[%s11042_s0 + $0x289] ss:$16 sm:%s4806_s26]  }
 0x23f   :  { %v3882_v12 = vpop.permute.xlu0 %3881   ;;  %v6034_v50 = vld [vmem:[%s11042_s0 + $0x289] ss:$16 sm:%s4809_s23]  }
 0x240   :  { %5833 = vst.msk [vmem:[%s11043_s1 + $0x68] sm:$0xff] %vm3654_vm10, %v3882_v12   ;;  %v4812_v55 = vsel %vm425_vm0, %v6034_v50, %v6033_v23  ;;  %v6035_v58 = vld [vmem:[%s11042_s0 + $0x289] ss:$16 sm:%s4814_s22]  }
 0x241   :  { %4685 = vrot.lane.b32.xlu2 %v4684_v37, %s6071_s18  ;;  %4869 = vrot.lane.b32.xlu1 %v4868_v59, %s6071_s18  ;;  %v4817_v56 = vsel %vm430_vm1, %v6035_v58, %v4812_v55  ;;  %v6036_v20 = vld [vmem:[%s11042_s0 + $0x289] ss:$16 sm:%s4819_s6]  }
 0x242   :  { %v6048_v63 = vld [vmem:[%s11042_s0 + $0x589] ss:$16 sm:%s4875_s15]   ;;  %v4822_v1 = vsel %vm435_vm2, %v6036_v20, %v4817_v56 }
 0x243   :  { %v3928_v46 = vpop.permute.xlu2 %3927   ;;  %v3905_v54 = vpop.permute.xlu1 %3904   ;;  %v6049_v19 = vld [vmem:[%s11042_s0 + $0x589] ss:$16 sm:%s4878_s11]  }
 0x244   :  { %5843 = vst.msk [vmem:[%s11043_s1 + $0xa8] sm:$0xff] %vm3654_vm10, %v3928_v46   ;;  %v4881_v32 = vsel %vm425_vm0, %v6049_v19, %v6048_v63  ;;  %v6050_v44 = vld [vmem:[%s11042_s0 + $0x589] ss:$16 sm:%s4883_s17]  }
 0x245   :  { %4915 = vrot.lane.b32.xlu0 %v4914_v9, %s6071_s18  ;;  %5838 = vst.msk [vmem:[%s11043_s1 + $0x88] sm:$0xff] %vm3654_vm10, %v3905_v54   ;;  %v4886_v7 = vsel %vm430_vm1, %v6050_v44, %v4881_v32  ;;  %v6051_v29 = vld [vmem:[%s11042_s0 + $0x589] ss:$16 sm:%s4888_s24]  }
 0x246   :  { %v4891_v49 = vsel %vm435_vm2, %v6051_v29, %v4886_v7 }
 0x247   :  { %v3951_v28 = vpop.permute.xlu0 %3950  }
 0x248   :  { %5848 = vst.msk [vmem:[%s11043_s1 + $0xc8] sm:$0xff] %vm3654_vm10, %v3951_v28  }
 0x249   :  { %4754 = vrot.lane.b32.xlu2 %v4753_v51, %s6071_s18 }
 0x24b   :  { %v3997_v60 = vpop.permute.xlu2 %3996   ;;  %v3974_v53 = vpop.permute.xlu1 %3973  }
 0x24c   :  { %5858 = vst.msk [vmem:[%s11043_s1 + $0x30] sm:$0xff] %vm3654_vm10, %v3997_v60  }
 0x24d   :  { %5853 = vst.msk [vmem:[%s11043_s1 + $0x10] sm:$0xff] %vm3654_vm10, %v3974_v53  }
 0x24f   :  { %v4020_v3 = vpop.permute.xlu0 %4019  }
 0x250   :  { %5863 = vst.msk [vmem:[%s11043_s1 + $0x50] sm:$0xff] %vm3654_vm10, %v4020_v3  }
 0x251   :  { %4823 = vrot.lane.b32.xlu2 %v4822_v1, %s6071_s18 }
 0x253   :  { %v4066_v41 = vpop.permute.xlu2 %4065   ;;  %v4043_v39 = vpop.permute.xlu1 %4042  }
 0x254   :  { %5873 = vst.msk [vmem:[%s11043_s1 + $0x90] sm:$0xff] %vm3654_vm10, %v4066_v41  }
 0x255   :  { %5868 = vst.msk [vmem:[%s11043_s1 + $0x70] sm:$0xff] %vm3654_vm10, %v4043_v39  }
 0x257   :  { %v4089_v45 = vpop.permute.xlu0 %4088  }
 0x258   :  { %5878 = vst.msk [vmem:[%s11043_s1 + $0xb0] sm:$0xff] %vm3654_vm10, %v4089_v45  }
 0x259   :  { %4892 = vrot.lane.b32.xlu2 %v4891_v49, %s6071_s18 }
 0x25b   :  { %v4135_v8 = vpop.permute.xlu2 %4134   ;;  %v4112_v2 = vpop.permute.xlu1 %4111  }
 0x25c   :  { %5888 = vst.msk [vmem:[%s11043_s1 + $0x18] sm:$0xff] %vm3654_vm10, %v4135_v8  }
 0x25d   :  { %5883 = vst.msk [vmem:[%s11043_s1 + $0xd0] sm:$0xff] %vm3654_vm10, %v4112_v2  }
 0x25f   :  { %v4158_v35 = vpop.permute.xlu0 %4157  }
 0x260   :  { %5893 = vst.msk [vmem:[%s11043_s1 + $0x38] sm:$0xff] %vm3654_vm10, %v4158_v35  }
 0x263   :  { %v4204_v10 = vpop.permute.xlu2 %4203   ;;  %v4181_v16 = vpop.permute.xlu1 %4180  }
 0x264   :  { %5903 = vst.msk [vmem:[%s11043_s1 + $0x78] sm:$0xff] %vm3654_vm10, %v4204_v10  }
 0x265   :  { %5898 = vst.msk [vmem:[%s11043_s1 + $0x58] sm:$0xff] %vm3654_vm10, %v4181_v16  }
 0x267   :  { %v4227_v33 = vpop.permute.xlu0 %4226  }
 0x268   :  { %5908 = vst.msk [vmem:[%s11043_s1 + $0x98] sm:$0xff] %vm3654_vm10, %v4227_v33  }
 0x26b   :  { %v4273_v22 = vpop.permute.xlu2 %4272   ;;  %v4250_v15 = vpop.permute.xlu1 %4249  }
 0x26c   :  { %5918 = vst.msk [vmem:[%s11043_s1 + $0xd8] sm:$0xff] %vm3654_vm10, %v4273_v22  }
 0x26d   :  { %5913 = vst.msk [vmem:[%s11043_s1 + $0xb8] sm:$0xff] %vm3654_vm10, %v4250_v15  }
 0x26f   :  { %v4296_v61 = vpop.permute.xlu0 %4295  }
 0x270   :  { %4298 = vst.msk [vmem:[%s11043_s1] sm:$0xff] %vm4297_vm11, %v4296_v61  }
 0x273   :  { %v4341_v5 = vpop.permute.xlu2 %4340   ;;  %v4318_v42 = vpop.permute.xlu1 %4317  }
 0x274   :  { %5932 = vst.msk [vmem:[%s11043_s1 + $0x40] sm:$0xff] %vm4297_vm11, %v4341_v5  }
 0x275   :  { %5927 = vst.msk [vmem:[%s11043_s1 + $0x20] sm:$0xff] %vm4297_vm11, %v4318_v42  }
 0x277   :  { %v4364_v17 = vpop.permute.xlu0 %4363  }
 0x278   :  { %5937 = vst.msk [vmem:[%s11043_s1 + $0x60] sm:$0xff] %vm4297_vm11, %v4364_v17  }
 0x27b   :  { %v4410_v47 = vpop.permute.xlu2 %4409   ;;  %v4387_v57 = vpop.permute.xlu1 %4386  }
 0x27c   :  { %5947 = vst.msk [vmem:[%s11043_s1 + $0xa0] sm:$0xff] %vm4297_vm11, %v4410_v47  }
 0x27d   :  { %5942 = vst.msk [vmem:[%s11043_s1 + $0x80] sm:$0xff] %vm4297_vm11, %v4387_v57  }
 0x27f   :  { %v4433_v18 = vpop.permute.xlu0 %4432  }
 0x280   :  { %5952 = vst.msk [vmem:[%s11043_s1 + $0xc0] sm:$0xff] %vm4297_vm11, %v4433_v18  }
 0x283   :  { %v4479_v0 = vpop.permute.xlu2 %4478   ;;  %v4456_v24 = vpop.permute.xlu1 %4455  }
 0x284   :  { %5962 = vst.msk [vmem:[%s11043_s1 + $0x28] sm:$0xff] %vm4297_vm11, %v4479_v0  }
 0x285   :  { %5957 = vst.msk [vmem:[%s11043_s1 + $0x8] sm:$0xff] %vm4297_vm11, %v4456_v24  }
 0x287   :  { %v4502_v26 = vpop.permute.xlu0 %4501  }
 0x288   :  { %5967 = vst.msk [vmem:[%s11043_s1 + $0x48] sm:$0xff] %vm4297_vm11, %v4502_v26  }
 0x28b   :  { %v4548_v31 = vpop.permute.xlu2 %4547   ;;  %v4525_v62 = vpop.permute.xlu1 %4524  }
 0x28c   :  { %5977 = vst.msk [vmem:[%s11043_s1 + $0x88] sm:$0xff] %vm4297_vm11, %v4548_v31  }
 0x28d   :  { %5972 = vst.msk [vmem:[%s11043_s1 + $0x68] sm:$0xff] %vm4297_vm11, %v4525_v62  }
 0x28f   :  { %v4571_v36 = vpop.permute.xlu0 %4570  }
 0x290   :  { %5982 = vst.msk [vmem:[%s11043_s1 + $0xa8] sm:$0xff] %vm4297_vm11, %v4571_v36  }
 0x293   :  { %v4617_v37 = vpop.permute.xlu2 %4616   ;;  %v4594_v14 = vpop.permute.xlu1 %4593  }
 0x294   :  { %5992 = vst.msk [vmem:[%s11043_s1 + $0x10] sm:$0xff] %vm4297_vm11, %v4617_v37  }
 0x295   :  { %5987 = vst.msk [vmem:[%s11043_s1 + $0xc8] sm:$0xff] %vm4297_vm11, %v4594_v14  }
 0x297   :  { %v4640_v13 = vpop.permute.xlu0 %4639  }
 0x298   :  { %5997 = vst.msk [vmem:[%s11043_s1 + $0x30] sm:$0xff] %vm4297_vm11, %v4640_v13  }
 0x29b   :  { %v4686_v4 = vpop.permute.xlu2 %4685   ;;  %v4663_v38 = vpop.permute.xlu1 %4662  }
 0x29c   :  { %6007 = vst.msk [vmem:[%s11043_s1 + $0x70] sm:$0xff] %vm4297_vm11, %v4686_v4  }
 0x29d   :  { %6002 = vst.msk [vmem:[%s11043_s1 + $0x50] sm:$0xff] %vm4297_vm11, %v4663_v38  }
 0x29f   :  { %v4709_v12 = vpop.permute.xlu0 %4708  }
 0x2a0   :  { %6012 = vst.msk [vmem:[%s11043_s1 + $0x90] sm:$0xff] %vm4297_vm11, %v4709_v12  }
 0x2a3   :  { %v4755_v34 = vpop.permute.xlu2 %4754   ;;  %v4732_v11 = vpop.permute.xlu1 %4731  }
 0x2a4   :  { %6022 = vst.msk [vmem:[%s11043_s1 + $0xd0] sm:$0xff] %vm4297_vm11, %v4755_v34  }
 0x2a5   :  { %6017 = vst.msk [vmem:[%s11043_s1 + $0xb0] sm:$0xff] %vm4297_vm11, %v4732_v11  }
 0x2a7   :  { %v4778_v59 = vpop.permute.xlu0 %4777  }
 0x2a8   :  { %6027 = vst.msk [vmem:[%s11043_s1 + $0x18] sm:$0xff] %vm4297_vm11, %v4778_v59  }
 0x2ab   :  { %v4824_v30 = vpop.permute.xlu2 %4823   ;;  %v4801_v43 = vpop.permute.xlu1 %4800  }
 0x2ac   :  { %6037 = vst.msk [vmem:[%s11043_s1 + $0x58] sm:$0xff] %vm4297_vm11, %v4824_v30  }
 0x2ad   :  { %6032 = vst.msk [vmem:[%s11043_s1 + $0x38] sm:$0xff] %vm4297_vm11, %v4801_v43  }
 0x2af   :  { %v4847_v25 = vpop.permute.xlu0 %4846  }
 0x2b0   :  { %6042 = vst.msk [vmem:[%s11043_s1 + $0x78] sm:$0xff] %vm4297_vm11, %v4847_v25  }
 0x2b3   :  { %v4893_v52 = vpop.permute.xlu2 %4892   ;;  %v4870_v6 = vpop.permute.xlu1 %4869  }
 0x2b4   :  { %6052 = vst.msk [vmem:[%s11043_s1 + $0xb8] sm:$0xff] %vm4297_vm11, %v4893_v52  }
 0x2b5   :  { %6047 = vst.msk [vmem:[%s11043_s1 + $0x98] sm:$0xff] %vm4297_vm11, %v4870_v6  }
 0x2b7   :  { %v4916_v9 = vpop.permute.xlu0 %4915  }
 0x2b8   :  { %6057 = vst.msk [vmem:[%s11043_s1 + $0xd8] sm:$0xff] %vm4297_vm11, %v4916_v9  }

// kernel: sliding_pos_biases.1
= control target key start
LH: loop header
LB: loop body
LE: loop exit
PB: predicated region body
PF: predicated region fallthrough
CT: control target
= control target key end

     0   :  { %7 = vsyncpa [#allocation3], 0  ;;  %s1031_s0 = inlined_call_operand.vmem [shape: f32[7,16,256], index: 0, kind: input, shape index: {}]   ;;  %s1032_s1 = inlined_call_operand.vmem [shape: s32[1,256], index: 1, kind: input, shape index: {}]   ;;  %s1033_s2 = inlined_call_operand.hbm [shape: f32[256,256], index: 2, kind: output, shape index: {}]  }
   0x1   :  { %9 = vsyncpa [#allocation3 + $0x1], 0  ;;  %s646_s9 = smov 0   ;;  %s648_s10 = smov 0  }
   0x2   :  { %s650_s11 = smov 0   ;;  %s652_s12 = smov 0  }
   0x3   :  { %s654_s13 = smov 0   ;;  %s656_s14 = smov 0  }
   0x4 LB: > { %s426_s15 = sadd.s32 4294967295, %s621_s14   ;;  %s427_s16 = sadd.s32 4294967294, %s621_s14   ;;  %s621_s14 = sphi %s656_s14, %s15_s14   ;;  %s617_s13 = sphi %s654_s13, %s1070_s13   ;;  %s613_s12 = sphi %s652_s12, %s1069_s12   ;;  %s609_s11 = sphi %s650_s11, %s1068_s11   ;;  %s605_s10 = sphi %s648_s10, %s1067_s10   ;;  %s601_s9 = sphi %s646_s9, %s1066_s9  }
   0x5   : > { %s27_s17 = sadd.s32 1, %s617_s13  ;;  %s83_s18 = sadd.s32 1, %s609_s11 }
   0x6   : > { %p29_p0 = scmp.ge.s32.totalorder %s27_s17, 2  ;;  %p93_p1 = scmp.ne.s32.totalorder %s609_s11, %s605_s10 }
   0x7   : > { %p94_p2 = scmp.eq.s32.totalorder %s426_s15, 1  ;;  %p99_p3 = scmp.ne.s32.totalorder %s605_s10, %s601_s9 }
   0x8   : > { %s1072_s17 = smov (%p29_p0, %s27_s17), 0  ;;  %p100_p5 = scmp.eq.s32.totalorder %s427_s16, 1 }
   0x9   : > { %p686_p4 = por %p94_p2, %p93_p1  ;;  %s78_s20 = ssub.s32 %s617_s13, %s1072_s17 }
   0xa   : > { %p430_p6 = scmp.ge.s32.totalorder %s621_s14, 1  ;;  %p81_p7 = scmp.eq.s32.totalorder %s78_s20, 0 }
   0xb   : > { %p693_p8 = por %p100_p5, %p99_p3  ;;  %p129_p9 = scmp.lt.s32.totalorder %s621_s14, 3 }
   0xc   : > { %s699_s22 = scalar_select %p81_p7, %s609_s11, %s83_s18  }
   0xd   : > { %p130_p10 = pnand %p430_p6, %p129_p9 }
   0xe   : > { %s147_s23 = sand.u32 (!%p130_p10), 1, %s605_s10   ;;  %s703_s24 = sshll.u32 (!%p130_p10), %s613_s12, 3 }
   0xf   : > { %133 = sbr.rel (%p130_p10) target bundleno = 101 (0x65), region = 28  ;;  %s431_s25 = sshll.u32 (!%p130_p10), %s147_s23, 8 }
  0x10   : > { %s433_s26 = sadd.s32 (!%p130_p10), 4294967293, %s703_s24  ;;  %s162_s28 = sadd.s32 (!%p130_p10), 10, %s703_s24 }
  0x11   : > { %p708_p11 = scmp.le.s32.totalorder (!%p130_p10), %s433_s26, 15  ;;  %p713_p12 = scmp.ge.s32.totalorder (!%p130_p10), %s162_s28, 0 }
  0x12   : > { %s721_s30 = scalar_lea.vmem (!%p130_p10), [#allocation2], %s431_s25 }
  0x13   : > { %p164_p13 = pnand (!%p130_p10), %p713_p12, %p708_p11 }
  0x14   : > { %s733_s5 = smov (!%p164_p13), 0  }
  0x15   : > { %167 = sbr.rel (%p164_p13) target bundleno = 52 (0x34), region = 32 }
  0x1a   : > { %v731_v0 = vld [vmem:[%s1032_s1] sm:$0x3] }
  0x1b LB: >> { %s175_s6 = sadd.s32 %s625_s5, %s703_s24  ;;  %s460_s7 = sshll.u32 %s625_s5, 4  ;;  %v627_v3 = vmov 0   ;;  %v179_v8 = vld [vmem:[%s1031_s0] sm:$0xff]  ;;  %v180_v30 = vld [vmem:[%s1031_s0 + $0x8] sm:$0xff]  ;;  %v181_v47 = vld [vmem:[%s1031_s0 + $0x10] sm:$0xff]  ;;  %s625_s5 = sphi %s733_s5, %s174_s5  }
  0x1c   : >> { %v176_v1 = vstv %s175_s6  ;;  %v436_v13 = vld [vmem:[%s1031_s0 + $0x20] sm:$0xff]  ;;  %s751_s20 = sshra.s32 %s460_s7, 3  ;;  %v437_v34 = vld [vmem:[%s1031_s0 + $0x28] sm:$0xff]  ;;  %v182_v48 = vld [vmem:[%s1031_s0 + $0x18] sm:$0xff]  ;;  %s174_s5 = sadd.s32 1, %s625_s5  }
  0x1d   : >> { %v177_v2 = vsub.s32 %v731_v0, %v176_v1  ;;  %v440_v17 = vld [vmem:[%s1031_s0 + $0x40] sm:$0xff]  ;;  %s469_s7 = sshll.u32 %s751_s20, 4  ;;  %v441_v42 = vld [vmem:[%s1031_s0 + $0x48] sm:$0xff]  ;;  %v438_v55 = vld [vmem:[%s1031_s0 + $0x30] sm:$0xff]  ;;  %p171_p0 = scmp.ge.s32.totalorder %s174_s5, 8  }
  0x1e   : >> { %v444_v21 = vld [vmem:[%s1031_s0 + $0x60] sm:$0xff]  ;;  %s821_s6 = scalar_lea.vmem %s721_s30, %s469_s7 [#allocation2]  ;;  %v445_v51 = vld [vmem:[%s1031_s0 + $0x68] sm:$0xff]  ;;  %v442_v61 = vld [vmem:[%s1031_s0 + $0x50] sm:$0xff] }
  0x1f   : >> { %vm178_vm0 = vcmp.eq.s32.totalorder %v177_v2, 4294967293  ;;  %vm192_vm1 = vcmp.eq.s32.totalorder %v177_v2, 4294967294  ;;  %vm207_vm2 = vcmp.eq.s32.totalorder %v177_v2, 4294967295  ;;  %vm222_vm3 = vcmp.eq.s32.totalorder %v177_v2, 0  ;;  %v448_v26 = vld [vmem:[%s1031_s0 + $0x80] sm:$0xff]  ;;  %v449_v53 = vld [vmem:[%s1031_s0 + $0x88] sm:$0xff] }
  0x20   : >> { %v183_v4 = vsel %vm178_vm0, 1, %v627_v3  ;;  %v198_v5 = vsel %vm192_vm1, 1, %v627_v3  ;;  %v213_v6 = vsel %vm207_vm2, 1, %v627_v3  ;;  %v742_v7 = vsel %vm222_vm3, 1, %v627_v3  ;;  %v452_v32 = vld [vmem:[%s1031_s0 + $0xa0] sm:$0xff]  ;;  %v453_v58 = vld [vmem:[%s1031_s0 + $0xa8] sm:$0xff] }
  0x21   : >> { %v184_v9 = vperm.slane %v183_v4, 0  ;;  %v199_v10 = vperm.slane %v198_v5, 0  ;;  %v214_v11 = vperm.slane %v213_v6, 0  ;;  %v229_v12 = vperm.slane %v742_v7, 0  ;;  %v456_v40 = vld [vmem:[%s1031_s0 + $0xc0] sm:$0xff]  ;;  %v439_v62 = vld [vmem:[%s1031_s0 + $0x38] sm:$0xff] }
  0x22   : >> { %vm237_vm4 = vcmp.eq.s32.totalorder %v177_v2, 1  ;;  %vm252_vm5 = vcmp.eq.s32.totalorder %v177_v2, 2  ;;  %vm267_vm6 = vcmp.eq.s32.totalorder %v177_v2, 3  ;;  %v185_v14 = vperm.slane %v183_v4, 1  ;;  %v454_v15 = vld [vmem:[%s1031_s0 + $0xb0] sm:$0xff] }
  0x23   : >> { %vm753_vm7 = vcmp.eq.s32.totalorder %v184_v9, 1  ;;  %vm757_vm8 = vcmp.eq.s32.totalorder %v199_v10, 1  ;;  %vm764_vm9 = vcmp.eq.s32.totalorder %v214_v11, 1  ;;  %vm768_vm10 = vcmp.eq.s32.totalorder %v229_v12, 1  ;;  %v450_v11 = vld [vmem:[%s1031_s0 + $0x90] sm:$0xff]  ;;  %v447_v12 = vld [vmem:[%s1031_s0 + $0x78] sm:$0xff] }
  0x24   : >> { %v188_v20 = vsel %vm753_vm7, %v179_v8, 0.0  ;;  %v243_v22 = vsel %vm237_vm4, 1, %v627_v3  ;;  %v258_v23 = vsel %vm252_vm5, 1, %v627_v3  ;;  %v273_v24 = vsel %vm267_vm6, 1, %v627_v3  ;;  %v446_v3 = vld [vmem:[%s1031_s0 + $0x70] sm:$0xff]  ;;  %v457_v8 = vld [vmem:[%s1031_s0 + $0xc8] sm:$0xff] }
  0x25   : >> { %v203_v25 = vsel %vm757_vm8, %v436_v13, %v188_v20  ;;  %v244_v27 = vperm.slane %v243_v22, 0  ;;  %v259_v28 = vperm.slane %v258_v23, 0  ;;  %v274_v29 = vperm.slane %v273_v24, 0 }
  0x26   : >> { %v218_v31 = vsel %vm764_vm9, %v440_v17, %v203_v25  ;;  %vm791_vm11 = vcmp.eq.s32.totalorder %v185_v14, 1  ;;  %v200_v35 = vperm.slane %v198_v5, 1  ;;  %v215_v36 = vperm.slane %v213_v6, 1  ;;  %v443_v5 = vld [vmem:[%s1031_s0 + $0x58] sm:$0xff] }
  0x27   : >> { %v233_v37 = vsel %vm768_vm10, %v444_v21, %v218_v31  ;;  %vm800_vm12 = vcmp.eq.s32.totalorder %v244_v27, 1  ;;  %vm804_vm13 = vcmp.eq.s32.totalorder %v259_v28, 1  ;;  %vm811_vm14 = vcmp.eq.s32.totalorder %v274_v29, 1  ;;  %v451_v17 = vld [vmem:[%s1031_s0 + $0x98] sm:$0xff]  ;;  %v458_v21 = vld [vmem:[%s1031_s0 + $0xd0] sm:$0xff] }
  0x28   : >> { %v248_v43 = vsel %vm800_vm12, %v448_v26, %v233_v37  ;;  %v189_v44 = vsel %vm791_vm11, %v180_v30, 0.0  ;;  %vm825_vm15 = vcmp.eq.s32.totalorder %v200_v35, 1  ;;  %vm829_vm0 = vcmp.eq.s32.totalorder %v215_v36, 1  ;;  %v459_v26 = vld [vmem:[%s1031_s0 + $0xd8] sm:$0xff] }
  0x29   : >> { %v263_v49 = vsel %vm804_vm13, %v452_v32, %v248_v43  ;;  %v204_v50 = vsel %vm825_vm15, %v437_v34, %v189_v44  ;;  %v230_v52 = vperm.slane %v742_v7, 1  ;;  %v245_v54 = vperm.slane %v243_v22, 1 }
  0x2a   : >> { %v278_v56 = vsel %vm811_vm14, %v456_v40, %v263_v49  ;;  %v219_v57 = vsel %vm829_vm0, %v441_v42, %v204_v50  ;;  %v260_v59 = vperm.slane %v258_v23, 1  ;;  %v275_v60 = vperm.slane %v273_v24, 1  ;;  %v455_v23 = vld [vmem:[%s1031_s0 + $0xb8] sm:$0xff] }
  0x2b   : >> { %288 = vst [vmem:[%s821_s6] sm:$0xff] %v278_v56  ;;  %vm867_vm1 = vcmp.eq.s32.totalorder %v230_v52, 1  ;;  %vm871_vm2 = vcmp.eq.s32.totalorder %v245_v54, 1  ;;  %v190_v2 = vsel %vm753_vm7, %v181_v47, 0.0  ;;  %v191_v4 = vsel %vm791_vm11, %v182_v48, 0.0 }
  0x2c   : >> { %v234_v6 = vsel %vm867_vm1, %v445_v51, %v219_v57  ;;  %vm887_vm3 = vcmp.eq.s32.totalorder %v260_v59, 1  ;;  %vm894_vm4 = vcmp.eq.s32.totalorder %v275_v60, 1  ;;  %v205_v10 = vsel %vm757_vm8, %v438_v55, %v190_v2 }
  0x2d   : >> { %v249_v13 = vsel %vm871_vm2, %v449_v53, %v234_v6  ;;  %v220_v14 = vsel %vm764_vm9, %v442_v61, %v205_v10  ;;  %v206_v16 = vsel %vm825_vm15, %v439_v62, %v191_v4 }
  0x2e   : >> { %v264_v20 = vsel %vm887_vm3, %v453_v58, %v249_v13  ;;  %v235_v18 = vsel %vm768_vm10, %v446_v3, %v220_v14  ;;  %v221_v22 = vsel %vm829_vm0, %v443_v5, %v206_v16 }
  0x2f   : >> { %v279_v24 = vsel %vm894_vm4, %v457_v8, %v264_v20  ;;  %v250_v25 = vsel %vm800_vm12, %v450_v11, %v235_v18  ;;  %v236_v19 = vsel %vm867_vm1, %v447_v12, %v221_v22  ;;  %173 = sbr.rel (!%p171_p0) target bundleno = 27 (0x1b), region = 85 }
  0x30   : >> { %289 = vst [vmem:[%s821_s6 + $0x8] sm:$0xff] %v279_v24  ;;  %v265_v27 = vsel %vm804_vm13, %v454_v15, %v250_v25  ;;  %v251_v28 = vsel %vm871_vm2, %v451_v17, %v236_v19 }
  0x31   : >> { %v280_v29 = vsel %vm811_vm14, %v458_v21, %v265_v27  ;;  %v266_v30 = vsel %vm887_vm3, %v455_v23, %v251_v28 }
  0x32   : >> { %290 = vst [vmem:[%s821_s6 + $0x10] sm:$0xff] %v280_v29  ;;  %v281_v31 = vsel %vm894_vm4, %v459_v26, %v266_v30 }
  0x33   : >> { %291 = vst [vmem:[%s821_s6 + $0x18] sm:$0xff] %v281_v31 }
  0x34 PF: > { %294 = sbr.rel (!%p164_p13) target bundleno = 85 (0x55), region = 43  ;;  %v628_v32 = vmov (%p164_p13), 0.0  }
  0x35   : > { %295 = vst [vmem:[%s721_s30] sm:$0xff] (%p164_p13), %v628_v32 }
  0x36   : > { %296 = vst [vmem:[%s721_s30 + $0x8] sm:$0xff] (%p164_p13), %v628_v32 }
  0x37   : > { %297 = vst [vmem:[%s721_s30 + $0x10] sm:$0xff] (%p164_p13), %v628_v32 }
  0x38   : > { %298 = vst [vmem:[%s721_s30 + $0x18] sm:$0xff] (%p164_p13), %v628_v32 }
  0x39   : > { %299 = vst [vmem:[%s721_s30 + $0x20] sm:$0xff] %v628_v32 }
  0x3a   : > { %300 = vst [vmem:[%s721_s30 + $0x28] sm:$0xff] %v628_v32 }
  0x3b   : > { %301 = vst [vmem:[%s721_s30 + $0x30] sm:$0xff] %v628_v32 }
  0x3c   : > { %302 = vst [vmem:[%s721_s30 + $0x38] sm:$0xff] %v628_v32 }
  0x3d   : > { %303 = vst [vmem:[%s721_s30 + $0x40] sm:$0xff] %v628_v32 }
  0x3e   : > { %304 = vst [vmem:[%s721_s30 + $0x48] sm:$0xff] %v628_v32 }
  0x3f   : > { %305 = vst [vmem:[%s721_s30 + $0x50] sm:$0xff] %v628_v32 }
  0x40   : > { %306 = vst [vmem:[%s721_s30 + $0x58] sm:$0xff] %v628_v32 }
  0x41   : > { %307 = vst [vmem:[%s721_s30 + $0x60] sm:$0xff] %v628_v32 }
  0x42   : > { %308 = vst [vmem:[%s721_s30 + $0x68] sm:$0xff] %v628_v32 }
  0x43   : > { %309 = vst [vmem:[%s721_s30 + $0x70] sm:$0xff] %v628_v32 }
  0x44   : > { %310 = vst [vmem:[%s721_s30 + $0x78] sm:$0xff] %v628_v32 }
  0x45   : > { %311 = vst [vmem:[%s721_s30 + $0x80] sm:$0xff] %v628_v32 }
  0x46   : > { %312 = vst [vmem:[%s721_s30 + $0x88] sm:$0xff] %v628_v32 }
  0x47   : > { %313 = vst [vmem:[%s721_s30 + $0x90] sm:$0xff] %v628_v32 }
  0x48   : > { %314 = vst [vmem:[%s721_s30 + $0x98] sm:$0xff] %v628_v32 }
  0x49   : > { %315 = vst [vmem:[%s721_s30 + $0xa0] sm:$0xff] %v628_v32 }
  0x4a   : > { %316 = vst [vmem:[%s721_s30 + $0xa8] sm:$0xff] %v628_v32 }
  0x4b   : > { %317 = vst [vmem:[%s721_s30 + $0xb0] sm:$0xff] %v628_v32 }
  0x4c   : > { %318 = vst [vmem:[%s721_s30 + $0xb8] sm:$0xff] %v628_v32 }
  0x4d   : > { %319 = vst [vmem:[%s721_s30 + $0xc0] sm:$0xff] %v628_v32 }
  0x4e   : > { %320 = vst [vmem:[%s721_s30 + $0xc8] sm:$0xff] %v628_v32 }
  0x4f   : > { %321 = vst [vmem:[%s721_s30 + $0xd0] sm:$0xff] %v628_v32 }
  0x50   : > { %322 = vst [vmem:[%s721_s30 + $0xd8] sm:$0xff] %v628_v32 }
  0x51   : > { %323 = vst [vmem:[%s721_s30 + $0xe0] sm:$0xff] %v628_v32 }
  0x52   : > { %324 = vst [vmem:[%s721_s30 + $0xe8] sm:$0xff] %v628_v32 }
  0x53   : > { %325 = vst [vmem:[%s721_s30 + $0xf0] sm:$0xff] %v628_v32 }
  0x54   : > { %326 = vst [vmem:[%s721_s30 + $0xf8] sm:$0xff] %v628_v32 }
  0x55 PF: > { %s471_s24 = sshll.u32 %s613_s12, 8  ;;  %s343_s6 = sshll.u32 %s721_s30, 4  ;;  %s344_s6 = int_to_ptr.vmem [resolvable:$true] %s343_s6 }
  0x56   : > { %s342_s5 = scalar_lea.hbm %s1033_s2, %s471_s24  ;;  %s328_s7 = scalar_lea.sflag [#allocation3], %s147_s23 }
  0x57   : > { %s345_s18 = sshll.u32 %s342_s5, 4  ;;  %s559_s12 = scalar_lea.hbm %s1033_s2, 512  ;;  %s346_s18 = int_to_ptr.hbm [resolvable:$true] %s345_s18 }
  0x58   : > { %s553_s25 = sshra.s32 %s346_s18, 4  ;;  %s554_s25 = int_to_ptr.hbm [resolvable:$true] %s553_s25 }
  0x59   : > { %s555_s26 = scalar_lea.hbm %s554_s25, 256  ;;  %p560_p5 = scmp.lt.s32.totalorder %s554_s25, %s1033_s2 }
  0x5a   : > { %p556_p1 = scmp.ne.s32.totalorder %s554_s25, %s555_s26  ;;  %p561_p6 = scmp.lt.s32.totalorder %s559_s12, %s555_s26 }
  0x5c   : > { %p557_p2 = pnand %p556_p1, %p686_p4  ;;  %p562_p7 = por %p561_p6, %p560_p5 }
  0x5e   : > { %p558_p3 = pneg %p557_p2 }
  0x60   : > { %p563_p9 = pnand %p562_p7, %p558_p3 }
  0x62   : > { %566 = shalt.err (!%p563_p9)
}
  0x63   : > { %s629_s23 = smov 256   ;;  %s630_s30 = smov 16  }
  0x64   : > { %472 = dma.vmem_to_hbm [thread:$0]  (%p686_p4), %s344_s6, 4096, %s346_s18, %s328_s7, %s629_s23, %s629_s23, %s630_s30  }
  0x65 PF: > { %p478_p10 = scmp.ge.s32.totalorder %s621_s14, 2  ;;  %s360_s8 = sand.u32 1, %s601_s9  }
  0x66   : > { %s361_s15 = scalar_lea.sflag [#allocation3], %s360_s8 }
  0x67   : > { %p475_p11 = pnand %p478_p10, %p693_p8 }
  0x69   : > { %p476_p12 = pneg %p475_p11 }
  0x6b   : > { %596 = dma.done.wait (%p476_p12), %s361_s15, 4096  }
  0x6c   : > { %598 = vsyncadd (%p476_p12), %s361_s15, 4294963200  ;;  %s15_s14 = sadd.s32 1, %s621_s14   ;;  %s1066_s9 = smov %s605_s10 }
  0x6d   : > { %p12_p13 = scmp.ge.s32.totalorder %s15_s14, 4   ;;  %s1067_s10 = smov %s609_s11 }
  0x6e   : > { %s1068_s11 = smov %s699_s22  ;;  %s1069_s12 = smov %s617_s13 }
  0x6f   : > { %s1070_s13 = smov %s1072_s17  ;;  %14 = sbr.rel (!%p12_p13) target bundleno = 4 (0x4), region = 96 }
  0x74   :  { %367 = vsyncpa [#allocation3], 1 }
  0x75   :  { %369 = vsyncpa [#allocation3 + $0x1], 1 }

</bundles_post_ra>
